<compile_context>
chip_gen: v5e
topology: v5e:2x2
jax: 0.10.0
libtpu: 0.0.40
codegen_flags: <defaults>
</compile_context>

<pallas_src>
import functools

import jax
import jax.numpy as jnp
from jax.experimental import pallas as pl
from jax.experimental.pallas import tpu as pltpu

NEG_SLOPE = 0.2  # LeakyReLU(0.2)


def _leaky_relu(v):
    return jnp.where(v > 0, v, NEG_SLOPE * v)


def _softplus_sym(z):
    # softplus(z) + softplus(-z) computed stably: |z| + 2*log1p(exp(-|z|))
    a = jnp.abs(z)
    return a + 2.0 * jnp.log1p(jnp.exp(-a))


def _round_up(n, m):
    return ((n + m - 1) // m) * m


def _pad_to(a, shape):
    return jnp.pad(a, [(0, t - s) for s, t in zip(a.shape, shape)])


def nice_forward_kernel(*refs, num_coupling_layers, num_hidden, valid_d):
    if num_hidden > 0:
        (x_ref, w_in_ref, b_in_ref, w_hid_ref, b_hid_ref,
         w_out_ref, b_out_ref, scale_ref, z_ref, lp_ref, zpad_ref) = refs
    else:
        (x_ref, w_in_ref, b_in_ref,
         w_out_ref, b_out_ref, scale_ref, z_ref, lp_ref, zpad_ref) = refs
        w_hid_ref = b_hid_ref = None

    # x arrives unpadded (tile_b, D); zero-pad it to 128 lanes via the VMEM
    # scratch.  Re-zeroed every step (cheap VMEM stores) so correctness does
    # not depend on which TensorCore ran which grid step under "parallel".
    zpad_ref[...] = jnp.zeros_like(zpad_ref)
    zpad_ref[:, :valid_d] = x_ref[...].astype(jnp.float32)
    z = zpad_ref[...]                                        # (tile_b, D_pad)

    # Coupling layers, statically unrolled (C and num_hidden are small here).
    # Masks are already folded into w_in / w_out / b_out (wrapper), so the
    # additive coupling update is simply z += m(z).  Padded lanes of z stay
    # exactly 0 because padded weight columns / biases are zero.
    # For large C switch to lax.fori_loop to bound vreg live ranges.
    for c in range(num_coupling_layers):
        h = jnp.dot(z.astype(jnp.bfloat16), w_in_ref[c],
                    preferred_element_type=jnp.float32) + b_in_ref[c]
        h = _leaky_relu(h)
        for l in range(num_hidden):
            h = jnp.dot(h.astype(jnp.bfloat16), w_hid_ref[c, l],
                        preferred_element_type=jnp.float32) + b_hid_ref[c, l]
            h = _leaky_relu(h)
        m_out = jnp.dot(h.astype(jnp.bfloat16), w_out_ref[c],
                        preferred_element_type=jnp.float32) + b_out_ref[c]
        z = z + m_out

    # Scaling layer; scale = exp(log_scale) precomputed in the wrapper with
    # zeros in the pad lanes, so z_scaled is exactly 0 there.
    z_scaled = scale_ref[...] * z                            # (tile_b, D_pad)
    z_ref[...] = z_scaled

    # Logistic prior log-prob, reduced in-kernel to a (tile_b, 1) column.
    # Pad lanes would hold softplus_sym(0) = 2*ln2, so mask them before the
    # row-sum (scalar log-det is a parameter constant, added in the wrapper).
    lp = _softplus_sym(z_scaled)
    col = jax.lax.broadcasted_iota(jnp.int32, lp.shape, 1)
    lp = jnp.where(col < valid_d, lp, 0.0)
    lp_ref[...] = -jnp.sum(lp, axis=1, keepdims=True)        # (tile_b, 1)


def nice_forward(x, params, *, tile_b=1024):
    masks, w_in, b_in, w_hid, b_hid, w_out, b_out, log_scale = params
    B, D = x.shape
    C = masks.shape[0]
    num_hidden = w_hid.shape[1]
    H = w_in.shape[2]

    D_pad = _round_up(D, 128)
    H_pad = _round_up(H, 128)

    # Big batch tiles amortize the ~0.35 us/step overhead; but keep >= 2 grid
    # steps when B allows so the "parallel" axis spans both v7x TensorCores.
    tile_b = max(8, _round_up(min(tile_b, B), 8))
    if B > 8 and _round_up(B, tile_b) // tile_b < 2:
        tile_b = _round_up((B + 1) // 2, 8)
    B_pad = _round_up(B, tile_b)
    grid = (B_pad // tile_b,)

    # Fold the 0/1 coupling masks into the weights (exact, since mask in {0,1}):
    #   (mask*z) @ W_in            == z @ (mask[:,None] * W_in)
    #   (h @ W_out + b_out)*(1-m)  == h @ (W_out*(1-m)) + b_out*(1-m)
    mask = masks.reshape(C, D)
    one_m = 1.0 - mask
    w_in_f = w_in * mask[:, :, None]
    w_out_f = w_out * one_m[:, None, :]
    b_out_f = b_out * one_m[:, None, :]
    scale = jnp.exp(log_scale)                    # parameter constant

    # Trace-time repacking: pad weight dims to lane/MXU granularity, pre-cast
    # matmul weights to bf16 (biases / scale stay f32 for the VPU/EUP path).
    # x stays UNPADDED in D (only rows padded to the tile); it is lane-padded
    # inside the kernel.
    x_p = _pad_to(x.astype(jnp.float32), (B_pad, D))
    w_in_p = _pad_to(w_in_f, (C, D_pad, H_pad)).astype(jnp.bfloat16)
    b_in_p = _pad_to(b_in, (C, 1, H_pad))
    w_out_p = _pad_to(w_out_f, (C, H_pad, D_pad)).astype(jnp.bfloat16)
    b_out_p = _pad_to(b_out_f, (C, 1, D_pad))
    scale_p = _pad_to(scale, (1, D_pad))          # pad lanes = 0

    def resident(shape):
        # Small parameter array; same block for every grid step -> stays VMEM
        # resident (no re-DMA across the batch grid).
        # TODO(synk): for large C/H add pipeline_mode=pl.Buffered(1) or stream
        # per coupling layer with pltpu.emit_pipeline (v7x: only 64 MiB VMEM).
        nd = len(shape)
        return pl.BlockSpec(shape, lambda i, _nd=nd: (0,) * _nd)

    x_spec = pl.BlockSpec((tile_b, D), lambda i: (i, 0))       # full-extent D
    z_spec = pl.BlockSpec((tile_b, D_pad), lambda i: (i, 0))   # lane-dense
    lp_spec = pl.BlockSpec((tile_b, 1), lambda i: (i, 0))      # reduced output

    args = [x_p, w_in_p, b_in_p]
    in_specs = [x_spec, resident(w_in_p.shape), resident(b_in_p.shape)]
    if num_hidden > 0:
        w_hid_p = _pad_to(w_hid, (C, num_hidden, H_pad, H_pad)).astype(jnp.bfloat16)
        b_hid_p = _pad_to(b_hid, (C, num_hidden, 1, H_pad))
        args += [w_hid_p, b_hid_p]
        in_specs += [resident(w_hid_p.shape), resident(b_hid_p.shape)]
    args += [w_out_p, b_out_p, scale_p]
    in_specs += [resident(w_out_p.shape), resident(b_out_p.shape),
                 resident(scale_p.shape)]

    kernel = functools.partial(nice_forward_kernel, num_coupling_layers=C,
                               num_hidden=num_hidden, valid_d=D)

    z_p, lp_p = pl.pallas_call(
        kernel,
        grid=grid,
        out_shape=(jax.ShapeDtypeStruct((B_pad, D_pad), jnp.float32),
                   jax.ShapeDtypeStruct((B_pad, 1), jnp.float32)),
        in_specs=in_specs,
        out_specs=(z_spec, lp_spec),
        scratch_shapes=[pltpu.VMEM((tile_b, D_pad), jnp.float32)],
        compiler_params=pltpu.CompilerParams(
            dimension_semantics=("parallel",)),
    )(*args)

    z = z_p[:B, :D]
    log_det = jnp.sum(log_scale)        # scalar parameter constant, hoisted
    ll = lp_p[:B, 0] + log_det
    return z, ll


def nice_forward_ref(x, params, *, matmul_dtype=jnp.float32):
    """Pure-JAX reference mirroring the PyTorch NICE.forward semantics.

    matmul_dtype=bfloat16 mirrors the kernel's bf16 MXU inputs (f32 accumulate).
    """
    masks, w_in, b_in, w_hid, b_hid, w_out, b_out, log_scale = params
    C = masks.shape[0]
    num_hidden = w_hid.shape[1]

    def mm(a, w):
        return jnp.dot(a.astype(matmul_dtype), w.astype(matmul_dtype),
                       preferred_element_type=jnp.float32)

    z = x.astype(jnp.float32)
    for c in range(C):
        mask = masks[c]
        x1 = mask * z
        h = _leaky_relu(mm(x1, w_in[c]) + b_in[c])
        for l in range(num_hidden):
            h = _leaky_relu(mm(h, w_hid[c, l]) + b_hid[c, l])
        m_out = mm(h, w_out[c]) + b_out[c]
        z = z + m_out * (1.0 - mask)
    z_scaled = jnp.exp(log_scale) * z
    log_det = jnp.sum(log_scale)
    log_prob = -(jax.nn.softplus(z_scaled) + jax.nn.softplus(-z_scaled))
    ll = jnp.sum(log_prob, axis=1) + log_det
    return z_scaled, ll


def make_params(key, input_dim, hidden_dim, num_coupling_layers, num_layers):
    """Deterministic synthetic parameter init (shapes match NICE.__init__).

    Linear weights are pre-transposed to (in_features, out_features).
    """
    D, H, C = input_dim, hidden_dim, num_coupling_layers
    num_hidden = num_layers - 2
    ks = jax.random.split(key, 7)
    scale = 0.1
    w_in = scale * jax.random.normal(ks[0], (C, D, H), jnp.float32)
    b_in = scale * jax.random.normal(ks[1], (C, 1, H), jnp.float32)
    w_hid = scale * jax.random.normal(ks[2], (C, num_hidden, H, H), jnp.float32)
    b_hid = scale * jax.random.normal(ks[3], (C, num_hidden, 1, H), jnp.float32)
    w_out = scale * jax.random.normal(ks[4], (C, H, D), jnp.float32)
    b_out = scale * jax.random.normal(ks[5], (C, 1, D), jnp.float32)
    log_scale = jax.random.normal(ks[6], (1, D), jnp.float32)  # torch.randn(1, D)

    # masks: _get_mask puts 1 at even indices, then flips when orientation=True
    base = jnp.zeros((D,), jnp.float32).at[::2].set(1.0)
    masks = jnp.stack(
        [(1.0 - base) if (i % 2 == 0) else base for i in range(C)]
    ).reshape(C, 1, D)

    return (masks, w_in, b_in, w_hid, b_hid, w_out, b_out, log_scale)


if __name__ == "__main__":
    # Config consistent with NICE(input_dim=16, hidden_dim=32,
    # num_coupling_layers=3, num_layers=4, use_scaling=True, prior='logistic').
    # B=512 with the default tile_b resolves to a 2-step, 256-row batch grid:
    # both v7x TensorCores get work and per-step overhead is amortized.
    B, D, H, C, L = 512, 16, 32, 3, 4

    key = jax.random.PRNGKey(0)
    kx, kp = jax.random.split(key)
    x = jax.random.normal(kx, (B, D), jnp.float32)
    params = make_params(kp, D, H, C, L)

    z, ll = nice_forward(x, params)
    z = jax.block_until_ready(z)
    ll = jax.block_until_ready(ll)

    # Reference mirrors the PyTorch forward with the same bf16-matmul / f32-
    # accumulate recipe as the kernel (mask folding is exact for 0/1 masks),
    # so tolerances stay tight.
    z_ref, ll_ref = nice_forward_ref(x, params, matmul_dtype=jnp.bfloat16)
    assert z.shape == (B, D) and ll.shape == (B,)
    assert jnp.allclose(z, z_ref, rtol=2e-3, atol=2e-3), \
        float(jnp.max(jnp.abs(z - z_ref)))
    assert jnp.allclose(ll, ll_ref, rtol=2e-3, atol=2e-3), \
        float(jnp.max(jnp.abs(ll - ll_ref)))

    print("KERNEL_OK")
</pallas_src>

<mosaic_0001>
module attributes {stable_mosaic.version = 11 : i64} {
  func.func @nice_forward_kernel(%arg0: i32, %arg1: memref<256x16xf32, #tpu.memory_space<vmem>>, %arg2: memref<3x128x128xbf16, #tpu.memory_space<vmem>>, %arg3: memref<3x1x128xf32, #tpu.memory_space<vmem>>, %arg4: memref<3x2x128x128xbf16, #tpu.memory_space<vmem>>, %arg5: memref<3x2x1x128xf32, #tpu.memory_space<vmem>>, %arg6: memref<3x128x128xbf16, #tpu.memory_space<vmem>>, %arg7: memref<3x1x128xf32, #tpu.memory_space<vmem>>, %arg8: memref<1x128xf32, #tpu.memory_space<vmem>>, %arg9: memref<256x128xf32, #tpu.memory_space<vmem>>, %arg10: memref<256x1xf32, #tpu.memory_space<vmem>>, %arg11: memref<256x128xf32, #tpu.memory_space<vmem>>) attributes {dimension_semantics = [#tpu.dimension_semantics<parallel>], iteration_bounds = array<i64: 2>, scalar_prefetch = 0 : i64, scratch_operands = 1 : i64, tpu.core_type = #tpu.core_type<tc>, window_params = [{transform_indices = @transform_0, window_bounds = array<i64: 256, 16>}, {pipeline_mode = #tpu.pipeline_mode<synchronous>, transform_indices = @transform_1, window_bounds = array<i64: 3, 128, 128>}, {pipeline_mode = #tpu.pipeline_mode<synchronous>, transform_indices = @transform_2, window_bounds = array<i64: 3, 1, 128>}, {pipeline_mode = #tpu.pipeline_mode<synchronous>, transform_indices = @transform_3, window_bounds = array<i64: 3, 2, 128, 128>}, {pipeline_mode = #tpu.pipeline_mode<synchronous>, transform_indices = @transform_4, window_bounds = array<i64: 3, 2, 1, 128>}, {pipeline_mode = #tpu.pipeline_mode<synchronous>, transform_indices = @transform_5, window_bounds = array<i64: 3, 128, 128>}, {pipeline_mode = #tpu.pipeline_mode<synchronous>, transform_indices = @transform_6, window_bounds = array<i64: 3, 1, 128>}, {pipeline_mode = #tpu.pipeline_mode<synchronous>, transform_indices = @transform_7, window_bounds = array<i64: 1, 128>}, {transform_indices = @transform_8, window_bounds = array<i64: 256, 128>}, {transform_indices = @transform_9, window_bounds = array<i64: 256, 1>}]} {
    %cst = arith.constant 0.000000e+00 : f32
    %0 = vector.broadcast %cst : f32 to vector<256x128xf32>
    %c0 = arith.constant 0 : index
    %c0_0 = arith.constant 0 : index
    %1 = vector.load %arg11[%c0, %c0_0] : memref<256x128xf32, #tpu.memory_space<vmem>>, vector<256x128xf32>
    tpu.vector_store %arg11[%c0, %c0_0], %0 {strides = array<i32>} : memref<256x128xf32, #tpu.memory_space<vmem>>, vector<256x128xf32>,
    %c0_1 = arith.constant 0 : index
    %c0_2 = arith.constant 0 : index
    %2 = vector.load %arg1[%c0_1, %c0_2] : memref<256x16xf32, #tpu.memory_space<vmem>>, vector<256x16xf32>
    %c0_3 = arith.constant 0 : index
    %c0_4 = arith.constant 0 : index
    %3 = vector.load %arg11[%c0_3, %c0_4] : memref<256x128xf32, #tpu.memory_space<vmem>>, vector<256x16xf32>
    tpu.vector_store %arg11[%c0_3, %c0_4], %2 {strides = array<i32>} : memref<256x128xf32, #tpu.memory_space<vmem>>, vector<256x16xf32>,
    %c0_5 = arith.constant 0 : index
    %c0_6 = arith.constant 0 : index
    %4 = vector.load %arg11[%c0_5, %c0_6] : memref<256x128xf32, #tpu.memory_space<vmem>>, vector<256x128xf32>
    %5 = arith.truncf %4 : vector<256x128xf32> to vector<256x128xbf16>
    %c0_7 = arith.constant 0 : index
    %c0_8 = arith.constant 0 : index
    %c0_9 = arith.constant 0 : index
    %6 = vector.load %arg2[%c0_7, %c0_8, %c0_9] : memref<3x128x128xbf16, #tpu.memory_space<vmem>>, vector<1x128x128xbf16>
    %7 = vector.shape_cast %6 : vector<1x128x128xbf16> to vector<128x128xbf16>
    %cst_10 = arith.constant dense<0.000000e+00> : vector<256x128xf32>
    %8 = tpu.matmul %5, %7, %cst_10 {dimension_numbers = #tpu.dot_dimension_numbers<[1], [0], [0], [1], [0, 0, 1, 1], [], []>} : vector<256x128xbf16>, vector<128x128xbf16>, vector<256x128xf32> -> vector<256x128xf32>
    %c0_11 = arith.constant 0 : index
    %c0_12 = arith.constant 0 : index
    %c0_13 = arith.constant 0 : index
    %9 = vector.load %arg3[%c0_11, %c0_12, %c0_13] : memref<3x1x128xf32, #tpu.memory_space<vmem>>, vector<1x1x128xf32>
    %10 = vector.shape_cast %9 : vector<1x1x128xf32> to vector<1x128xf32>
    %11 = vector.broadcast %10 : vector<1x128xf32> to vector<256x128xf32>
    %12 = arith.addf %8, %11 : vector<256x128xf32>
    %cst_14 = arith.constant 0.000000e+00 : f32
    %13 = vector.broadcast %cst_14 : f32 to vector<256x128xf32>
    %14 = arith.cmpf ogt, %12, %13 : vector<256x128xf32>
    %cst_15 = arith.constant 2.000000e-01 : f32
    %15 = vector.broadcast %cst_15 : f32 to vector<256x128xf32>
    %16 = arith.mulf %15, %12 : vector<256x128xf32>
    %17 = arith.select %14, %12, %16 : vector<256x128xi1>, vector<256x128xf32>
    %18 = arith.truncf %17 : vector<256x128xf32> to vector<256x128xbf16>
    %c0_16 = arith.constant 0 : index
    %c0_17 = arith.constant 0 : index
    %c0_18 = arith.constant 0 : index
    %c0_19 = arith.constant 0 : index
    %19 = vector.load %arg4[%c0_16, %c0_17, %c0_18, %c0_19] : memref<3x2x128x128xbf16, #tpu.memory_space<vmem>>, vector<1x1x128x128xbf16>
    %20 = vector.shape_cast %19 : vector<1x1x128x128xbf16> to vector<128x128xbf16>
    %cst_20 = arith.constant dense<0.000000e+00> : vector<256x128xf32>
    %21 = tpu.matmul %18, %20, %cst_20 {dimension_numbers = #tpu.dot_dimension_numbers<[1], [0], [0], [1], [0, 0, 1, 1], [], []>} : vector<256x128xbf16>, vector<128x128xbf16>, vector<256x128xf32> -> vector<256x128xf32>
    %c0_21 = arith.constant 0 : index
    %c0_22 = arith.constant 0 : index
    %c0_23 = arith.constant 0 : index
    %c0_24 = arith.constant 0 : index
    %22 = vector.load %arg5[%c0_21, %c0_22, %c0_23, %c0_24] : memref<3x2x1x128xf32, #tpu.memory_space<vmem>>, vector<1x1x1x128xf32>
    %23 = vector.shape_cast %22 : vector<1x1x1x128xf32> to vector<1x128xf32>
    %24 = vector.broadcast %23 : vector<1x128xf32> to vector<256x128xf32>
    %25 = arith.addf %21, %24 : vector<256x128xf32>
    %cst_25 = arith.constant 0.000000e+00 : f32
    %26 = vector.broadcast %cst_25 : f32 to vector<256x128xf32>
    %27 = arith.cmpf ogt, %25, %26 : vector<256x128xf32>
    %cst_26 = arith.constant 2.000000e-01 : f32
    %28 = vector.broadcast %cst_26 : f32 to vector<256x128xf32>
    %29 = arith.mulf %28, %25 : vector<256x128xf32>
    %30 = arith.select %27, %25, %29 : vector<256x128xi1>, vector<256x128xf32>
    %31 = arith.truncf %30 : vector<256x128xf32> to vector<256x128xbf16>
    %c0_27 = arith.constant 0 : index
    %c1 = arith.constant 1 : index
    %c0_28 = arith.constant 0 : index
    %c0_29 = arith.constant 0 : index
    %32 = vector.load %arg4[%c0_27, %c1, %c0_28, %c0_29] : memref<3x2x128x128xbf16, #tpu.memory_space<vmem>>, vector<1x1x128x128xbf16>
    %33 = vector.shape_cast %32 : vector<1x1x128x128xbf16> to vector<128x128xbf16>
    %cst_30 = arith.constant dense<0.000000e+00> : vector<256x128xf32>
    %34 = tpu.matmul %31, %33, %cst_30 {dimension_numbers = #tpu.dot_dimension_numbers<[1], [0], [0], [1], [0, 0, 1, 1], [], []>} : vector<256x128xbf16>, vector<128x128xbf16>, vector<256x128xf32> -> vector<256x128xf32>
    %c0_31 = arith.constant 0 : index
    %c1_32 = arith.constant 1 : index
    %c0_33 = arith.constant 0 : index
    %c0_34 = arith.constant 0 : index
    %35 = vector.load %arg5[%c0_31, %c1_32, %c0_33, %c0_34] : memref<3x2x1x128xf32, #tpu.memory_space<vmem>>, vector<1x1x1x128xf32>
    %36 = vector.shape_cast %35 : vector<1x1x1x128xf32> to vector<1x128xf32>
    %37 = vector.broadcast %36 : vector<1x128xf32> to vector<256x128xf32>
    %38 = arith.addf %34, %37 : vector<256x128xf32>
    %cst_35 = arith.constant 0.000000e+00 : f32
    %39 = vector.broadcast %cst_35 : f32 to vector<256x128xf32>
    %40 = arith.cmpf ogt, %38, %39 : vector<256x128xf32>
    %cst_36 = arith.constant 2.000000e-01 : f32
    %41 = vector.broadcast %cst_36 : f32 to vector<256x128xf32>
    %42 = arith.mulf %41, %38 : vector<256x128xf32>
    %43 = arith.select %40, %38, %42 : vector<256x128xi1>, vector<256x128xf32>
    %44 = arith.truncf %43 : vector<256x128xf32> to vector<256x128xbf16>
    %c0_37 = arith.constant 0 : index
    %c0_38 = arith.constant 0 : index
    %c0_39 = arith.constant 0 : index
    %45 = vector.load %arg6[%c0_37, %c0_38, %c0_39] : memref<3x128x128xbf16, #tpu.memory_space<vmem>>, vector<1x128x128xbf16>
    %46 = vector.shape_cast %45 : vector<1x128x128xbf16> to vector<128x128xbf16>
    %cst_40 = arith.constant dense<0.000000e+00> : vector<256x128xf32>
    %47 = tpu.matmul %44, %46, %cst_40 {dimension_numbers = #tpu.dot_dimension_numbers<[1], [0], [0], [1], [0, 0, 1, 1], [], []>} : vector<256x128xbf16>, vector<128x128xbf16>, vector<256x128xf32> -> vector<256x128xf32>
    %c0_41 = arith.constant 0 : index
    %c0_42 = arith.constant 0 : index
    %c0_43 = arith.constant 0 : index
    %48 = vector.load %arg7[%c0_41, %c0_42, %c0_43] : memref<3x1x128xf32, #tpu.memory_space<vmem>>, vector<1x1x128xf32>
    %49 = vector.shape_cast %48 : vector<1x1x128xf32> to vector<1x128xf32>
    %50 = vector.broadcast %49 : vector<1x128xf32> to vector<256x128xf32>
    %51 = arith.addf %47, %50 : vector<256x128xf32>
    %52 = arith.addf %4, %51 : vector<256x128xf32>
    %53 = arith.truncf %52 : vector<256x128xf32> to vector<256x128xbf16>
    %c1_44 = arith.constant 1 : index
    %c0_45 = arith.constant 0 : index
    %c0_46 = arith.constant 0 : index
    %54 = vector.load %arg2[%c1_44, %c0_45, %c0_46] : memref<3x128x128xbf16, #tpu.memory_space<vmem>>, vector<1x128x128xbf16>
    %55 = vector.shape_cast %54 : vector<1x128x128xbf16> to vector<128x128xbf16>
    %cst_47 = arith.constant dense<0.000000e+00> : vector<256x128xf32>
    %56 = tpu.matmul %53, %55, %cst_47 {dimension_numbers = #tpu.dot_dimension_numbers<[1], [0], [0], [1], [0, 0, 1, 1], [], []>} : vector<256x128xbf16>, vector<128x128xbf16>, vector<256x128xf32> -> vector<256x128xf32>
    %c1_48 = arith.constant 1 : index
    %c0_49 = arith.constant 0 : index
    %c0_50 = arith.constant 0 : index
    %57 = vector.load %arg3[%c1_48, %c0_49, %c0_50] : memref<3x1x128xf32, #tpu.memory_space<vmem>>, vector<1x1x128xf32>
    %58 = vector.shape_cast %57 : vector<1x1x128xf32> to vector<1x128xf32>
    %59 = vector.broadcast %58 : vector<1x128xf32> to vector<256x128xf32>
    %60 = arith.addf %56, %59 : vector<256x128xf32>
    %cst_51 = arith.constant 0.000000e+00 : f32
    %61 = vector.broadcast %cst_51 : f32 to vector<256x128xf32>
    %62 = arith.cmpf ogt, %60, %61 : vector<256x128xf32>
    %cst_52 = arith.constant 2.000000e-01 : f32
    %63 = vector.broadcast %cst_52 : f32 to vector<256x128xf32>
    %64 = arith.mulf %63, %60 : vector<256x128xf32>
    %65 = arith.select %62, %60, %64 : vector<256x128xi1>, vector<256x128xf32>
    %66 = arith.truncf %65 : vector<256x128xf32> to vector<256x128xbf16>
    %c1_53 = arith.constant 1 : index
    %c0_54 = arith.constant 0 : index
    %c0_55 = arith.constant 0 : index
    %c0_56 = arith.constant 0 : index
    %67 = vector.load %arg4[%c1_53, %c0_54, %c0_55, %c0_56] : memref<3x2x128x128xbf16, #tpu.memory_space<vmem>>, vector<1x1x128x128xbf16>
    %68 = vector.shape_cast %67 : vector<1x1x128x128xbf16> to vector<128x128xbf16>
    %cst_57 = arith.constant dense<0.000000e+00> : vector<256x128xf32>
    %69 = tpu.matmul %66, %68, %cst_57 {dimension_numbers = #tpu.dot_dimension_numbers<[1], [0], [0], [1], [0, 0, 1, 1], [], []>} : vector<256x128xbf16>, vector<128x128xbf16>, vector<256x128xf32> -> vector<256x128xf32>
    %c1_58 = arith.constant 1 : index
    %c0_59 = arith.constant 0 : index
    %c0_60 = arith.constant 0 : index
    %c0_61 = arith.constant 0 : index
    %70 = vector.load %arg5[%c1_58, %c0_59, %c0_60, %c0_61] : memref<3x2x1x128xf32, #tpu.memory_space<vmem>>, vector<1x1x1x128xf32>
    %71 = vector.shape_cast %70 : vector<1x1x1x128xf32> to vector<1x128xf32>
    %72 = vector.broadcast %71 : vector<1x128xf32> to vector<256x128xf32>
    %73 = arith.addf %69, %72 : vector<256x128xf32>
    %cst_62 = arith.constant 0.000000e+00 : f32
    %74 = vector.broadcast %cst_62 : f32 to vector<256x128xf32>
    %75 = arith.cmpf ogt, %73, %74 : vector<256x128xf32>
    %cst_63 = arith.constant 2.000000e-01 : f32
    %76 = vector.broadcast %cst_63 : f32 to vector<256x128xf32>
    %77 = arith.mulf %76, %73 : vector<256x128xf32>
    %78 = arith.select %75, %73, %77 : vector<256x128xi1>, vector<256x128xf32>
    %79 = arith.truncf %78 : vector<256x128xf32> to vector<256x128xbf16>
    %c1_64 = arith.constant 1 : index
    %c1_65 = arith.constant 1 : index
    %c0_66 = arith.constant 0 : index
    %c0_67 = arith.constant 0 : index
    %80 = vector.load %arg4[%c1_64, %c1_65, %c0_66, %c0_67] : memref<3x2x128x128xbf16, #tpu.memory_space<vmem>>, vector<1x1x128x128xbf16>
    %81 = vector.shape_cast %80 : vector<1x1x128x128xbf16> to vector<128x128xbf16>
    %cst_68 = arith.constant dense<0.000000e+00> : vector<256x128xf32>
    %82 = tpu.matmul %79, %81, %cst_68 {dimension_numbers = #tpu.dot_dimension_numbers<[1], [0], [0], [1], [0, 0, 1, 1], [], []>} : vector<256x128xbf16>, vector<128x128xbf16>, vector<256x128xf32> -> vector<256x128xf32>
    %c1_69 = arith.constant 1 : index
    %c1_70 = arith.constant 1 : index
    %c0_71 = arith.constant 0 : index
    %c0_72 = arith.constant 0 : index
    %83 = vector.load %arg5[%c1_69, %c1_70, %c0_71, %c0_72] : memref<3x2x1x128xf32, #tpu.memory_space<vmem>>, vector<1x1x1x128xf32>
    %84 = vector.shape_cast %83 : vector<1x1x1x128xf32> to vector<1x128xf32>
    %85 = vector.broadcast %84 : vector<1x128xf32> to vector<256x128xf32>
    %86 = arith.addf %82, %85 : vector<256x128xf32>
    %cst_73 = arith.constant 0.000000e+00 : f32
    %87 = vector.broadcast %cst_73 : f32 to vector<256x128xf32>
    %88 = arith.cmpf ogt, %86, %87 : vector<256x128xf32>
    %cst_74 = arith.constant 2.000000e-01 : f32
    %89 = vector.broadcast %cst_74 : f32 to vector<256x128xf32>
    %90 = arith.mulf %89, %86 : vector<256x128xf32>
    %91 = arith.select %88, %86, %90 : vector<256x128xi1>, vector<256x128xf32>
    %92 = arith.truncf %91 : vector<256x128xf32> to vector<256x128xbf16>
    %c1_75 = arith.constant 1 : index
    %c0_76 = arith.constant 0 : index
    %c0_77 = arith.constant 0 : index
    %93 = vector.load %arg6[%c1_75, %c0_76, %c0_77] : memref<3x128x128xbf16, #tpu.memory_space<vmem>>, vector<1x128x128xbf16>
    %94 = vector.shape_cast %93 : vector<1x128x128xbf16> to vector<128x128xbf16>
    %cst_78 = arith.constant dense<0.000000e+00> : vector<256x128xf32>
    %95 = tpu.matmul %92, %94, %cst_78 {dimension_numbers = #tpu.dot_dimension_numbers<[1], [0], [0], [1], [0, 0, 1, 1], [], []>} : vector<256x128xbf16>, vector<128x128xbf16>, vector<256x128xf32> -> vector<256x128xf32>
    %c1_79 = arith.constant 1 : index
    %c0_80 = arith.constant 0 : index
    %c0_81 = arith.constant 0 : index
    %96 = vector.load %arg7[%c1_79, %c0_80, %c0_81] : memref<3x1x128xf32, #tpu.memory_space<vmem>>, vector<1x1x128xf32>
    %97 = vector.shape_cast %96 : vector<1x1x128xf32> to vector<1x128xf32>
    %98 = vector.broadcast %97 : vector<1x128xf32> to vector<256x128xf32>
    %99 = arith.addf %95, %98 : vector<256x128xf32>
    %100 = arith.addf %52, %99 : vector<256x128xf32>
    %101 = arith.truncf %100 : vector<256x128xf32> to vector<256x128xbf16>
    %c2 = arith.constant 2 : index
    %c0_82 = arith.constant 0 : index
    %c0_83 = arith.constant 0 : index
    %102 = vector.load %arg2[%c2, %c0_82, %c0_83] : memref<3x128x128xbf16, #tpu.memory_space<vmem>>, vector<1x128x128xbf16>
    %103 = vector.shape_cast %102 : vector<1x128x128xbf16> to vector<128x128xbf16>
    %cst_84 = arith.constant dense<0.000000e+00> : vector<256x128xf32>
    %104 = tpu.matmul %101, %103, %cst_84 {dimension_numbers = #tpu.dot_dimension_numbers<[1], [0], [0], [1], [0, 0, 1, 1], [], []>} : vector<256x128xbf16>, vector<128x128xbf16>, vector<256x128xf32> -> vector<256x128xf32>
    %c2_85 = arith.constant 2 : index
    %c0_86 = arith.constant 0 : index
    %c0_87 = arith.constant 0 : index
    %105 = vector.load %arg3[%c2_85, %c0_86, %c0_87] : memref<3x1x128xf32, #tpu.memory_space<vmem>>, vector<1x1x128xf32>
    %106 = vector.shape_cast %105 : vector<1x1x128xf32> to vector<1x128xf32>
    %107 = vector.broadcast %106 : vector<1x128xf32> to vector<256x128xf32>
    %108 = arith.addf %104, %107 : vector<256x128xf32>
    %cst_88 = arith.constant 0.000000e+00 : f32
    %109 = vector.broadcast %cst_88 : f32 to vector<256x128xf32>
    %110 = arith.cmpf ogt, %108, %109 : vector<256x128xf32>
    %cst_89 = arith.constant 2.000000e-01 : f32
    %111 = vector.broadcast %cst_89 : f32 to vector<256x128xf32>
    %112 = arith.mulf %111, %108 : vector<256x128xf32>
    %113 = arith.select %110, %108, %112 : vector<256x128xi1>, vector<256x128xf32>
    %114 = arith.truncf %113 : vector<256x128xf32> to vector<256x128xbf16>
    %c2_90 = arith.constant 2 : index
    %c0_91 = arith.constant 0 : index
    %c0_92 = arith.constant 0 : index
    %c0_93 = arith.constant 0 : index
    %115 = vector.load %arg4[%c2_90, %c0_91, %c0_92, %c0_93] : memref<3x2x128x128xbf16, #tpu.memory_space<vmem>>, vector<1x1x128x128xbf16>
    %116 = vector.shape_cast %115 : vector<1x1x128x128xbf16> to vector<128x128xbf16>
    %cst_94 = arith.constant dense<0.000000e+00> : vector<256x128xf32>
    %117 = tpu.matmul %114, %116, %cst_94 {dimension_numbers = #tpu.dot_dimension_numbers<[1], [0], [0], [1], [0, 0, 1, 1], [], []>} : vector<256x128xbf16>, vector<128x128xbf16>, vector<256x128xf32> -> vector<256x128xf32>
    %c2_95 = arith.constant 2 : index
    %c0_96 = arith.constant 0 : index
    %c0_97 = arith.constant 0 : index
    %c0_98 = arith.constant 0 : index
    %118 = vector.load %arg5[%c2_95, %c0_96, %c0_97, %c0_98] : memref<3x2x1x128xf32, #tpu.memory_space<vmem>>, vector<1x1x1x128xf32>
    %119 = vector.shape_cast %118 : vector<1x1x1x128xf32> to vector<1x128xf32>
    %120 = vector.broadcast %119 : vector<1x128xf32> to vector<256x128xf32>
    %121 = arith.addf %117, %120 : vector<256x128xf32>
    %cst_99 = arith.constant 0.000000e+00 : f32
    %122 = vector.broadcast %cst_99 : f32 to vector<256x128xf32>
    %123 = arith.cmpf ogt, %121, %122 : vector<256x128xf32>
    %cst_100 = arith.constant 2.000000e-01 : f32
    %124 = vector.broadcast %cst_100 : f32 to vector<256x128xf32>
    %125 = arith.mulf %124, %121 : vector<256x128xf32>
    %126 = arith.select %123, %121, %125 : vector<256x128xi1>, vector<256x128xf32>
    %127 = arith.truncf %126 : vector<256x128xf32> to vector<256x128xbf16>
    %c2_101 = arith.constant 2 : index
    %c1_102 = arith.constant 1 : index
    %c0_103 = arith.constant 0 : index
    %c0_104 = arith.constant 0 : index
    %128 = vector.load %arg4[%c2_101, %c1_102, %c0_103, %c0_104] : memref<3x2x128x128xbf16, #tpu.memory_space<vmem>>, vector<1x1x128x128xbf16>
    %129 = vector.shape_cast %128 : vector<1x1x128x128xbf16> to vector<128x128xbf16>
    %cst_105 = arith.constant dense<0.000000e+00> : vector<256x128xf32>
    %130 = tpu.matmul %127, %129, %cst_105 {dimension_numbers = #tpu.dot_dimension_numbers<[1], [0], [0], [1], [0, 0, 1, 1], [], []>} : vector<256x128xbf16>, vector<128x128xbf16>, vector<256x128xf32> -> vector<256x128xf32>
    %c2_106 = arith.constant 2 : index
    %c1_107 = arith.constant 1 : index
    %c0_108 = arith.constant 0 : index
    %c0_109 = arith.constant 0 : index
    %131 = vector.load %arg5[%c2_106, %c1_107, %c0_108, %c0_109] : memref<3x2x1x128xf32, #tpu.memory_space<vmem>>, vector<1x1x1x128xf32>
    %132 = vector.shape_cast %131 : vector<1x1x1x128xf32> to vector<1x128xf32>
    %133 = vector.broadcast %132 : vector<1x128xf32> to vector<256x128xf32>
    %134 = arith.addf %130, %133 : vector<256x128xf32>
    %cst_110 = arith.constant 0.000000e+00 : f32
    %135 = vector.broadcast %cst_110 : f32 to vector<256x128xf32>
    %136 = arith.cmpf ogt, %134, %135 : vector<256x128xf32>
    %cst_111 = arith.constant 2.000000e-01 : f32
    %137 = vector.broadcast %cst_111 : f32 to vector<256x128xf32>
    %138 = arith.mulf %137, %134 : vector<256x128xf32>
    %139 = arith.select %136, %134, %138 : vector<256x128xi1>, vector<256x128xf32>
    %140 = arith.truncf %139 : vector<256x128xf32> to vector<256x128xbf16>
    %c2_112 = arith.constant 2 : index
    %c0_113 = arith.constant 0 : index
    %c0_114 = arith.constant 0 : index
    %141 = vector.load %arg6[%c2_112, %c0_113, %c0_114] : memref<3x128x128xbf16, #tpu.memory_space<vmem>>, vector<1x128x128xbf16>
    %142 = vector.shape_cast %141 : vector<1x128x128xbf16> to vector<128x128xbf16>
    %cst_115 = arith.constant dense<0.000000e+00> : vector<256x128xf32>
    %143 = tpu.matmul %140, %142, %cst_115 {dimension_numbers = #tpu.dot_dimension_numbers<[1], [0], [0], [1], [0, 0, 1, 1], [], []>} : vector<256x128xbf16>, vector<128x128xbf16>, vector<256x128xf32> -> vector<256x128xf32>
    %c2_116 = arith.constant 2 : index
    %c0_117 = arith.constant 0 : index
    %c0_118 = arith.constant 0 : index
    %144 = vector.load %arg7[%c2_116, %c0_117, %c0_118] : memref<3x1x128xf32, #tpu.memory_space<vmem>>, vector<1x1x128xf32>
    %145 = vector.shape_cast %144 : vector<1x1x128xf32> to vector<1x128xf32>
    %146 = vector.broadcast %145 : vector<1x128xf32> to vector<256x128xf32>
    %147 = arith.addf %143, %146 : vector<256x128xf32>
    %148 = arith.addf %100, %147 : vector<256x128xf32>
    %c0_119 = arith.constant 0 : index
    %c0_120 = arith.constant 0 : index
    %149 = vector.load %arg8[%c0_119, %c0_120] : memref<1x128xf32, #tpu.memory_space<vmem>>, vector<1x128xf32>
    %150 = vector.broadcast %149 : vector<1x128xf32> to vector<256x128xf32>
    %151 = arith.mulf %150, %148 : vector<256x128xf32>
    %c0_121 = arith.constant 0 : index
    %c0_122 = arith.constant 0 : index
    %152 = vector.load %arg9[%c0_121, %c0_122] : memref<256x128xf32, #tpu.memory_space<vmem>>, vector<256x128xf32>
    tpu.vector_store %arg9[%c0_121, %c0_122], %151 {strides = array<i32>} : memref<256x128xf32, #tpu.memory_space<vmem>>, vector<256x128xf32>,
    %153 = math.absf %151 : vector<256x128xf32>
    %cst_123 = arith.constant 0.000000e+00 : f32
    %154 = vector.broadcast %cst_123 : f32 to vector<256x128xf32>
    %155 = arith.subf %154, %153 : vector<256x128xf32>
    %156 = math.exp %155 : vector<256x128xf32>
    %157 = math.log1p %156 : vector<256x128xf32>
    %cst_124 = arith.constant 2.000000e+00 : f32
    %158 = vector.broadcast %cst_124 : f32 to vector<256x128xf32>
    %159 = arith.mulf %158, %157 : vector<256x128xf32>
    %160 = arith.addf %153, %159 : vector<256x128xf32>
    %161 = tpu.iota {dimensions = array<i32: 1>} : vector<256x128xi32>
    %c16_i32 = arith.constant 16 : i32
    %162 = vector.broadcast %c16_i32 : i32 to vector<256x128xi32>
    %163 = arith.cmpi slt, %161, %162 : vector<256x128xi32>
    %cst_125 = arith.constant 0.000000e+00 : f32
    %164 = vector.broadcast %cst_125 : f32 to vector<256x128xf32>
    %165 = arith.select %163, %160, %164 : vector<256x128xi1>, vector<256x128xf32>
    %cst_126 = arith.constant dense<0.000000e+00> : vector<256xf32>
    %166 = vector.multi_reduction <add>, %165, %cst_126 [1] : vector<256x128xf32> to vector<256xf32>
    %167 = vector.shape_cast %166 : vector<256xf32> to vector<256x1xf32>
    %cst_127 = arith.constant 0.000000e+00 : f32
    %168 = vector.broadcast %cst_127 : f32 to vector<256x1xf32>
    %169 = arith.subf %168, %167 : vector<256x1xf32>
    %c0_128 = arith.constant 0 : index
    %c0_129 = arith.constant 0 : index
    %170 = vector.load %arg10[%c0_128, %c0_129] : memref<256x1xf32, #tpu.memory_space<vmem>>, vector<256x1xf32>
    tpu.vector_store %arg10[%c0_128, %c0_129], %169 {strides = array<i32>} : memref<256x1xf32, #tpu.memory_space<vmem>>, vector<256x1xf32>,
    return
  }
  func.func @transform_0(%arg0: i32) -> (i32, i32) {
    %c0_i32 = arith.constant 0 : i32
    %c0_i32_0 = arith.constant 0 : i32
    return %arg0, %c0_i32 : i32, i32
  }
  func.func @transform_1(%arg0: i32) -> (i32, i32, i32) {
    %c0_i32 = arith.constant 0 : i32
    %c0_i32_0 = arith.constant 0 : i32
    %c0_i32_1 = arith.constant 0 : i32
    %c0_i32_2 = arith.constant 0 : i32
    return %c0_i32, %c0_i32_0, %c0_i32_1 : i32, i32, i32
  }
  func.func @transform_2(%arg0: i32) -> (i32, i32, i32) {
    %c0_i32 = arith.constant 0 : i32
    %c0_i32_0 = arith.constant 0 : i32
    %c0_i32_1 = arith.constant 0 : i32
    %c0_i32_2 = arith.constant 0 : i32
    return %c0_i32, %c0_i32_0, %c0_i32_1 : i32, i32, i32
  }
  func.func @transform_3(%arg0: i32) -> (i32, i32, i32, i32) {
    %c0_i32 = arith.constant 0 : i32
    %c0_i32_0 = arith.constant 0 : i32
    %c0_i32_1 = arith.constant 0 : i32
    %c0_i32_2 = arith.constant 0 : i32
    %c0_i32_3 = arith.constant 0 : i32
    return %c0_i32, %c0_i32_0, %c0_i32_1, %c0_i32_2 : i32, i32, i32, i32
  }
  func.func @transform_4(%arg0: i32) -> (i32, i32, i32, i32) {
    %c0_i32 = arith.constant 0 : i32
    %c0_i32_0 = arith.constant 0 : i32
    %c0_i32_1 = arith.constant 0 : i32
    %c0_i32_2 = arith.constant 0 : i32
    %c0_i32_3 = arith.constant 0 : i32
    return %c0_i32, %c0_i32_0, %c0_i32_1, %c0_i32_2 : i32, i32, i32, i32
  }
  func.func @transform_5(%arg0: i32) -> (i32, i32, i32) {
    %c0_i32 = arith.constant 0 : i32
    %c0_i32_0 = arith.constant 0 : i32
    %c0_i32_1 = arith.constant 0 : i32
    %c0_i32_2 = arith.constant 0 : i32
    return %c0_i32, %c0_i32_0, %c0_i32_1 : i32, i32, i32
  }
  func.func @transform_6(%arg0: i32) -> (i32, i32, i32) {
    %c0_i32 = arith.constant 0 : i32
    %c0_i32_0 = arith.constant 0 : i32
    %c0_i32_1 = arith.constant 0 : i32
    %c0_i32_2 = arith.constant 0 : i32
    return %c0_i32, %c0_i32_0, %c0_i32_1 : i32, i32, i32
  }
  func.func @transform_7(%arg0: i32) -> (i32, i32) {
    %c0_i32 = arith.constant 0 : i32
    %c0_i32_0 = arith.constant 0 : i32
    %c0_i32_1 = arith.constant 0 : i32
    return %c0_i32, %c0_i32_0 : i32, i32
  }
  func.func @transform_8(%arg0: i32) -> (i32, i32) {
    %c0_i32 = arith.constant 0 : i32
    %c0_i32_0 = arith.constant 0 : i32
    return %arg0, %c0_i32 : i32, i32
  }
  func.func @transform_9(%arg0: i32) -> (i32, i32) {
    %c0_i32 = arith.constant 0 : i32
    %c0_i32_0 = arith.constant 0 : i32
    return %arg0, %c0_i32 : i32, i32
  }
}

</mosaic_0001>

<bundles_post_ra>
// kernel: tpu_custom_call.1
= control target key start
LH: loop header
LB: loop body
LE: loop exit
PB: predicated region body
PF: predicated region fallthrough
CT: control target
= control target key end

     0   :  { %s7155_s0 = inlined_call_operand.vmem [shape: f32[512,16], index: 0, kind: input, shape index: {}]   ;;  %s7156_s1 = inlined_call_operand.vmem [shape: bf16[3,128,128], index: 1, kind: input, shape index: {}]   ;;  %s7157_s2 = inlined_call_operand.hbm [shape: f32[3,1,128], index: 2, kind: input, shape index: {}]   ;;  %s7158_s3 = inlined_call_operand.vmem [shape: bf16[3,2,128,128], index: 3, kind: input, shape index: {}]   ;;  %s7159_s4 = inlined_call_operand.hbm [shape: f32[3,2,1,128], index: 4, kind: input, shape index: {}]   ;;  %s7160_s5 = inlined_call_operand.hbm [shape: bf16[3,128,128], index: 5, kind: input, shape index: {}]   ;;  %s7161_s6 = inlined_call_operand.hbm [shape: f32[3,1,128], index: 6, kind: input, shape index: {}]   ;;  %s7162_s7 = inlined_call_operand.vmem [shape: f32[1,128], index: 7, kind: input, shape index: {}]   ;;  %s7163_s8 = inlined_call_operand.hbm [shape: f32[512,128], index: 8, kind: output, shape index: {0}]   ;;  %s7164_s9 = inlined_call_operand.vmem [shape: f32[512,1], index: 9, kind: output, shape index: {1}]  }
   0x1   :  { %7169 = sst [smem:[#allocation20_spill]] %s7157_s2 }
   0x2   :  { %7170 = sst [smem:[#allocation21_spill]] %s7159_s4 }
   0x3   :  { %15 = vsyncpa [#allocation4], 0 }
   0x4   :  { %16 = vsyncpa [#allocation7], 0 }
   0x5   :  { %17 = vsyncpa [#allocation10], 0 }
   0x6   :  { %18 = vsyncpa [#allocation5], 0 }
   0x7   :  { %20 = vsyncpa [#allocation5 + $0x1], 0  ;;  %s5598_s30 = smov 0   ;;  %s5600_s10 = smov 0  }
   0x8   :  { %s5602_s11 = smov 0   ;;  %s5604_s12 = smov 0  }
   0x9 LB: > { %7171 = sst [smem:[#allocation16_spill]] %s5531_s11  ;;  %s5619_s13 = sadd.s32 4294967295, %s5535_s12   ;;  %s5535_s12 = sphi %s5604_s12, %s7182_s12   ;;  %s5531_s11 = sphi %s5602_s11, %s7184_s11   ;;  %s5527_s10 = sphi %s5600_s10, %s7186_s10   ;;  %s5523_s30 = sphi %s5598_s30, %s7185_s30  }
   0xa   : > { %s4463_s14 = sadd.s32 4294967294, %s5535_s12   ;;  %s5623_s15 = sadd.s32 1, %s5535_s12  }
   0xb   : > { %7172 = sst [smem:[#allocation17_spill]] %s5623_s15  ;;  %s206_s16 = sadd.s32 1, %s5531_s11 }
   0xc   : > { %s203_s17 = ssub.s32 %s5535_s12, %s5623_s15  ;;  %p216_p0 = scmp.ne.s32.totalorder %s5531_s11, %s5527_s10 }
   0xd   : > { %p204_p1 = scmp.eq.s32.totalorder %s203_s17, 0  ;;  %p217_p2 = scmp.eq.s32.totalorder %s5619_s13, 1 }
   0xe   : > { %p222_p3 = scmp.ne.s32.totalorder %s5527_s10, %s5523_s30  ;;  %p223_p4 = scmp.eq.s32.totalorder %s4463_s14, 1 }
   0xf   : > { %s5634_s18 = scalar_select %p204_p1, %s5531_s11, %s206_s16  }
  0x10   : > { %p5636_p5 = por %p217_p2, %p216_p0  ;;  %p5640_p6 = por %p223_p4, %p222_p3 }
  0x11   : > { %7173 = sst [smem:[#allocation18_spill]] %s5634_s18  ;;  %p4464_p7 = scmp.ge.s32.totalorder %s5535_s12, 1 }
  0x12   : > { %s7175_s20 = scalar_select %p5640_p6, 1, 0 }
  0x13   : > { %p256_p8 = scmp.lt.s32.totalorder %s5535_s12, 3  ;;  %p5113_p9 = scmp.eq.s32.totalorder %s5619_s13, 0 }
  0x14   : > { %7176 = sst [smem:[#allocation19_spill]] %s7175_s20  ;;  %s5537_s29 = smov [#allocation6]  }
  0x15   : > { %p5647_p10 = pnand %p4464_p7, %p256_p8  ;;  %s7178_s4 = sld [smem:[#allocation21_spill]] }
  0x16   : > { %s7179_s2 = sld [smem:[#allocation20_spill]]  ;;  %s289_s14 = sshll.u32 %s5537_s29, 4  ;;  %s290_s14 = int_to_ptr.vmem [resolvable:$true] %s289_s14 }
  0x17   : > { %p5096_p11 = pneg %p5647_p10  ;;  %s5538_s16 = smov 16  }
  0x18   : > { %s5539_s17 = smov 1   ;;  %s5540_s22 = smov [#allocation3]  }
  0x19   : > { %p5661_p12 = pnand %p5113_p9, %p5096_p11  ;;  %s272_s23 = sshll.u32 %s5540_s22, 4  ;;  %s273_s23 = int_to_ptr.vmem [resolvable:$true] %s272_s23 }
  0x1a   : > { %s315_s15 = sshll.u32 %s7161_s6, 4  ;;  %s5542_s20 = smov 64   ;;  %s316_s15 = int_to_ptr.hbm [resolvable:$true] %s315_s15 }
  0x1b   : > { %s287_s24 = sshll.u32 %s7178_s4, 4  ;;  %s5541_s4 = smov [#allocation8]   ;;  %s288_s24 = int_to_ptr.hbm [resolvable:$true] %s287_s24 }
  0x1c   : > { %s270_s27 = sshll.u32 %s7179_s2, 4  ;;  %s301_s2 = sshll.u32 %s7160_s5, 4  ;;  %s271_s27 = int_to_ptr.hbm [resolvable:$true] %s270_s27  ;;  %s302_s2 = int_to_ptr.hbm [resolvable:$true] %s301_s2 }
  0x1d   : > { %5102 = dma.hbm_to_vmem [thread:$0]  (!%p5661_p12), %s288_s24, 96, %s290_s14, [#allocation7], %s5538_s16, %s5538_s16, %s5539_s17  }
  0x1e   : > { %5099 = dma.hbm_to_vmem [thread:$0]  (!%p5661_p12), %s271_s27, 48, %s273_s23, [#allocation4], %s5538_s16, %s5538_s16, %s5539_s17  }
  0x1f   : > { %s303_s29 = sshll.u32 %s5541_s4, 4  ;;  %s5543_s24 = smov 4   ;;  %s304_s29 = int_to_ptr.vmem [resolvable:$true] %s303_s29 }
  0x20   : > { %5105 = dma.hbm_to_vmem [thread:$0]  (!%p5661_p12), %s302_s2, 3072, %s304_s29, [#allocation7], %s5542_s20, %s5542_s20, %s5543_s24  }
  0x21   : > { %s5544_s14 = smov [#allocation9]   ;;  %345 = sbr.rel (%p5647_p10) target bundleno = 2190 (0x88e), region = 52 }
  0x22   : > { %s317_s22 = sshll.u32 %s5544_s14, 4  ;;  %s318_s22 = int_to_ptr.vmem [resolvable:$true] %s317_s22 }
  0x23   : > { %5108 = dma.hbm_to_vmem [thread:$0]  (!%p5661_p12), %s316_s15, 48, %s318_s22, [#allocation10], %s5538_s16, %s5538_s16, %s5539_s17  }
  0x26   : > { %5506 = dma.done.wait (%p5113_p9), [#allocation4], 48  }
  0x27   : > { %5508 = vsyncadd (%p5113_p9), [#allocation4], 4294967248 }
  0x28   : > { %5510 = dma.done.wait (%p5113_p9), [#allocation7], 3168  }
  0x29   : > { %5512 = vsyncadd (%p5113_p9), [#allocation7], 4294964128 }
  0x2a   : > { %5514 = dma.done.wait (%p5113_p9), [#allocation10], 48  }
  0x2b   : > { %5516 = vsyncadd (%p5113_p9), [#allocation10], 4294967248  ;;  %s4476_s2 = sshll.u32 %s5619_s13, 5  ;;  %v5545_v0 = vmov 0.0   ;;  %v4988_v1 = vld [vmem:[%s7156_s1 + $0x38] sm:$0xff]  ;;  %vm479_vm0 = vcmask 130048  }
  0x2c   : > { %p403_p13 = scmp.lt.s32.totalorder %s4476_s2, 63  ;;  %415 = vst [vmem:[#allocation2] sm:$0xff] %v5545_v0  ;;  %628 = vmatpush.bf16.msra.mxu0 %v4988_v1  ;;  %v4987_v2 = vld [vmem:[%s7156_s1 + $0x30] sm:$0xff]  ;;  %v4986_v5 = vld [vmem:[%s7156_s1 + $0x28] sm:$0xff]  ;;  %v4985_v6 = vld [vmem:[%s7156_s1 + $0x20] sm:$0xff]  ;;  %s5077_s29 = sshll.u32 %s5619_s13, 8 }
  0x2d   : > { %416 = vst [vmem:[#allocation2 + $0x8] sm:$0xff] %v5545_v0  ;;  %v4984_v7 = vld [vmem:[%s7156_s1 + $0x18] sm:$0xff]  ;;  %v4983_v8 = vld [vmem:[%s7156_s1 + $0x10] sm:$0xff]  ;;  %v4982_v9 = vld [vmem:[%s7156_s1 + $0x8] sm:$0xff]  ;;  %s4327_s22 = scalar_lea.hbm %s7163_s8, %s5077_s29  ;;  %s5481_s16 = scalar_lea.hbm %s7163_s8, 512 }
  0x2e   : > { %s7188_s2 = smov (!%p403_p13, %s4476_s2), 63  ;;  %417 = vst [vmem:[#allocation2 + $0x10] sm:$0xff] %v5545_v0  ;;  %v4981_v10 = vld [vmem:[%s7156_s1] sm:$0xff]  ;;  %v4996_v38 = vld [vmem:[%s7158_s3 + $0x38] sm:$0xff]  ;;  %v4995_v44 = vld [vmem:[%s7158_s3 + $0x30] sm:$0xff]  ;;  %s4330_s15 = sshll.u32 %s4327_s22, 4  ;;  %s4331_s15 = int_to_ptr.hbm [resolvable:$true] %s4330_s15 }
  0x2f   : > { %418 = vst [vmem:[#allocation2 + $0x18] sm:$0xff] %v5545_v0  ;;  %s4477_s4 = sshll.u32 %s7188_s2, 3  ;;  %897 = vmatpush.bf16.msra.mxu1 %v4996_v38  ;;  %v4994_v45 = vld [vmem:[%s7158_s3 + $0x28] sm:$0xff]  ;;  %v4993_v48 = vld [vmem:[%s7158_s3 + $0x20] sm:$0xff]  ;;  %v4992_v52 = vld [vmem:[%s7158_s3 + $0x18] sm:$0xff]  ;;  %s5475_s20 = sshra.s32 %s4331_s15, 4  ;;  %s5476_s20 = int_to_ptr.hbm [resolvable:$true] %s5475_s20 }
  0x30   : > { %419 = vst [vmem:[#allocation2 + $0x20] sm:$0xff] %v5545_v0  ;;  %s5702_s18 = scalar_lea.vmem %s7155_s0, %s4477_s4  ;;  %629 = vmatpush.bf16.msra.mxu0 %v4987_v2  ;;  %v4991_v53 = vld [vmem:[%s7158_s3 + $0x10] sm:$0xff]  ;;  %v4990_v54 = vld [vmem:[%s7158_s3 + $0x8] sm:$0xff]  ;;  %v4989_v57 = vld [vmem:[%s7158_s3] sm:$0xff]  ;;  %s6848_s26 = scalar_lea.vmem %s7164_s9, %s4477_s4 }
  0x31   : > { %420 = vst [vmem:[#allocation2 + $0x28] sm:$0xff] %v5545_v0  ;;  %v447_v3 = vld [vmem:[%s5702_s18] sm:$0xff]  ;;  %v448_v4 = vld [vmem:[%s5702_s18 + $0x8] sm:$0xff]  ;;  %v449_v11 = vld [vmem:[%s5702_s18 + $0x10] sm:$0xff]  ;;  %s5477_s21 = scalar_lea.hbm %s5476_s20, 256  ;;  %p5482_p3 = scmp.lt.s32.totalorder %s5476_s20, %s7163_s8 }
  0x32   : > { %421 = vst [vmem:[#allocation2 + $0x30] sm:$0xff] %v5545_v0  ;;  %v450_v14 = vld [vmem:[%s5702_s18 + $0x18] sm:$0xff]  ;;  %v451_v15 = vld [vmem:[%s5702_s18 + $0x20] sm:$0xff]  ;;  %v452_v16 = vld [vmem:[%s5702_s18 + $0x28] sm:$0xff]  ;;  %p5478_p0 = scmp.ne.s32.totalorder %s5476_s20, %s5477_s21  ;;  %p5483_p4 = scmp.lt.s32.totalorder %s5481_s16, %s5477_s21 }
  0x33   : > { %422 = vst [vmem:[#allocation2 + $0x38] sm:$0xff] %v5545_v0  ;;  %v453_v18 = vld [vmem:[%s5702_s18 + $0x30] sm:$0xff]  ;;  %v454_v19 = vld [vmem:[%s5702_s18 + $0x38] sm:$0xff]  ;;  %v455_v23 = vld [vmem:[%s5702_s18 + $0x40] sm:$0xff]  ;;  %898 = vmatpush.bf16.msra.mxu1 %v4995_v44 }
  0x34   : > { %423 = vst [vmem:[#allocation2 + $0x40] sm:$0xff] %v5545_v0  ;;  %630 = vmatpush.bf16.msra.mxu0 %v4986_v5  ;;  %v456_v24 = vld [vmem:[%s5702_s18 + $0x48] sm:$0xff]  ;;  %v457_v28 = vld [vmem:[%s5702_s18 + $0x50] sm:$0xff]  ;;  %v458_v29 = vld [vmem:[%s5702_s18 + $0x58] sm:$0xff]  ;;  %p5479_p1 = pnand %p5478_p0, %p5636_p5  ;;  %p5484_p7 = por %p5483_p4, %p5482_p3 }
  0x35   : > { %480 = vst.msk [vmem:[#allocation2] sm:$0xff] %vm479_vm0, %v447_v3  ;;  %v459_v33 = vld [vmem:[%s5702_s18 + $0x60] sm:$0xff]  ;;  %v460_v34 = vld [vmem:[%s5702_s18 + $0x68] sm:$0xff]  ;;  %v461_v39 = vld [vmem:[%s5702_s18 + $0x70] sm:$0xff] }
  0x36   : > { %481 = vst.msk [vmem:[#allocation2 + $0x8] sm:$0xff] %vm479_vm0, %v448_v4  ;;  %v462_v40 = vld [vmem:[%s5702_s18 + $0x78] sm:$0xff]  ;;  %v463_v46 = vld [vmem:[%s5702_s18 + $0x80] sm:$0xff]  ;;  %v464_v47 = vld [vmem:[%s5702_s18 + $0x88] sm:$0xff]  ;;  %p5480_p2 = pneg %p5479_p1 }
  0x37   : > { %424 = vst [vmem:[#allocation2 + $0x48] sm:$0xff] %v5545_v0  ;;  %899 = vmatpush.bf16.msra.mxu1 %v4994_v45  ;;  %v465_v55 = vld [vmem:[%s5702_s18 + $0x90] sm:$0xff]  ;;  %v466_v56 = vld [vmem:[%s5702_s18 + $0x98] sm:$0xff]  ;;  %v467_v61 = vld [vmem:[%s5702_s18 + $0xa0] sm:$0xff] }
  0x38   : > { %425 = vst [vmem:[#allocation2 + $0x50] sm:$0xff] %v5545_v0  ;;  %631 = vmatpush.bf16.msra.mxu0 %v4985_v6  ;;  %v468_v62 = vld [vmem:[%s5702_s18 + $0xa8] sm:$0xff]  ;;  %v5796_v3 = vld [vmem:[#allocation3] ss:$0 sm:$0xff]  ;;  %v469_v6 = vld [vmem:[%s5702_s18 + $0xb0] sm:$0xff]  ;;  %p5485_p8 = pnand %p5484_p7, %p5480_p2 }
  0x39   : > { %426 = vst [vmem:[#allocation2 + $0x58] sm:$0xff] %v5545_v0 }
  0x3a   : > { %427 = vst [vmem:[#allocation2 + $0x60] sm:$0xff] %v5545_v0 }
  0x3b   : > { %428 = vst [vmem:[#allocation2 + $0x68] sm:$0xff] %v5545_v0  ;;  %900 = vmatpush.bf16.msra.mxu1 %v4993_v48  ;;  %v475_v48 = vld [vmem:[%s5702_s18 + $0xe0] sm:$0xff] }
  0x3c   : > { %429 = vst [vmem:[#allocation2 + $0x70] sm:$0xff] %v5545_v0  ;;  %632 = vmatpush.bf16.msra.mxu0 %v4984_v7  ;;  %v512_v12 = vld [vmem:[#allocation2] sm:$0xff]  ;;  %v470_v7 = vld [vmem:[%s5702_s18 + $0xb8] sm:$0xff] }
  0x3d   : > { %430 = vst [vmem:[#allocation2 + $0x78] sm:$0xff] %v5545_v0  ;;  %v513_v13 = vld [vmem:[#allocation2 + $0x8] sm:$0xff] }
  0x3e   : > { %431 = vst [vmem:[#allocation2 + $0x80] sm:$0xff] %v5545_v0  ;;  %v544_v17 = vpack.c.bf16 %v513_v13, %v512_v12 }
  0x3f   : > { %432 = vst [vmem:[#allocation2 + $0x88] sm:$0xff] %v5545_v0  ;;  %901 = vmatpush.bf16.msra.mxu1 %v4992_v52 }
  0x40   : > { %433 = vst [vmem:[#allocation2 + $0x90] sm:$0xff] %v5545_v0  ;;  %633 = vmatpush.bf16.msra.mxu0 %v4983_v8 }
  0x41   : > { %434 = vst [vmem:[#allocation2 + $0x98] sm:$0xff] %v5545_v0 }
  0x42   : > { %435 = vst [vmem:[#allocation2 + $0xa0] sm:$0xff] %v5545_v0 }
  0x43   : > { %436 = vst [vmem:[#allocation2 + $0xa8] sm:$0xff] %v5545_v0  ;;  %902 = vmatpush.bf16.msra.mxu1 %v4991_v53 }
  0x44   : > { %437 = vst [vmem:[#allocation2 + $0xb0] sm:$0xff] %v5545_v0  ;;  %634 = vmatpush.bf16.msra.mxu0 %v4982_v9 }
  0x45   : > { %438 = vst [vmem:[#allocation2 + $0xb8] sm:$0xff] %v5545_v0 }
  0x46   : > { %439 = vst [vmem:[#allocation2 + $0xc0] sm:$0xff] %v5545_v0 }
  0x47   : > { %440 = vst [vmem:[#allocation2 + $0xc8] sm:$0xff] %v5545_v0  ;;  %903 = vmatpush.bf16.msra.mxu1 %v4990_v54 }
  0x48   : > { %441 = vst [vmem:[#allocation2 + $0xd0] sm:$0xff] %v5545_v0  ;;  %635 = vmatpush.bf16.msra.mxu0 %v4981_v10 }
  0x49   : > { %442 = vst [vmem:[#allocation2 + $0xd8] sm:$0xff] %v5545_v0 }
  0x4a   : > { %443 = vst [vmem:[#allocation2 + $0xe0] sm:$0xff] %v5545_v0 }
  0x4b   : > { %444 = vst [vmem:[#allocation2 + $0xe8] sm:$0xff] %v5545_v0  ;;  %636 = vmatmul.bf16.vlgmr.msra.gmra.mxu0 %v544_v17  ;;  %904 = vmatpush.bf16.msra.mxu1 %v4989_v57 }
  0x4c   : > { %445 = vst [vmem:[#allocation2 + $0xf0] sm:$0xff] %v5545_v0 }
  0x4d   : > { %446 = vst [vmem:[#allocation2 + $0xf8] sm:$0xff] %v5545_v0 }
  0x4e   : > { %482 = vst.msk [vmem:[#allocation2 + $0x10] sm:$0xff] %vm479_vm0, %v449_v11 }
  0x4f   : > { %483 = vst.msk [vmem:[#allocation2 + $0x18] sm:$0xff] %vm479_vm0, %v450_v14 }
  0x50   : > { %484 = vst.msk [vmem:[#allocation2 + $0x20] sm:$0xff] %vm479_vm0, %v451_v15 }
  0x51   : > { %485 = vst.msk [vmem:[#allocation2 + $0x28] sm:$0xff] %vm479_vm0, %v452_v16 }
  0x52   : > { %486 = vst.msk [vmem:[#allocation2 + $0x30] sm:$0xff] %vm479_vm0, %v453_v18 }
  0x53   : > { %487 = vst.msk [vmem:[#allocation2 + $0x38] sm:$0xff] %vm479_vm0, %v454_v19 }
  0x54   : > { %488 = vst.msk [vmem:[#allocation2 + $0x40] sm:$0xff] %vm479_vm0, %v455_v23 }
  0x55   : > { %v514_v20 = vld [vmem:[#allocation2 + $0x10] sm:$0xff]  ;;  %489 = vst.msk [vmem:[#allocation2 + $0x48] sm:$0xff] %vm479_vm0, %v456_v24 }
  0x56   : > { %v515_v21 = vld [vmem:[#allocation2 + $0x18] sm:$0xff]  ;;  %490 = vst.msk [vmem:[#allocation2 + $0x50] sm:$0xff] %vm479_vm0, %v457_v28 }
  0x57   : > { %v545_v22 = vpack.c.bf16 %v515_v21, %v514_v20  ;;  %v516_v25 = vld [vmem:[#allocation2 + $0x20] sm:$0xff]  ;;  %491 = vst.msk [vmem:[#allocation2 + $0x58] sm:$0xff] %vm479_vm0, %v458_v29  ;;  %v472_v21 = vld [vmem:[%s5702_s18 + $0xc8] sm:$0xff] }
  0x58   : > { %v517_v26 = vld [vmem:[#allocation2 + $0x28] sm:$0xff]  ;;  %492 = vst.msk [vmem:[#allocation2 + $0x60] sm:$0xff] %vm479_vm0, %v459_v33  ;;  %v471_v20 = vld [vmem:[%s5702_s18 + $0xc0] sm:$0xff] }
  0x59   : > { %v546_v27 = vpack.c.bf16 %v517_v26, %v516_v25  ;;  %v518_v30 = vld [vmem:[#allocation2 + $0x30] sm:$0xff]  ;;  %493 = vst.msk [vmem:[#allocation2 + $0x68] sm:$0xff] %vm479_vm0, %v460_v34 }
  0x5a   : > { %v519_v31 = vld [vmem:[#allocation2 + $0x38] sm:$0xff]  ;;  %494 = vst.msk [vmem:[#allocation2 + $0x70] sm:$0xff] %vm479_vm0, %v461_v39  ;;  %v473_v34 = vld [vmem:[%s5702_s18 + $0xd0] sm:$0xff] }
  0x5b   : > { %641 = vmatmul.bf16.gmra.mxu0 %v545_v22  ;;  %v547_v32 = vpack.c.bf16 %v519_v31, %v518_v30  ;;  %v520_v35 = vld [vmem:[#allocation2 + $0x40] sm:$0xff]  ;;  %495 = vst.msk [vmem:[#allocation2 + $0x78] sm:$0xff] %vm479_vm0, %v462_v40 }
  0x5c   : > { %v521_v36 = vld [vmem:[#allocation2 + $0x48] sm:$0xff]  ;;  %496 = vst.msk [vmem:[#allocation2 + $0x80] sm:$0xff] %vm479_vm0, %v463_v46 }
  0x5d   : > { %v548_v37 = vpack.c.bf16 %v521_v36, %v520_v35  ;;  %v522_v41 = vld [vmem:[#allocation2 + $0x50] sm:$0xff]  ;;  %497 = vst.msk [vmem:[#allocation2 + $0x88] sm:$0xff] %vm479_vm0, %v464_v47  ;;  %v474_v35 = vld [vmem:[%s5702_s18 + $0xd8] sm:$0xff] }
  0x5e   : > { %v523_v42 = vld [vmem:[#allocation2 + $0x58] sm:$0xff]  ;;  %498 = vst.msk [vmem:[#allocation2 + $0x90] sm:$0xff] %vm479_vm0, %v465_v55 }
  0x5f   : > { %v549_v43 = vpack.c.bf16 %v523_v42, %v522_v41  ;;  %v524_v49 = vld [vmem:[#allocation2 + $0x60] sm:$0xff]  ;;  %499 = vst.msk [vmem:[#allocation2 + $0x98] sm:$0xff] %vm479_vm0, %v466_v56 }
  0x60   : > { %v525_v50 = vld [vmem:[#allocation2 + $0x68] sm:$0xff]  ;;  %500 = vst.msk [vmem:[#allocation2 + $0xa0] sm:$0xff] %vm479_vm0, %v467_v61 }
  0x61   : > { %v550_v51 = vpack.c.bf16 %v525_v50, %v524_v49  ;;  %v526_v58 = vld [vmem:[#allocation2 + $0x70] sm:$0xff]  ;;  %501 = vst.msk [vmem:[#allocation2 + $0xa8] sm:$0xff] %vm479_vm0, %v468_v62  ;;  %v476_v49 = vld [vmem:[%s5702_s18 + $0xe8] sm:$0xff] }
  0x62   : > { %v527_v59 = vld [vmem:[#allocation2 + $0x78] sm:$0xff]  ;;  %502 = vst.msk [vmem:[#allocation2 + $0xb0] sm:$0xff] %vm479_vm0, %v469_v6  ;;  %v477_v62 = vld [vmem:[%s5702_s18 + $0xf0] sm:$0xff] }
  0x63   : > { %v551_v60 = vpack.c.bf16 %v527_v59, %v526_v58  ;;  %v528_v63 = vld [vmem:[#allocation2 + $0x80] sm:$0xff]  ;;  %503 = vst.msk [vmem:[#allocation2 + $0xb8] sm:$0xff] %vm479_vm0, %v470_v7 }
  0x64   : > { %v529_v0 = vld [vmem:[#allocation2 + $0x88] sm:$0xff]  ;;  %504 = vst.msk [vmem:[#allocation2 + $0xc0] sm:$0xff] %vm479_vm0, %v471_v20 }
  0x65   : > { %v552_v1 = vpack.c.bf16 %v529_v0, %v528_v63  ;;  %v530_v11 = vld [vmem:[#allocation2 + $0x90] sm:$0xff]  ;;  %505 = vst.msk [vmem:[#allocation2 + $0xc8] sm:$0xff] %vm479_vm0, %v472_v21  ;;  %v478_v63 = vld [vmem:[%s5702_s18 + $0xf8] sm:$0xff]  ;;  %s392_s18 = sand.u32 1, %s5527_s10  }
  0x66   : > { %v531_v12 = vld [vmem:[#allocation2 + $0x98] sm:$0xff]  ;;  %506 = vst.msk [vmem:[#allocation2 + $0xd0] sm:$0xff] %vm479_vm0, %v473_v34  ;;  %s4475_s27 = sshll.u32 %s392_s18, 8  ;;  %s4311_s13 = scalar_lea.sflag [#allocation5], %s392_s18 }
  0x67   : > { %v553_v16 = vpack.c.bf16 %v531_v12, %v530_v11  ;;  %v532_v25 = vld [vmem:[#allocation2 + $0xa0] sm:$0xff]  ;;  %507 = vst.msk [vmem:[#allocation2 + $0xd8] sm:$0xff] %vm479_vm0, %v474_v35  ;;  %v5000_v34 = vld [vmem:[%s7158_s3 + $0x58] sm:$0xff]  ;;  %s6585_s17 = scalar_lea.vmem [#allocation11], %s4475_s27 }
  0x68   : > { %v533_v26 = vld [vmem:[#allocation2 + $0xa8] sm:$0xff]  ;;  %508 = vst.msk [vmem:[#allocation2 + $0xe0] sm:$0xff] %vm479_vm0, %v475_v48  ;;  %s4328_s11 = sshll.u32 %s6585_s17, 4  ;;  %s4329_s11 = int_to_ptr.vmem [resolvable:$true] %s4328_s11 }
  0x69   : > { %v554_v30 = vpack.c.bf16 %v533_v26, %v532_v25  ;;  %v534_v39 = vld [vmem:[#allocation2 + $0xb0] sm:$0xff]  ;;  %509 = vst.msk [vmem:[#allocation2 + $0xe8] sm:$0xff] %vm479_vm0, %v476_v49  ;;  %v5002_v25 = vld [vmem:[%s7158_s3 + $0x68] sm:$0xff] }
  0x6a   : > { %v535_v40 = vld [vmem:[#allocation2 + $0xb8] sm:$0xff]  ;;  %510 = vst.msk [vmem:[#allocation2 + $0xf0] sm:$0xff] %vm479_vm0, %v477_v62 }
  0x6b   : > { %646 = vmatmul.bf16.gmra.mxu0 %v546_v27  ;;  %v555_v44 = vpack.c.bf16 %v535_v40, %v534_v39  ;;  %v536_v53 = vld [vmem:[#allocation2 + $0xc0] sm:$0xff]  ;;  %511 = vst.msk [vmem:[#allocation2 + $0xf8] sm:$0xff] %vm479_vm0, %v478_v63  ;;  %v4999_v40 = vld [vmem:[%s7158_s3 + $0x50] sm:$0xff] }
  0x6c   : > { %v537_v54 = vld [vmem:[#allocation2 + $0xc8] sm:$0xff] }
  0x6d   : > { %v556_v58 = vpack.c.bf16 %v537_v54, %v536_v53 }
  0x7b   : > { %651 = vmatmul.bf16.gmra.mxu0 %v547_v32 }
  0x8b   : > { %656 = vmatmul.bf16.gmra.mxu0 %v548_v37 }
  0x9b   : > { %661 = vmatmul.bf16.gmra.mxu0 %v549_v43 }
  0xab   : > { %666 = vmatmul.bf16.gmra.mxu0 %v550_v51 }
  0xbb   : > { %671 = vmatmul.bf16.gmra.mxu0 %v551_v60 }
  0xc8   : > { %v637_v2 = vpop.f32.mrf.mxu0 }
  0xc9   : > { %v638_v4 = vadd.f32 %v5796_v3, %v637_v2 }
  0xcb   : > { %676 = vmatmul.bf16.gmra.mxu0 %v552_v1  ;;  %v749_v8 = vmul.f32 0.2, %v638_v4  ;;  %vm717_vm1 = vcmp.gt.f32.partialorder %v638_v4, 0.0 }
  0xcd   : > { %v781_v13 = vsel %vm717_vm1, %v638_v4, %v749_v8  ;;  %v538_v4 = vld [vmem:[#allocation2 + $0xd0] sm:$0xff] }
  0xd0   : > { %v639_v5 = vpop.f32.mrf.mxu0 }
  0xd1   : > { %v640_v9 = vadd.f32 %v5796_v3, %v639_v5  ;;  %v539_v5 = vld [vmem:[#allocation2 + $0xd8] sm:$0xff] }
  0xd3   : > { %v750_v10 = vmul.f32 0.2, %v640_v9  ;;  %vm718_vm2 = vcmp.gt.f32.partialorder %v640_v9, 0.0 }
  0xd5   : > { %v782_v14 = vsel %vm718_vm2, %v640_v9, %v750_v10  ;;  %v557_v9 = vpack.c.bf16 %v539_v5, %v538_v4 }
  0xd6   : > { %v813_v15 = vpack.c.bf16 %v782_v14, %v781_v13 }
  0xd8   : > { %v642_v17 = vpop.f32.mrf.mxu0  ;;  %905 = vmatmul.bf16.vlgmr.msra.gmra.mxu1 %v813_v15 }
  0xd9   : > { %v643_v18 = vadd.f32 %v5796_v3, %v642_v17  ;;  %v540_v17 = vld [vmem:[#allocation2 + $0xe0] sm:$0xff] }
  0xdb   : > { %681 = vmatmul.bf16.gmra.mxu0 %v553_v16  ;;  %v751_v22 = vmul.f32 0.2, %v643_v18  ;;  %vm719_vm3 = vcmp.gt.f32.partialorder %v643_v18, 0.0  ;;  %v5004_v16 = vld [vmem:[%s7158_s3 + $0x78] sm:$0xff] }
  0xdc   : > { %1168 = vmatpush.bf16.msra.mxu2 %v5004_v16 }
  0xdd   : > { %v783_v27 = vsel %vm719_vm3, %v643_v18, %v751_v22  ;;  %v541_v18 = vld [vmem:[#allocation2 + $0xe8] sm:$0xff] }
  0xde   : > { %v558_v22 = vpack.c.bf16 %v541_v18, %v540_v17 }
  0xe0   : > { %v644_v19 = vpop.f32.mrf.mxu0 }
  0xe1   : > { %v645_v23 = vadd.f32 %v5796_v3, %v644_v19 }
  0xe3   : > { %v752_v24 = vmul.f32 0.2, %v645_v23  ;;  %vm720_vm4 = vcmp.gt.f32.partialorder %v645_v23, 0.0 }
  0xe5   : > { %v784_v28 = vsel %vm720_vm4, %v645_v23, %v752_v24  ;;  %v5003_v24 = vld [vmem:[%s7158_s3 + $0x70] sm:$0xff] }
  0xe6   : > { %v814_v29 = vpack.c.bf16 %v784_v28, %v783_v27  ;;  %1169 = vmatpush.bf16.msra.mxu2 %v5003_v24  ;;  %v5001_v28 = vld [vmem:[%s7158_s3 + $0x60] sm:$0xff] }
  0xe8   : > { %v647_v31 = vpop.f32.mrf.mxu0  ;;  %910 = vmatmul.bf16.gmra.mxu1 %v814_v29 }
  0xe9   : > { %v648_v32 = vadd.f32 %v5796_v3, %v647_v31 }
  0xea   : > { %1170 = vmatpush.bf16.msra.mxu2 %v5002_v25 }
  0xeb   : > { %686 = vmatmul.bf16.gmra.mxu0 %v554_v30  ;;  %v753_v36 = vmul.f32 0.2, %v648_v32  ;;  %vm721_vm5 = vcmp.gt.f32.partialorder %v648_v32, 0.0 }
  0xed   : > { %v785_v41 = vsel %vm721_vm5, %v648_v32, %v753_v36  ;;  %v542_v32 = vld [vmem:[#allocation2 + $0xf0] sm:$0xff] }
  0xee   : > { %1171 = vmatpush.bf16.msra.mxu2 %v5001_v28 }
  0xf0   : > { %v649_v33 = vpop.f32.mrf.mxu0 }
  0xf1   : > { %v650_v37 = vadd.f32 %v5796_v3, %v649_v33  ;;  %v543_v33 = vld [vmem:[#allocation2 + $0xf8] sm:$0xff] }
  0xf2   : > { %1172 = vmatpush.bf16.msra.mxu2 %v5000_v34 }
  0xf3   : > { %v754_v38 = vmul.f32 0.2, %v650_v37  ;;  %vm722_vm6 = vcmp.gt.f32.partialorder %v650_v37, 0.0 }
  0xf5   : > { %v786_v42 = vsel %vm722_vm6, %v650_v37, %v754_v38  ;;  %v559_v38 = vpack.c.bf16 %v543_v33, %v542_v32 }
  0xf6   : > { %v815_v43 = vpack.c.bf16 %v786_v42, %v785_v41  ;;  %1173 = vmatpush.bf16.msra.mxu2 %v4999_v40  ;;  %v4998_v41 = vld [vmem:[%s7158_s3 + $0x48] sm:$0xff] }
  0xf8   : > { %v652_v45 = vpop.f32.mrf.mxu0  ;;  %915 = vmatmul.bf16.gmra.mxu1 %v815_v43 }
  0xf9   : > { %v653_v46 = vadd.f32 %v5796_v3, %v652_v45 }
  0xfa   : > { %1174 = vmatpush.bf16.msra.mxu2 %v4998_v41 }
  0xfb   : > { %691 = vmatmul.bf16.gmra.mxu0 %v555_v44  ;;  %v755_v50 = vmul.f32 0.2, %v653_v46  ;;  %vm723_vm7 = vcmp.gt.f32.partialorder %v653_v46, 0.0  ;;  %v4997_v44 = vld [vmem:[%s7158_s3 + $0x40] sm:$0xff] }
  0xfd   : > { %v787_v55 = vsel %vm723_vm7, %v653_v46, %v755_v50 }
  0xfe   : > { %1175 = vmatpush.bf16.msra.mxu2 %v4997_v44 }
 0x100   : > { %v654_v47 = vpop.f32.mrf.mxu0 }
 0x101   : > { %v655_v51 = vadd.f32 %v5796_v3, %v654_v47 }
 0x103   : > { %v756_v52 = vmul.f32 0.2, %v655_v51  ;;  %vm724_vm8 = vcmp.gt.f32.partialorder %v655_v51, 0.0 }
 0x105   : > { %v788_v56 = vsel %vm724_vm8, %v655_v51, %v756_v52 }
 0x106   : > { %v816_v57 = vpack.c.bf16 %v788_v56, %v787_v55 }
 0x108   : > { %v657_v59 = vpop.f32.mrf.mxu0  ;;  %920 = vmatmul.bf16.gmra.mxu1 %v816_v57 }
 0x109   : > { %v658_v60 = vadd.f32 %v5796_v3, %v657_v59 }
 0x10b   : > { %696 = vmatmul.bf16.gmra.mxu0 %v556_v58  ;;  %v757_v0 = vmul.f32 0.2, %v658_v60  ;;  %vm725_vm9 = vcmp.gt.f32.partialorder %v658_v60, 0.0 }
 0x10d   : > { %v789_v6 = vsel %vm725_vm9, %v658_v60, %v757_v0  ;;  %v5860_v60 = vld [vmem:[#allocation6] ss:$0 sm:$0xff] }
 0x110   : > { %v659_v61 = vpop.f32.mrf.mxu0 }
 0x111   : > { %v660_v1 = vadd.f32 %v5796_v3, %v659_v61 }
 0x113   : > { %v758_v2 = vmul.f32 0.2, %v660_v1  ;;  %vm726_vm10 = vcmp.gt.f32.partialorder %v660_v1, 0.0 }
 0x115   : > { %v790_v7 = vsel %vm726_vm10, %v660_v1, %v758_v2 }
 0x116   : > { %v817_v8 = vpack.c.bf16 %v790_v7, %v789_v6 }
 0x118   : > { %v662_v10 = vpop.f32.mrf.mxu0  ;;  %925 = vmatmul.bf16.gmra.mxu1 %v817_v8 }
 0x119   : > { %v663_v11 = vadd.f32 %v5796_v3, %v662_v10 }
 0x11b   : > { %701 = vmatmul.bf16.gmra.mxu0 %v557_v9  ;;  %v759_v13 = vmul.f32 0.2, %v663_v11  ;;  %vm727_vm11 = vcmp.gt.f32.partialorder %v663_v11, 0.0 }
 0x11d   : > { %v791_v19 = vsel %vm727_vm11, %v663_v11, %v759_v13 }
 0x120   : > { %v664_v12 = vpop.f32.mrf.mxu0 }
 0x121   : > { %v665_v14 = vadd.f32 %v5796_v3, %v664_v12 }
 0x123   : > { %v760_v15 = vmul.f32 0.2, %v665_v14  ;;  %vm728_vm12 = vcmp.gt.f32.partialorder %v665_v14, 0.0 }
 0x125   : > { %v792_v20 = vsel %vm728_vm12, %v665_v14, %v760_v15 }
 0x126   : > { %v818_v21 = vpack.c.bf16 %v792_v20, %v791_v19  ;;  %v5020_v19 = vld [vmem:[%s7156_s1 + $0x78] sm:$0xff] }
 0x127   : > { %1644 = vmatpush.bf16.msrb.mxu0 %v5020_v19 }
 0x128   : > { %v667_v23 = vpop.f32.mrf.mxu0  ;;  %930 = vmatmul.bf16.gmra.mxu1 %v818_v21 }
 0x129   : > { %v668_v26 = vadd.f32 %v5796_v3, %v667_v23 }
 0x12b   : > { %706 = vmatmul.bf16.gmra.mxu0 %v558_v22  ;;  %v761_v29 = vmul.f32 0.2, %v668_v26  ;;  %vm729_vm13 = vcmp.gt.f32.partialorder %v668_v26, 0.0 }
 0x12d   : > { %v793_v35 = vsel %vm729_vm13, %v668_v26, %v761_v29 }
 0x130   : > { %v669_v27 = vpop.f32.mrf.mxu0 }
 0x131   : > { %v670_v30 = vadd.f32 %v5796_v3, %v669_v27 }
 0x133   : > { %v762_v31 = vmul.f32 0.2, %v670_v30  ;;  %vm730_vm14 = vcmp.gt.f32.partialorder %v670_v30, 0.0 }
 0x135   : > { %v794_v36 = vsel %vm730_vm14, %v670_v30, %v762_v31 }
 0x136   : > { %v819_v37 = vpack.c.bf16 %v794_v36, %v793_v35 }
 0x138   : > { %v672_v39 = vpop.f32.mrf.mxu0  ;;  %935 = vmatmul.bf16.gmra.mxu1 %v819_v37 }
 0x139   : > { %v673_v42 = vadd.f32 %v5796_v3, %v672_v39 }
 0x13b   : > { %711 = vmatmul.bf16.gmra.mxu0 %v559_v38  ;;  %v763_v45 = vmul.f32 0.2, %v673_v42  ;;  %vm731_vm15 = vcmp.gt.f32.partialorder %v673_v42, 0.0 }
 0x13d   : > { %v795_v48 = vsel %vm731_vm15, %v673_v42, %v763_v45 }
 0x140   : > { %v674_v43 = vpop.f32.mrf.mxu0 }
 0x141   : > { %v675_v46 = vadd.f32 %v5796_v3, %v674_v43 }
 0x143   : > { %v764_v47 = vmul.f32 0.2, %v675_v46  ;;  %vm732_vm0 = vcmp.gt.f32.partialorder %v675_v46, 0.0 }
 0x145   : > { %v796_v49 = vsel %vm732_vm0, %v675_v46, %v764_v47 }
 0x146   : > { %v820_v50 = vpack.c.bf16 %v796_v49, %v795_v48 }
 0x148   : > { %v677_v51 = vpop.f32.mrf.mxu0  ;;  %940 = vmatmul.bf16.gmra.mxu1 %v820_v50 }
 0x149   : > { %v678_v52 = vadd.f32 %v5796_v3, %v677_v51 }
 0x14b   : > { %v765_v54 = vmul.f32 0.2, %v678_v52  ;;  %vm733_vm1 = vcmp.gt.f32.partialorder %v678_v52, 0.0 }
 0x14d   : > { %v797_v58 = vsel %vm733_vm1, %v678_v52, %v765_v54 }
 0x150   : > { %v679_v53 = vpop.f32.mrf.mxu0 }
 0x151   : > { %v680_v55 = vadd.f32 %v5796_v3, %v679_v53 }
 0x153   : > { %v766_v56 = vmul.f32 0.2, %v680_v55  ;;  %vm734_vm2 = vcmp.gt.f32.partialorder %v680_v55, 0.0 }
 0x155   : > { %v906_v57 = vpop.f32.mrf.mxu1  ;;  %v798_v59 = vsel %vm734_vm2, %v680_v55, %v766_v56  ;;  %v5019_v56 = vld [vmem:[%s7156_s1 + $0x70] sm:$0xff] }
 0x156   : > { %v821_v61 = vpack.c.bf16 %v798_v59, %v797_v58  ;;  %v907_v63 = vadd.f32 %v5860_v60, %v906_v57  ;;  %1645 = vmatpush.bf16.msrb.mxu0 %v5019_v56  ;;  %v5010_v56 = vld [vmem:[#allocation8 + $0x28] sm:$0xff] }
 0x158   : > { %v682_v62 = vpop.f32.mrf.mxu0  ;;  %945 = vmatmul.bf16.gmra.mxu1 %v821_v61  ;;  %v1018_v2 = vmul.f32 0.2, %v907_v63  ;;  %vm986_vm3 = vcmp.gt.f32.partialorder %v907_v63, 0.0 }
 0x159   : > { %v683_v0 = vadd.f32 %v5796_v3, %v682_v62 }
 0x15a   : > { %v1050_v9 = vsel %vm986_vm3, %v907_v63, %v1018_v2 }
 0x15b   : > { %v767_v7 = vmul.f32 0.2, %v683_v0  ;;  %vm735_vm5 = vcmp.gt.f32.partialorder %v683_v0, 0.0 }
 0x15d   : > { %v908_v1 = vpop.f32.mrf.mxu1  ;;  %v799_v14 = vsel %vm735_vm5, %v683_v0, %v767_v7 }
 0x15e   : > { %v909_v4 = vadd.f32 %v5860_v60, %v908_v1 }
 0x160   : > { %v1019_v5 = vmul.f32 0.2, %v909_v4  ;;  %v684_v6 = vpop.f32.mrf.mxu0  ;;  %vm987_vm4 = vcmp.gt.f32.partialorder %v909_v4, 0.0 }
 0x161   : > { %v685_v8 = vadd.f32 %v5796_v3, %v684_v6 }
 0x162   : > { %v1051_v10 = vsel %vm987_vm4, %v909_v4, %v1019_v5 }
 0x163   : > { %v768_v11 = vmul.f32 0.2, %v685_v8  ;;  %v1082_v12 = vpack.c.bf16 %v1051_v10, %v1050_v9  ;;  %vm736_vm6 = vcmp.gt.f32.partialorder %v685_v8, 0.0 }
 0x165   : > { %v911_v13 = vpop.f32.mrf.mxu1  ;;  %1176 = vmatmul.bf16.vlgmr.msra.gmra.mxu2 %v1082_v12  ;;  %v800_v15 = vsel %vm736_vm6, %v685_v8, %v768_v11 }
 0x166   : > { %v822_v16 = vpack.c.bf16 %v800_v15, %v799_v14  ;;  %v912_v18 = vadd.f32 %v5860_v60, %v911_v13 }
 0x168   : > { %v687_v17 = vpop.f32.mrf.mxu0  ;;  %950 = vmatmul.bf16.gmra.mxu1 %v822_v16  ;;  %v1020_v22 = vmul.f32 0.2, %v912_v18  ;;  %vm988_vm7 = vcmp.gt.f32.partialorder %v912_v18, 0.0 }
 0x169   : > { %v688_v20 = vadd.f32 %v5796_v3, %v687_v17 }
 0x16a   : > { %v1052_v28 = vsel %vm988_vm7, %v912_v18, %v1020_v22 }
 0x16b   : > { %v769_v26 = vmul.f32 0.2, %v688_v20  ;;  %vm737_vm9 = vcmp.gt.f32.partialorder %v688_v20, 0.0 }
 0x16d   : > { %v913_v21 = vpop.f32.mrf.mxu1  ;;  %v801_v33 = vsel %vm737_vm9, %v688_v20, %v769_v26 }
 0x16e   : > { %v914_v23 = vadd.f32 %v5860_v60, %v913_v21 }
 0x170   : > { %v1021_v24 = vmul.f32 0.2, %v914_v23  ;;  %v689_v25 = vpop.f32.mrf.mxu0  ;;  %vm989_vm8 = vcmp.gt.f32.partialorder %v914_v23, 0.0 }
 0x171   : > { %v690_v27 = vadd.f32 %v5796_v3, %v689_v25 }
 0x172   : > { %v1053_v29 = vsel %vm989_vm8, %v914_v23, %v1021_v24 }
 0x173   : > { %v770_v30 = vmul.f32 0.2, %v690_v27  ;;  %v1083_v31 = vpack.c.bf16 %v1053_v29, %v1052_v28  ;;  %vm738_vm10 = vcmp.gt.f32.partialorder %v690_v27, 0.0 }
 0x175   : > { %v916_v32 = vpop.f32.mrf.mxu1  ;;  %1181 = vmatmul.bf16.gmra.mxu2 %v1083_v31  ;;  %v802_v34 = vsel %vm738_vm10, %v690_v27, %v770_v30  ;;  %v5018_v30 = vld [vmem:[%s7156_s1 + $0x68] sm:$0xff] }
 0x176   : > { %v823_v35 = vpack.c.bf16 %v802_v34, %v801_v33  ;;  %v917_v37 = vadd.f32 %v5860_v60, %v916_v32  ;;  %1646 = vmatpush.bf16.msrb.mxu0 %v5018_v30 }
 0x178   : > { %v692_v36 = vpop.f32.mrf.mxu0  ;;  %955 = vmatmul.bf16.gmra.mxu1 %v823_v35  ;;  %v1022_v40 = vmul.f32 0.2, %v917_v37  ;;  %vm990_vm11 = vcmp.gt.f32.partialorder %v917_v37, 0.0 }
 0x179   : > { %v693_v38 = vadd.f32 %v5796_v3, %v692_v36 }
 0x17a   : > { %v1054_v46 = vsel %vm990_vm11, %v917_v37, %v1022_v40 }
 0x17b   : > { %v771_v44 = vmul.f32 0.2, %v693_v38  ;;  %vm739_vm13 = vcmp.gt.f32.partialorder %v693_v38, 0.0 }
 0x17d   : > { %v918_v39 = vpop.f32.mrf.mxu1  ;;  %v803_v51 = vsel %vm739_vm13, %v693_v38, %v771_v44 }
 0x17e   : > { %v919_v41 = vadd.f32 %v5860_v60, %v918_v39 }
 0x180   : > { %v1023_v42 = vmul.f32 0.2, %v919_v41  ;;  %v694_v43 = vpop.f32.mrf.mxu0  ;;  %vm991_vm12 = vcmp.gt.f32.partialorder %v919_v41, 0.0 }
 0x181   : > { %v695_v45 = vadd.f32 %v5796_v3, %v694_v43 }
 0x182   : > { %v1055_v47 = vsel %vm991_vm12, %v919_v41, %v1023_v42 }
 0x183   : > { %v772_v48 = vmul.f32 0.2, %v695_v45  ;;  %v1084_v49 = vpack.c.bf16 %v1055_v47, %v1054_v46  ;;  %vm740_vm14 = vcmp.gt.f32.partialorder %v695_v45, 0.0 }
 0x185   : > { %v921_v50 = vpop.f32.mrf.mxu1  ;;  %1186 = vmatmul.bf16.gmra.mxu2 %v1084_v49  ;;  %v804_v52 = vsel %vm740_vm14, %v695_v45, %v772_v48  ;;  %v5012_v48 = vld [vmem:[#allocation8 + $0x38] sm:$0xff] }
 0x186   : > { %v824_v53 = vpack.c.bf16 %v804_v52, %v803_v51  ;;  %v922_v55 = vadd.f32 %v5860_v60, %v921_v50  ;;  %1437 = vmatpush.bf16.msra.mxu3 %v5012_v48  ;;  %v5011_v51 = vld [vmem:[#allocation8 + $0x30] sm:$0xff] }
 0x188   : > { %v697_v54 = vpop.f32.mrf.mxu0  ;;  %960 = vmatmul.bf16.gmra.mxu1 %v824_v53  ;;  %v1024_v59 = vmul.f32 0.2, %v922_v55  ;;  %vm992_vm15 = vcmp.gt.f32.partialorder %v922_v55, 0.0 }
 0x189   : > { %v698_v57 = vadd.f32 %v5796_v3, %v697_v54 }
 0x18a   : > { %v1056_v2 = vsel %vm992_vm15, %v922_v55, %v1024_v59  ;;  %1438 = vmatpush.bf16.msra.mxu3 %v5011_v51  ;;  %v5028_v51 = vld [vmem:[%s7158_s3 + $0xb8] sm:$0xff] }
 0x18b   : > { %v773_v0 = vmul.f32 0.2, %v698_v57  ;;  %vm741_vm1 = vcmp.gt.f32.partialorder %v698_v57, 0.0  ;;  %1915 = vmatpush.bf16.msrb.mxu1 %v5028_v51 }
 0x18d   : > { %v923_v58 = vpop.f32.mrf.mxu1  ;;  %v805_v8 = vsel %vm741_vm1, %v698_v57, %v773_v0 }
 0x18e   : > { %v924_v61 = vadd.f32 %v5860_v60, %v923_v58  ;;  %1439 = vmatpush.bf16.msra.mxu3 %v5010_v56 }
 0x190   : > { %v1025_v62 = vmul.f32 0.2, %v924_v61  ;;  %v699_v63 = vpop.f32.mrf.mxu0  ;;  %vm993_vm0 = vcmp.gt.f32.partialorder %v924_v61, 0.0 }
 0x191   : > { %v700_v1 = vadd.f32 %v5796_v3, %v699_v63 }
 0x192   : > { %v1057_v4 = vsel %vm993_vm0, %v924_v61, %v1025_v62 }
 0x193   : > { %vm742_vm2 = vcmp.gt.f32.partialorder %v700_v1, 0.0  ;;  %v774_v5 = vmul.f32 0.2, %v700_v1  ;;  %v1085_v6 = vpack.c.bf16 %v1057_v4, %v1056_v2  ;;  %v5009_v2 = vld [vmem:[#allocation8 + $0x20] sm:$0xff] }
 0x194   : > { %1440 = vmatpush.bf16.msra.mxu3 %v5009_v2 }
 0x195   : > { %v926_v7 = vpop.f32.mrf.mxu1  ;;  %1191 = vmatmul.bf16.gmra.mxu2 %v1085_v6  ;;  %v806_v9 = vsel %vm742_vm2, %v700_v1, %v774_v5 }
 0x196   : > { %v825_v10 = vpack.c.bf16 %v806_v9, %v805_v8  ;;  %v927_v12 = vadd.f32 %v5860_v60, %v926_v7  ;;  %v5008_v8 = vld [vmem:[#allocation8 + $0x18] sm:$0xff] }
 0x198   : > { %v702_v11 = vpop.f32.mrf.mxu0  ;;  %965 = vmatmul.bf16.gmra.mxu1 %v825_v10  ;;  %v1026_v15 = vmul.f32 0.2, %v927_v12  ;;  %vm994_vm3 = vcmp.gt.f32.partialorder %v927_v12, 0.0  ;;  %1441 = vmatpush.bf16.msra.mxu3 %v5008_v8  ;;  %v5007_v10 = vld [vmem:[#allocation8 + $0x10] sm:$0xff] }
 0x199   : > { %v703_v13 = vadd.f32 %v5796_v3, %v702_v11 }
 0x19a   : > { %v1058_v21 = vsel %vm994_vm3, %v927_v12, %v1026_v15 }
 0x19b   : > { %v775_v19 = vmul.f32 0.2, %v703_v13  ;;  %vm743_vm5 = vcmp.gt.f32.partialorder %v703_v13, 0.0 }
 0x19c   : > { %1442 = vmatpush.bf16.msra.mxu3 %v5007_v10 }
 0x19d   : > { %v928_v14 = vpop.f32.mrf.mxu1  ;;  %v807_v26 = vsel %vm743_vm5, %v703_v13, %v775_v19  ;;  %v5005_v19 = vld [vmem:[#allocation8] sm:$0xff] }
 0x19e   : > { %v929_v16 = vadd.f32 %v5860_v60, %v928_v14  ;;  %v5006_v14 = vld [vmem:[#allocation8 + $0x8] sm:$0xff] }
 0x1a0   : > { %v1027_v17 = vmul.f32 0.2, %v929_v16  ;;  %v704_v18 = vpop.f32.mrf.mxu0  ;;  %vm995_vm4 = vcmp.gt.f32.partialorder %v929_v16, 0.0  ;;  %1443 = vmatpush.bf16.msra.mxu3 %v5006_v14 }
 0x1a1   : > { %v705_v20 = vadd.f32 %v5796_v3, %v704_v18 }
 0x1a2   : > { %v1059_v22 = vsel %vm995_vm4, %v929_v16, %v1027_v17 }
 0x1a3   : > { %vm744_vm6 = vcmp.gt.f32.partialorder %v705_v20, 0.0  ;;  %v776_v23 = vmul.f32 0.2, %v705_v20  ;;  %v1086_v24 = vpack.c.bf16 %v1059_v22, %v1058_v21 }
 0x1a4   : > { %1444 = vmatpush.bf16.msra.mxu3 %v5005_v19 }
 0x1a5   : > { %v931_v25 = vpop.f32.mrf.mxu1  ;;  %1196 = vmatmul.bf16.gmra.mxu2 %v1086_v24  ;;  %v808_v27 = vsel %vm744_vm6, %v705_v20, %v776_v23 }
 0x1a6   : > { %v826_v28 = vpack.c.bf16 %v808_v27, %v807_v26  ;;  %v932_v31 = vadd.f32 %v5860_v60, %v931_v25 }
 0x1a8   : > { %v707_v29 = vpop.f32.mrf.mxu0  ;;  %970 = vmatmul.bf16.gmra.mxu1 %v826_v28  ;;  %v1028_v34 = vmul.f32 0.2, %v932_v31  ;;  %vm996_vm7 = vcmp.gt.f32.partialorder %v932_v31, 0.0 }
 0x1a9   : > { %v708_v32 = vadd.f32 %v5796_v3, %v707_v29 }
 0x1aa   : > { %v1060_v40 = vsel %vm996_vm7, %v932_v31, %v1028_v34  ;;  %v5906_v31 = vld [vmem:[#allocation6 + $0x1] ss:$0 sm:$0xff] }
 0x1ab   : > { %v777_v38 = vmul.f32 0.2, %v708_v32  ;;  %vm745_vm9 = vcmp.gt.f32.partialorder %v708_v32, 0.0 }
 0x1ad   : > { %v933_v33 = vpop.f32.mrf.mxu1  ;;  %v809_v45 = vsel %vm745_vm9, %v708_v32, %v777_v38 }
 0x1ae   : > { %v934_v35 = vadd.f32 %v5860_v60, %v933_v33  ;;  %v5016_v33 = vld [vmem:[%s7156_s1 + $0x58] sm:$0xff] }
 0x1b0   : > { %v1029_v36 = vmul.f32 0.2, %v934_v35  ;;  %v709_v37 = vpop.f32.mrf.mxu0  ;;  %vm997_vm8 = vcmp.gt.f32.partialorder %v934_v35, 0.0 }
 0x1b1   : > { %v710_v39 = vadd.f32 %v5796_v3, %v709_v37 }
 0x1b2   : > { %v1061_v41 = vsel %vm997_vm8, %v934_v35, %v1029_v36 }
 0x1b3   : > { %vm746_vm10 = vcmp.gt.f32.partialorder %v710_v39, 0.0  ;;  %v778_v42 = vmul.f32 0.2, %v710_v39  ;;  %v1087_v43 = vpack.c.bf16 %v1061_v41, %v1060_v40 }
 0x1b5   : > { %v936_v44 = vpop.f32.mrf.mxu1  ;;  %1201 = vmatmul.bf16.gmra.mxu2 %v1087_v43  ;;  %v810_v46 = vsel %vm746_vm10, %v710_v39, %v778_v42 }
 0x1b6   : > { %v827_v47 = vpack.c.bf16 %v810_v46, %v809_v45  ;;  %v937_v50 = vadd.f32 %v5860_v60, %v936_v44 }
 0x1b8   : > { %v712_v49 = vpop.f32.mrf.mxu0  ;;  %975 = vmatmul.bf16.gmra.mxu1 %v827_v47  ;;  %v1030_v54 = vmul.f32 0.2, %v937_v50  ;;  %vm998_vm11 = vcmp.gt.f32.partialorder %v937_v50, 0.0 }
 0x1b9   : > { %v713_v52 = vadd.f32 %v5796_v3, %v712_v49 }
 0x1ba   : > { %v1062_v62 = vsel %vm998_vm11, %v937_v50, %v1030_v54 }
 0x1bb   : > { %v779_v59 = vmul.f32 0.2, %v713_v52  ;;  %vm747_vm13 = vcmp.gt.f32.partialorder %v713_v52, 0.0 }
 0x1bd   : > { %v938_v53 = vpop.f32.mrf.mxu1  ;;  %v811_v5 = vsel %vm747_vm13, %v713_v52, %v779_v59 }
 0x1be   : > { %v939_v55 = vadd.f32 %v5860_v60, %v938_v53 }
 0x1c0   : > { %v1031_v57 = vmul.f32 0.2, %v939_v55  ;;  %v714_v58 = vpop.f32.mrf.mxu0  ;;  %vm999_vm12 = vcmp.gt.f32.partialorder %v939_v55, 0.0 }
 0x1c1   : > { %v715_v61 = vadd.f32 %v5796_v3, %v714_v58  ;;  %v5017_v3 = vld [vmem:[%s7156_s1 + $0x60] sm:$0xff] }
 0x1c2   : > { %v1063_v63 = vsel %vm999_vm12, %v939_v55, %v1031_v57  ;;  %1647 = vmatpush.bf16.msrb.mxu0 %v5017_v3 }
 0x1c3   : > { %vm748_vm14 = vcmp.gt.f32.partialorder %v715_v61, 0.0  ;;  %v780_v0 = vmul.f32 0.2, %v715_v61  ;;  %v1088_v1 = vpack.c.bf16 %v1063_v63, %v1062_v62 }
 0x1c5   : > { %v941_v4 = vpop.f32.mrf.mxu1  ;;  %1206 = vmatmul.bf16.gmra.mxu2 %v1088_v1  ;;  %v812_v6 = vsel %vm748_vm14, %v715_v61, %v780_v0 }
 0x1c6   : > { %v828_v7 = vpack.c.bf16 %v812_v6, %v811_v5  ;;  %v942_v9 = vadd.f32 %v5860_v60, %v941_v4  ;;  %1648 = vmatpush.bf16.msrb.mxu0 %v5016_v33 }
 0x1c8   : > { %980 = vmatmul.bf16.gmra.mxu1 %v828_v7  ;;  %v1032_v12 = vmul.f32 0.2, %v942_v9  ;;  %vm1000_vm15 = vcmp.gt.f32.partialorder %v942_v9, 0.0 }
 0x1ca   : > { %v1064_v16 = vsel %vm1000_vm15, %v942_v9, %v1032_v12  ;;  %v5015_v9 = vld [vmem:[%s7156_s1 + $0x50] sm:$0xff] }
 0x1cb   : > { %1649 = vmatpush.bf16.msrb.mxu0 %v5015_v9 }
 0x1cd   : > { %v943_v11 = vpop.f32.mrf.mxu1 }
 0x1ce   : > { %v944_v13 = vadd.f32 %v5860_v60, %v943_v11 }
 0x1d0   : > { %v1033_v15 = vmul.f32 0.2, %v944_v13  ;;  %vm1001_vm0 = vcmp.gt.f32.partialorder %v944_v13, 0.0 }
 0x1d2   : > { %v1065_v17 = vsel %vm1001_vm0, %v944_v13, %v1033_v15 }
 0x1d3   : > { %v1089_v18 = vpack.c.bf16 %v1065_v17, %v1064_v16 }
 0x1d5   : > { %v946_v20 = vpop.f32.mrf.mxu1  ;;  %1211 = vmatmul.bf16.gmra.mxu2 %v1089_v18 }
 0x1d6   : > { %v947_v21 = vadd.f32 %v5860_v60, %v946_v20 }
 0x1d8   : > { %v1034_v23 = vmul.f32 0.2, %v947_v21  ;;  %vm1002_vm1 = vcmp.gt.f32.partialorder %v947_v21, 0.0 }
 0x1da   : > { %v1066_v26 = vsel %vm1002_vm1, %v947_v21, %v1034_v23 }
 0x1dd   : > { %v948_v22 = vpop.f32.mrf.mxu1 }
 0x1de   : > { %v949_v24 = vadd.f32 %v5860_v60, %v948_v22 }
 0x1e0   : > { %v1035_v25 = vmul.f32 0.2, %v949_v24  ;;  %vm1003_vm2 = vcmp.gt.f32.partialorder %v949_v24, 0.0 }
 0x1e2   : > { %v1067_v27 = vsel %vm1003_vm2, %v949_v24, %v1035_v25 }
 0x1e3   : > { %v1090_v28 = vpack.c.bf16 %v1067_v27, %v1066_v26  ;;  %v5027_v26 = vld [vmem:[%s7158_s3 + $0xb0] sm:$0xff] }
 0x1e4   : > { %1916 = vmatpush.bf16.msrb.mxu1 %v5027_v26 }
 0x1e5   : > { %v951_v29 = vpop.f32.mrf.mxu1  ;;  %1216 = vmatmul.bf16.gmra.mxu2 %v1090_v28 }
 0x1e6   : > { %v952_v32 = vadd.f32 %v5860_v60, %v951_v29 }
 0x1e8   : > { %v1177_v30 = vpop.f32.mrf.mxu2  ;;  %v1036_v36 = vmul.f32 0.2, %v952_v32  ;;  %vm1004_vm3 = vcmp.gt.f32.partialorder %v952_v32, 0.0 }
 0x1e9   : > { %v1178_v34 = vadd.f32 %v5906_v31, %v1177_v30 }
 0x1ea   : > { %v1068_v42 = vsel %vm1004_vm3, %v952_v32, %v1036_v36 }
 0x1eb   : > { %v1289_v40 = vmul.f32 0.2, %v1178_v34  ;;  %vm1257_vm5 = vcmp.gt.f32.partialorder %v1178_v34, 0.0 }
 0x1ed   : > { %v953_v35 = vpop.f32.mrf.mxu1  ;;  %v1321_v47 = vsel %vm1257_vm5, %v1178_v34, %v1289_v40 }
 0x1ee   : > { %v954_v37 = vadd.f32 %v5860_v60, %v953_v35 }
 0x1f0   : > { %v1037_v38 = vmul.f32 0.2, %v954_v37  ;;  %v1179_v39 = vpop.f32.mrf.mxu2  ;;  %vm1005_vm4 = vcmp.gt.f32.partialorder %v954_v37, 0.0 }
 0x1f1   : > { %v1180_v41 = vadd.f32 %v5906_v31, %v1179_v39 }
 0x1f2   : > { %v1069_v43 = vsel %vm1005_vm4, %v954_v37, %v1037_v38 }
 0x1f3   : > { %v1290_v44 = vmul.f32 0.2, %v1180_v41  ;;  %v1091_v45 = vpack.c.bf16 %v1069_v43, %v1068_v42  ;;  %vm1258_vm6 = vcmp.gt.f32.partialorder %v1180_v41, 0.0 }
 0x1f5   : > { %v956_v46 = vpop.f32.mrf.mxu1  ;;  %1221 = vmatmul.bf16.gmra.mxu2 %v1091_v45  ;;  %v1322_v48 = vsel %vm1258_vm6, %v1180_v41, %v1290_v44 }
 0x1f6   : > { %v1353_v49 = vpack.c.bf16 %v1322_v48, %v1321_v47  ;;  %v957_v52 = vadd.f32 %v5860_v60, %v956_v46  ;;  %v5014_v47 = vld [vmem:[%s7156_s1 + $0x48] sm:$0xff] }
 0x1f7   : > { %1650 = vmatpush.bf16.msrb.mxu0 %v5014_v47 }
 0x1f8   : > { %v1182_v50 = vpop.f32.mrf.mxu2  ;;  %1445 = vmatmul.bf16.vlgmr.msra.gmra.mxu3 %v1353_v49  ;;  %v1038_v55 = vmul.f32 0.2, %v957_v52  ;;  %vm1006_vm7 = vcmp.gt.f32.partialorder %v957_v52, 0.0 }
 0x1f9   : > { %v1183_v53 = vadd.f32 %v5906_v31, %v1182_v50 }
 0x1fa   : > { %v1070_v62 = vsel %vm1006_vm7, %v957_v52, %v1038_v55 }
 0x1fb   : > { %v1291_v59 = vmul.f32 0.2, %v1183_v53  ;;  %vm1259_vm9 = vcmp.gt.f32.partialorder %v1183_v53, 0.0 }
 0x1fd   : > { %v958_v54 = vpop.f32.mrf.mxu1  ;;  %v1323_v4 = vsel %vm1259_vm9, %v1183_v53, %v1291_v59 }
 0x1fe   : > { %v959_v56 = vadd.f32 %v5860_v60, %v958_v54 }
 0x200   : > { %v1039_v57 = vmul.f32 0.2, %v959_v56  ;;  %v1184_v58 = vpop.f32.mrf.mxu2  ;;  %vm1007_vm8 = vcmp.gt.f32.partialorder %v959_v56, 0.0 }
 0x201   : > { %v1185_v61 = vadd.f32 %v5906_v31, %v1184_v58 }
 0x202   : > { %v1071_v63 = vsel %vm1007_vm8, %v959_v56, %v1039_v57 }
 0x203   : > { %v1292_v0 = vmul.f32 0.2, %v1185_v61  ;;  %v1092_v1 = vpack.c.bf16 %v1071_v63, %v1070_v62  ;;  %vm1260_vm10 = vcmp.gt.f32.partialorder %v1185_v61, 0.0 }
 0x205   : > { %v961_v2 = vpop.f32.mrf.mxu1  ;;  %1226 = vmatmul.bf16.gmra.mxu2 %v1092_v1  ;;  %v1324_v5 = vsel %vm1260_vm10, %v1185_v61, %v1292_v0  ;;  %v5026_v0 = vld [vmem:[%s7158_s3 + $0xa8] sm:$0xff] }
 0x206   : > { %v1354_v6 = vpack.c.bf16 %v1324_v5, %v1323_v4  ;;  %v962_v8 = vadd.f32 %v5860_v60, %v961_v2  ;;  %1917 = vmatpush.bf16.msrb.mxu1 %v5026_v0 }
 0x208   : > { %v1187_v7 = vpop.f32.mrf.mxu2  ;;  %1450 = vmatmul.bf16.gmra.mxu3 %v1354_v6  ;;  %v1040_v11 = vmul.f32 0.2, %v962_v8  ;;  %vm1008_vm11 = vcmp.gt.f32.partialorder %v962_v8, 0.0 }
 0x209   : > { %v1188_v3 = vadd.f32 %v5906_v31, %v1187_v7 }
 0x20a   : > { %v1072_v17 = vsel %vm1008_vm11, %v962_v8, %v1040_v11 }
 0x20b   : > { %v1293_v15 = vmul.f32 0.2, %v1188_v3  ;;  %vm1261_vm13 = vcmp.gt.f32.partialorder %v1188_v3, 0.0 }
 0x20d   : > { %v963_v10 = vpop.f32.mrf.mxu1  ;;  %v1325_v22 = vsel %vm1261_vm13, %v1188_v3, %v1293_v15 }
 0x20e   : > { %v964_v12 = vadd.f32 %v5860_v60, %v963_v10 }
 0x210   : > { %v1041_v13 = vmul.f32 0.2, %v964_v12  ;;  %v1189_v14 = vpop.f32.mrf.mxu2  ;;  %vm1009_vm12 = vcmp.gt.f32.partialorder %v964_v12, 0.0 }
 0x211   : > { %v1190_v16 = vadd.f32 %v5906_v31, %v1189_v14 }
 0x212   : > { %v1073_v18 = vsel %vm1009_vm12, %v964_v12, %v1041_v13 }
 0x213   : > { %v1294_v19 = vmul.f32 0.2, %v1190_v16  ;;  %v1093_v20 = vpack.c.bf16 %v1073_v18, %v1072_v17  ;;  %vm1262_vm14 = vcmp.gt.f32.partialorder %v1190_v16, 0.0 }
 0x215   : > { %v966_v21 = vpop.f32.mrf.mxu1  ;;  %1231 = vmatmul.bf16.gmra.mxu2 %v1093_v20  ;;  %v1326_v23 = vsel %vm1262_vm14, %v1190_v16, %v1294_v19 }
 0x216   : > { %v1355_v24 = vpack.c.bf16 %v1326_v23, %v1325_v22  ;;  %v967_v27 = vadd.f32 %v5860_v60, %v966_v21  ;;  %v5013_v22 = vld [vmem:[%s7156_s1 + $0x40] sm:$0xff] }
 0x217   : > { %1651 = vmatpush.bf16.msrb.mxu0 %v5013_v22 }
 0x218   : > { %v1192_v25 = vpop.f32.mrf.mxu2  ;;  %1455 = vmatmul.bf16.gmra.mxu3 %v1355_v24  ;;  %v1042_v30 = vmul.f32 0.2, %v967_v27  ;;  %vm1010_vm15 = vcmp.gt.f32.partialorder %v967_v27, 0.0 }
 0x219   : > { %v1193_v28 = vadd.f32 %v5906_v31, %v1192_v25 }
 0x21a   : > { %v1074_v37 = vsel %vm1010_vm15, %v967_v27, %v1042_v30 }
 0x21b   : > { %v1295_v35 = vmul.f32 0.2, %v1193_v28  ;;  %vm1263_vm1 = vcmp.gt.f32.partialorder %v1193_v28, 0.0 }
 0x21d   : > { %v968_v29 = vpop.f32.mrf.mxu1  ;;  %v1327_v42 = vsel %vm1263_vm1, %v1193_v28, %v1295_v35 }
 0x21e   : > { %v969_v32 = vadd.f32 %v5860_v60, %v968_v29 }
 0x220   : > { %vm1011_vm0 = vcmp.gt.f32.partialorder %v969_v32, 0.0  ;;  %v1043_v33 = vmul.f32 0.2, %v969_v32  ;;  %v1194_v34 = vpop.f32.mrf.mxu2 }
 0x221   : > { %v1195_v36 = vadd.f32 %v5906_v31, %v1194_v34 }
 0x222   : > { %v1075_v38 = vsel %vm1011_vm0, %v969_v32, %v1043_v33 }
 0x223   : > { %v1296_v39 = vmul.f32 0.2, %v1195_v36  ;;  %v1094_v40 = vpack.c.bf16 %v1075_v38, %v1074_v37  ;;  %vm1264_vm2 = vcmp.gt.f32.partialorder %v1195_v36, 0.0 }
 0x225   : > { %v971_v41 = vpop.f32.mrf.mxu1  ;;  %1236 = vmatmul.bf16.gmra.mxu2 %v1094_v40  ;;  %v1328_v43 = vsel %vm1264_vm2, %v1195_v36, %v1296_v39  ;;  %v5025_v36 = vld [vmem:[%s7158_s3 + $0xa0] sm:$0xff] }
 0x226   : > { %v1356_v44 = vpack.c.bf16 %v1328_v43, %v1327_v42  ;;  %v972_v46 = vadd.f32 %v5860_v60, %v971_v41  ;;  %1918 = vmatpush.bf16.msrb.mxu1 %v5025_v36 }
 0x228   : > { %v1197_v45 = vpop.f32.mrf.mxu2  ;;  %1460 = vmatmul.bf16.gmra.mxu3 %v1356_v44  ;;  %v1044_v50 = vmul.f32 0.2, %v972_v46  ;;  %vm1012_vm3 = vcmp.gt.f32.partialorder %v972_v46, 0.0 }
 0x229   : > { %v1198_v48 = vadd.f32 %v5906_v31, %v1197_v45 }
 0x22a   : > { %v1076_v56 = vsel %vm1012_vm3, %v972_v46, %v1044_v50 }
 0x22b   : > { %v1297_v54 = vmul.f32 0.2, %v1198_v48  ;;  %vm1265_vm5 = vcmp.gt.f32.partialorder %v1198_v48, 0.0 }
 0x22d   : > { %v973_v49 = vpop.f32.mrf.mxu1  ;;  %v1329_v62 = vsel %vm1265_vm5, %v1198_v48, %v1297_v54 }
 0x22e   : > { %v974_v51 = vadd.f32 %v5860_v60, %v973_v49 }
 0x230   : > { %vm1013_vm4 = vcmp.gt.f32.partialorder %v974_v51, 0.0  ;;  %v1045_v52 = vmul.f32 0.2, %v974_v51  ;;  %v1199_v53 = vpop.f32.mrf.mxu2 }
 0x231   : > { %v1200_v55 = vadd.f32 %v5906_v31, %v1199_v53 }
 0x232   : > { %v1077_v57 = vsel %vm1013_vm4, %v974_v51, %v1045_v52 }
 0x233   : > { %v1298_v58 = vmul.f32 0.2, %v1200_v55  ;;  %v1095_v59 = vpack.c.bf16 %v1077_v57, %v1076_v56  ;;  %vm1266_vm6 = vcmp.gt.f32.partialorder %v1200_v55, 0.0  ;;  %v5024_v57 = vld [vmem:[%s7158_s3 + $0x98] sm:$0xff] }
 0x234   : > { %1919 = vmatpush.bf16.msrb.mxu1 %v5024_v57 }
 0x235   : > { %v976_v61 = vpop.f32.mrf.mxu1  ;;  %1241 = vmatmul.bf16.gmra.mxu2 %v1095_v59  ;;  %v1330_v63 = vsel %vm1266_vm6, %v1200_v55, %v1298_v58 }
 0x236   : > { %v1357_v1 = vpack.c.bf16 %v1330_v63, %v1329_v62  ;;  %v977_v4 = vadd.f32 %v5860_v60, %v976_v61  ;;  %v5968_v62 = vld [vmem:[#allocation9] ss:$0 sm:$0xff] }
 0x238   : > { %v1202_v2 = vpop.f32.mrf.mxu2  ;;  %1465 = vmatmul.bf16.gmra.mxu3 %v1357_v1  ;;  %v1046_v7 = vmul.f32 0.2, %v977_v4  ;;  %vm1014_vm7 = vcmp.gt.f32.partialorder %v977_v4, 0.0 }
 0x239   : > { %v1203_v5 = vadd.f32 %v5906_v31, %v1202_v2 }
 0x23a   : > { %v1078_v12 = vsel %vm1014_vm7, %v977_v4, %v1046_v7 }
 0x23b   : > { %v1299_v10 = vmul.f32 0.2, %v1203_v5  ;;  %vm1267_vm9 = vcmp.gt.f32.partialorder %v1203_v5, 0.0 }
 0x23d   : > { %v978_v6 = vpop.f32.mrf.mxu1  ;;  %v1331_v17 = vsel %vm1267_vm9, %v1203_v5, %v1299_v10  ;;  %v5307_v10 = vld [vmem:[#allocation2 + $0x8] sm:$0xff] }
 0x23e   : > { %v979_v8 = vadd.f32 %v5860_v60, %v978_v6 }
 0x240   : > { %vm1015_vm8 = vcmp.gt.f32.partialorder %v979_v8, 0.0  ;;  %v1047_v9 = vmul.f32 0.2, %v979_v8  ;;  %v1204_v3 = vpop.f32.mrf.mxu2 }
 0x241   : > { %v1205_v11 = vadd.f32 %v5906_v31, %v1204_v3 }
 0x242   : > { %v1079_v13 = vsel %vm1015_vm8, %v979_v8, %v1047_v9  ;;  %v5306_v9 = vld [vmem:[#allocation2] sm:$0xff] }
 0x243   : > { %v1300_v14 = vmul.f32 0.2, %v1205_v11  ;;  %v1096_v15 = vpack.c.bf16 %v1079_v13, %v1078_v12  ;;  %vm1268_vm10 = vcmp.gt.f32.partialorder %v1205_v11, 0.0  ;;  %v5036_v13 = vld [vmem:[%s7158_s3 + $0xf8] sm:$0xff] }
 0x244   : > { %2186 = vmatpush.bf16.msrb.mxu2 %v5036_v13 }
 0x245   : > { %v981_v16 = vpop.f32.mrf.mxu1  ;;  %1246 = vmatmul.bf16.gmra.mxu2 %v1096_v15  ;;  %v1332_v18 = vsel %vm1268_vm10, %v1205_v11, %v1300_v14 }
 0x246   : > { %v1358_v19 = vpack.c.bf16 %v1332_v18, %v1331_v17  ;;  %v982_v21 = vadd.f32 %v5860_v60, %v981_v16 }
 0x248   : > { %v1207_v20 = vpop.f32.mrf.mxu2  ;;  %1470 = vmatmul.bf16.gmra.mxu3 %v1358_v19  ;;  %v1048_v25 = vmul.f32 0.2, %v982_v21  ;;  %vm1016_vm11 = vcmp.gt.f32.partialorder %v982_v21, 0.0 }
 0x249   : > { %v1208_v23 = vadd.f32 %v5906_v31, %v1207_v20 }
 0x24a   : > { %v1080_v32 = vsel %vm1016_vm11, %v982_v21, %v1048_v25 }
 0x24b   : > { %v1301_v29 = vmul.f32 0.2, %v1208_v23  ;;  %vm1269_vm13 = vcmp.gt.f32.partialorder %v1208_v23, 0.0 }
 0x24d   : > { %v983_v24 = vpop.f32.mrf.mxu1  ;;  %v1333_v37 = vsel %vm1269_vm13, %v1208_v23, %v1301_v29  ;;  %v5309_v29 = vld [vmem:[#allocation2 + $0x18] sm:$0xff] }
 0x24e   : > { %v984_v26 = vadd.f32 %v5860_v60, %v983_v24 }
 0x250   : > { %vm1017_vm12 = vcmp.gt.f32.partialorder %v984_v26, 0.0  ;;  %v1049_v27 = vmul.f32 0.2, %v984_v26  ;;  %v1209_v28 = vpop.f32.mrf.mxu2 }
 0x251   : > { %v1210_v30 = vadd.f32 %v5906_v31, %v1209_v28 }
 0x252   : > { %v1081_v33 = vsel %vm1017_vm12, %v984_v26, %v1049_v27  ;;  %v5308_v27 = vld [vmem:[#allocation2 + $0x10] sm:$0xff] }
 0x253   : > { %v1302_v34 = vmul.f32 0.2, %v1210_v30  ;;  %v1097_v35 = vpack.c.bf16 %v1081_v33, %v1080_v32  ;;  %vm1270_vm14 = vcmp.gt.f32.partialorder %v1210_v30, 0.0  ;;  %v5023_v33 = vld [vmem:[%s7158_s3 + $0x90] sm:$0xff] }
 0x254   : > { %1920 = vmatpush.bf16.msrb.mxu1 %v5023_v33 }
 0x255   : > { %1251 = vmatmul.bf16.gmra.mxu2 %v1097_v35  ;;  %v1334_v60 = vsel %vm1270_vm14, %v1210_v30, %v1302_v34 }
 0x256   : > { %v1359_v38 = vpack.c.bf16 %v1334_v60, %v1333_v37 }
 0x258   : > { %v1212_v39 = vpop.f32.mrf.mxu2  ;;  %1475 = vmatmul.bf16.gmra.mxu3 %v1359_v38 }
 0x259   : > { %v1213_v40 = vadd.f32 %v5906_v31, %v1212_v39 }
 0x25b   : > { %v1303_v42 = vmul.f32 0.2, %v1213_v40  ;;  %vm1271_vm15 = vcmp.gt.f32.partialorder %v1213_v40, 0.0 }
 0x25d   : > { %v1335_v45 = vsel %vm1271_vm15, %v1213_v40, %v1303_v42 }
 0x260   : > { %v1214_v41 = vpop.f32.mrf.mxu2 }
 0x261   : > { %v1215_v43 = vadd.f32 %v5906_v31, %v1214_v41 }
 0x263   : > { %v1304_v44 = vmul.f32 0.2, %v1215_v43  ;;  %vm1272_vm0 = vcmp.gt.f32.partialorder %v1215_v43, 0.0 }
 0x265   : > { %v1336_v46 = vsel %vm1272_vm0, %v1215_v43, %v1304_v44 }
 0x266   : > { %v1360_v47 = vpack.c.bf16 %v1336_v46, %v1335_v45  ;;  %v5310_v46 = vld [vmem:[#allocation2 + $0x20] sm:$0xff] }
 0x268   : > { %v1217_v48 = vpop.f32.mrf.mxu2  ;;  %1480 = vmatmul.bf16.gmra.mxu3 %v1360_v47 }
 0x269   : > { %v1218_v49 = vadd.f32 %v5906_v31, %v1217_v48  ;;  %v5311_v48 = vld [vmem:[#allocation2 + $0x28] sm:$0xff] }
 0x26b   : > { %v1305_v51 = vmul.f32 0.2, %v1218_v49  ;;  %vm1273_vm1 = vcmp.gt.f32.partialorder %v1218_v49, 0.0 }
 0x26d   : > { %v1337_v54 = vsel %vm1273_vm1, %v1218_v49, %v1305_v51  ;;  %v5035_v51 = vld [vmem:[%s7158_s3 + $0xf0] sm:$0xff] }
 0x26e   : > { %2187 = vmatpush.bf16.msrb.mxu2 %v5035_v51 }
 0x270   : > { %v1219_v50 = vpop.f32.mrf.mxu2 }
 0x271   : > { %v1220_v52 = vadd.f32 %v5906_v31, %v1219_v50 }
 0x273   : > { %v1306_v53 = vmul.f32 0.2, %v1220_v52  ;;  %vm1274_vm2 = vcmp.gt.f32.partialorder %v1220_v52, 0.0 }
 0x275   : > { %v1338_v55 = vsel %vm1274_vm2, %v1220_v52, %v1306_v53 }
 0x276   : > { %v1361_v56 = vpack.c.bf16 %v1338_v55, %v1337_v54 }
 0x278   : > { %v1222_v58 = vpop.f32.mrf.mxu2  ;;  %1485 = vmatmul.bf16.gmra.mxu3 %v1361_v56 }
 0x279   : > { %v1223_v61 = vadd.f32 %v5906_v31, %v1222_v58 }
 0x27b   : > { %v1446_v59 = vpop.f32.mrf.mxu3  ;;  %v1307_v0 = vmul.f32 0.2, %v1223_v61  ;;  %vm1275_vm3 = vcmp.gt.f32.partialorder %v1223_v61, 0.0 }
 0x27c   : > { %v1447_v2 = vadd.f32 %v5968_v62, %v1446_v59 }
 0x27d   : > { %v1339_v7 = vsel %vm1275_vm3, %v1223_v61, %v1307_v0 }
 0x27e   : > { %v5973_v3 = vadd.f32 %v5306_v9, %v1447_v2  ;;  %v5022_v9 = vld [vmem:[%s7158_s3 + $0x88] sm:$0xff] }
 0x27f   : > { %1921 = vmatpush.bf16.msrb.mxu1 %v5022_v9  ;;  %v5319_v9 = vld [vmem:[#allocation2 + $0x68] sm:$0xff] }
 0x280   : > { %v1224_v63 = vpop.f32.mrf.mxu2 }
 0x281   : > { %v1225_v1 = vadd.f32 %v5906_v31, %v1224_v63 }
 0x283   : > { %v1308_v4 = vmul.f32 0.2, %v1225_v1  ;;  %v1448_v5 = vpop.f32.mrf.mxu3  ;;  %vm1276_vm4 = vcmp.gt.f32.partialorder %v1225_v1, 0.0 }
 0x284   : > { %v1449_v6 = vadd.f32 %v5968_v62, %v1448_v5 }
 0x285   : > { %v1340_v8 = vsel %vm1276_vm4, %v1225_v1, %v1308_v4  ;;  %v5312_v4 = vld [vmem:[#allocation2 + $0x30] sm:$0xff] }
 0x286   : > { %v5975_v11 = vadd.f32 %v5307_v10, %v1449_v6  ;;  %v1362_v12 = vpack.c.bf16 %v1340_v8, %v1339_v7  ;;  %v5313_v6 = vld [vmem:[#allocation2 + $0x38] sm:$0xff] }
 0x288   : > { %v1558_v14 = vpack.c.bf16 %v5975_v11, %v5973_v3  ;;  %v1227_v15 = vpop.f32.mrf.mxu2  ;;  %1490 = vmatmul.bf16.gmra.mxu3 %v1362_v12 }
 0x289   : > { %v1228_v17 = vadd.f32 %v5906_v31, %v1227_v15 }
 0x28a   : > { %1652 = vmatmul.bf16.vlgmr.msrb.gmra.mxu0 %v1558_v14 }
 0x28b   : > { %v1451_v16 = vpop.f32.mrf.mxu3  ;;  %v1309_v19 = vmul.f32 0.2, %v1228_v17  ;;  %vm1277_vm5 = vcmp.gt.f32.partialorder %v1228_v17, 0.0 }
 0x28c   : > { %v1452_v21 = vadd.f32 %v5968_v62, %v1451_v16 }
 0x28d   : > { %v1341_v25 = vsel %vm1277_vm5, %v1228_v17, %v1309_v19 }
 0x28e   : > { %v5986_v28 = vadd.f32 %v5308_v27, %v1452_v21 }
 0x290   : > { %v1229_v18 = vpop.f32.mrf.mxu2 }
 0x291   : > { %v1230_v20 = vadd.f32 %v5906_v31, %v1229_v18 }
 0x293   : > { %v1310_v22 = vmul.f32 0.2, %v1230_v20  ;;  %v1453_v23 = vpop.f32.mrf.mxu3  ;;  %vm1278_vm6 = vcmp.gt.f32.partialorder %v1230_v20, 0.0 }
 0x294   : > { %v1454_v24 = vadd.f32 %v5968_v62, %v1453_v23 }
 0x295   : > { %v1342_v26 = vsel %vm1278_vm6, %v1230_v20, %v1310_v22 }
 0x296   : > { %v5988_v30 = vadd.f32 %v5309_v29, %v1454_v24  ;;  %v1363_v32 = vpack.c.bf16 %v1342_v26, %v1341_v25  ;;  %v5314_v24 = vld [vmem:[#allocation2 + $0x40] sm:$0xff]  ;;  %v5315_v26 = vld [vmem:[#allocation2 + $0x48] sm:$0xff] }
 0x298   : > { %v1232_v34 = vpop.f32.mrf.mxu2  ;;  %1495 = vmatmul.bf16.gmra.mxu3 %v1363_v32  ;;  %v1559_v35 = vpack.c.bf16 %v5988_v30, %v5986_v28  ;;  %v5034_v32 = vld [vmem:[%s7158_s3 + $0xe8] sm:$0xff] }
 0x299   : > { %v1233_v37 = vadd.f32 %v5906_v31, %v1232_v34  ;;  %2188 = vmatpush.bf16.msrb.mxu2 %v5034_v32  ;;  %v5322_v32 = vld [vmem:[#allocation2 + $0x80] sm:$0xff] }
 0x29a   : > { %1657 = vmatmul.bf16.gmra.mxu0 %v1559_v35 }
 0x29b   : > { %v1456_v36 = vpop.f32.mrf.mxu3  ;;  %v1311_v38 = vmul.f32 0.2, %v1233_v37  ;;  %vm1279_vm7 = vcmp.gt.f32.partialorder %v1233_v37, 0.0 }
 0x29c   : > { %v1457_v40 = vadd.f32 %v5968_v62, %v1456_v36 }
 0x29d   : > { %v1343_v44 = vsel %vm1279_vm7, %v1233_v37, %v1311_v38 }
 0x29e   : > { %v5999_v47 = vadd.f32 %v5310_v46, %v1457_v40 }
 0x2a0   : > { %v1234_v60 = vpop.f32.mrf.mxu2 }
 0x2a1   : > { %v1235_v39 = vadd.f32 %v5906_v31, %v1234_v60 }
 0x2a3   : > { %v1312_v41 = vmul.f32 0.2, %v1235_v39  ;;  %v1458_v42 = vpop.f32.mrf.mxu3  ;;  %vm1280_vm8 = vcmp.gt.f32.partialorder %v1235_v39, 0.0 }
 0x2a4   : > { %v1459_v43 = vadd.f32 %v5968_v62, %v1458_v42 }
 0x2a5   : > { %v1344_v45 = vsel %vm1280_vm8, %v1235_v39, %v1312_v41 }
 0x2a6   : > { %v6001_v49 = vadd.f32 %v5311_v48, %v1459_v43  ;;  %v1364_v50 = vpack.c.bf16 %v1344_v45, %v1343_v44  ;;  %v5316_v45 = vld [vmem:[#allocation2 + $0x50] sm:$0xff]  ;;  %v5317_v48 = vld [vmem:[#allocation2 + $0x58] sm:$0xff] }
 0x2a8   : > { %v1237_v52 = vpop.f32.mrf.mxu2  ;;  %1500 = vmatmul.bf16.gmra.mxu3 %v1364_v50  ;;  %v1560_v53 = vpack.c.bf16 %v6001_v49, %v5999_v47 }
 0x2a9   : > { %v1238_v55 = vadd.f32 %v5906_v31, %v1237_v52  ;;  %v5021_v52 = vld [vmem:[%s7158_s3 + $0x80] sm:$0xff] }
 0x2aa   : > { %1662 = vmatmul.bf16.gmra.mxu0 %v1560_v53  ;;  %1922 = vmatpush.bf16.msrb.mxu1 %v5021_v52 }
 0x2ab   : > { %v1461_v54 = vpop.f32.mrf.mxu3  ;;  %v1313_v57 = vmul.f32 0.2, %v1238_v55  ;;  %vm1281_vm9 = vcmp.gt.f32.partialorder %v1238_v55, 0.0 }
 0x2ac   : > { %v1462_v59 = vadd.f32 %v5968_v62, %v1461_v54 }
 0x2ad   : > { %v1345_v1 = vsel %vm1281_vm9, %v1238_v55, %v1313_v57 }
 0x2ae   : > { %v6012_v5 = vadd.f32 %v5312_v4, %v1462_v59 }
 0x2b0   : > { %v1239_v56 = vpop.f32.mrf.mxu2 }
 0x2b1   : > { %v1240_v58 = vadd.f32 %v5906_v31, %v1239_v56 }
 0x2b3   : > { %vm1282_vm10 = vcmp.gt.f32.partialorder %v1240_v58, 0.0  ;;  %v1314_v61 = vmul.f32 0.2, %v1240_v58  ;;  %v1463_v63 = vpop.f32.mrf.mxu3 }
 0x2b4   : > { %v1464_v0 = vadd.f32 %v5968_v62, %v1463_v63 }
 0x2b5   : > { %v1346_v2 = vsel %vm1282_vm10, %v1240_v58, %v1314_v61 }
 0x2b6   : > { %v6014_v7 = vadd.f32 %v5313_v6, %v1464_v0  ;;  %v1365_v8 = vpack.c.bf16 %v1346_v2, %v1345_v1  ;;  %v5318_v6 = vld [vmem:[#allocation2 + $0x60] sm:$0xff] }
 0x2b8   : > { %v1242_v10 = vpop.f32.mrf.mxu2  ;;  %1505 = vmatmul.bf16.gmra.mxu3 %v1365_v8  ;;  %v1561_v12 = vpack.c.bf16 %v6014_v7, %v6012_v5 }
 0x2b9   : > { %v1243_v14 = vadd.f32 %v5906_v31, %v1242_v10 }
 0x2ba   : > { %1667 = vmatmul.bf16.gmra.mxu0 %v1561_v12 }
 0x2bb   : > { %v1466_v13 = vpop.f32.mrf.mxu3  ;;  %v1315_v16 = vmul.f32 0.2, %v1243_v14  ;;  %vm1283_vm11 = vcmp.gt.f32.partialorder %v1243_v14, 0.0 }
 0x2bc   : > { %v1467_v18 = vadd.f32 %v5968_v62, %v1466_v13 }
 0x2bd   : > { %v1347_v22 = vsel %vm1283_vm11, %v1243_v14, %v1315_v16 }
 0x2be   : > { %v6025_v25 = vadd.f32 %v5314_v24, %v1467_v18  ;;  %v5320_v18 = vld [vmem:[#allocation2 + $0x70] sm:$0xff] }
 0x2c0   : > { %v1244_v15 = vpop.f32.mrf.mxu2 }
 0x2c1   : > { %v1245_v17 = vadd.f32 %v5906_v31, %v1244_v15 }
 0x2c3   : > { %vm1284_vm12 = vcmp.gt.f32.partialorder %v1245_v17, 0.0  ;;  %v1316_v19 = vmul.f32 0.2, %v1245_v17  ;;  %v1468_v20 = vpop.f32.mrf.mxu3 }
 0x2c4   : > { %v1469_v21 = vadd.f32 %v5968_v62, %v1468_v20  ;;  %v5321_v20 = vld [vmem:[#allocation2 + $0x78] sm:$0xff] }
 0x2c5   : > { %v1348_v23 = vsel %vm1284_vm12, %v1245_v17, %v1316_v19 }
 0x2c6   : > { %v6027_v27 = vadd.f32 %v5315_v26, %v1469_v21  ;;  %v1366_v29 = vpack.c.bf16 %v1348_v23, %v1347_v22 }
 0x2c8   : > { %v1247_v33 = vpop.f32.mrf.mxu2  ;;  %1510 = vmatmul.bf16.gmra.mxu3 %v1366_v29  ;;  %v1562_v34 = vpack.c.bf16 %v6027_v27, %v6025_v25 }
 0x2c9   : > { %v1248_v36 = vadd.f32 %v5906_v31, %v1247_v33 }
 0x2ca   : > { %1672 = vmatmul.bf16.gmra.mxu0 %v1562_v34  ;;  %v5323_v34 = vld [vmem:[#allocation2 + $0x88] sm:$0xff] }
 0x2cb   : > { %v1471_v35 = vpop.f32.mrf.mxu3  ;;  %v1317_v60 = vmul.f32 0.2, %v1248_v36  ;;  %vm1285_vm13 = vcmp.gt.f32.partialorder %v1248_v36, 0.0 }
 0x2cc   : > { %v1472_v39 = vadd.f32 %v5968_v62, %v1471_v35 }
 0x2cd   : > { %v1349_v43 = vsel %vm1285_vm13, %v1248_v36, %v1317_v60  ;;  %v5032_v36 = vld [vmem:[%s7158_s3 + $0xd8] sm:$0xff]  ;;  %v6077_v60 = vld [vmem:[#allocation3 + $0x1] ss:$0 sm:$0xff] }
 0x2ce   : > { %v6038_v46 = vadd.f32 %v5316_v45, %v1472_v39 }
 0x2d0   : > { %v1249_v37 = vpop.f32.mrf.mxu2 }
 0x2d1   : > { %v1250_v38 = vadd.f32 %v5906_v31, %v1249_v37 }
 0x2d3   : > { %vm1286_vm14 = vcmp.gt.f32.partialorder %v1250_v38, 0.0  ;;  %v1318_v40 = vmul.f32 0.2, %v1250_v38  ;;  %v1473_v41 = vpop.f32.mrf.mxu3 }
 0x2d4   : > { %v1474_v42 = vadd.f32 %v5968_v62, %v1473_v41 }
 0x2d5   : > { %v1350_v44 = vsel %vm1286_vm14, %v1250_v38, %v1318_v40 }
 0x2d6   : > { %v6040_v50 = vadd.f32 %v5317_v48, %v1474_v42  ;;  %v1367_v51 = vpack.c.bf16 %v1350_v44, %v1349_v43 }
 0x2d8   : > { %v1252_v53 = vpop.f32.mrf.mxu2  ;;  %1515 = vmatmul.bf16.gmra.mxu3 %v1367_v51  ;;  %v1563_v54 = vpack.c.bf16 %v6040_v50, %v6038_v46 }
 0x2d9   : > { %v1253_v56 = vadd.f32 %v5906_v31, %v1252_v53 }
 0x2da   : > { %1677 = vmatmul.bf16.gmra.mxu0 %v1563_v54 }
 0x2db   : > { %v1476_v55 = vpop.f32.mrf.mxu3  ;;  %v1319_v58 = vmul.f32 0.2, %v1253_v56  ;;  %vm1287_vm15 = vcmp.gt.f32.partialorder %v1253_v56, 0.0 }
 0x2dc   : > { %v1477_v61 = vadd.f32 %v5968_v62, %v1476_v55  ;;  %v5324_v55 = vld [vmem:[#allocation2 + $0x90] sm:$0xff] }
 0x2dd   : > { %v1351_v2 = vsel %vm1287_vm15, %v1253_v56, %v1319_v58 }
 0x2de   : > { %v6051_v8 = vadd.f32 %v5318_v6, %v1477_v61 }
 0x2e0   : > { %v1254_v57 = vpop.f32.mrf.mxu2 }
 0x2e1   : > { %v1255_v59 = vadd.f32 %v5906_v31, %v1254_v57  ;;  %v5033_v31 = vld [vmem:[%s7158_s3 + $0xe0] sm:$0xff]  ;;  %v5325_v57 = vld [vmem:[#allocation2 + $0x98] sm:$0xff] }
 0x2e2   : > { %2189 = vmatpush.bf16.msrb.mxu2 %v5033_v31 }
 0x2e3   : > { %vm1288_vm0 = vcmp.gt.f32.partialorder %v1255_v59, 0.0  ;;  %v1320_v63 = vmul.f32 0.2, %v1255_v59  ;;  %v1478_v0 = vpop.f32.mrf.mxu3 }
 0x2e4   : > { %v1479_v1 = vadd.f32 %v5968_v62, %v1478_v0 }
 0x2e5   : > { %v1352_v4 = vsel %vm1288_vm0, %v1255_v59, %v1320_v63  ;;  %v5044_v63 = vld [vmem:[#allocation8 + $0x78] sm:$0xff] }
 0x2e6   : > { %v6053_v10 = vadd.f32 %v5319_v9, %v1479_v1  ;;  %v1368_v12 = vpack.c.bf16 %v1352_v4, %v1351_v2  ;;  %2190 = vmatpush.bf16.msrb.mxu2 %v5032_v36  ;;  %2457 = vmatpush.bf16.msrb.mxu3 %v5044_v63 }
 0x2e8   : > { %1520 = vmatmul.bf16.gmra.mxu3 %v1368_v12  ;;  %v1564_v13 = vpack.c.bf16 %v6053_v10, %v6051_v8 }
 0x2ea   : > { %1682 = vmatmul.bf16.gmra.mxu0 %v1564_v13 }
 0x2eb   : > { %v1481_v14 = vpop.f32.mrf.mxu3 }
 0x2ec   : > { %v1482_v15 = vadd.f32 %v5968_v62, %v1481_v14 }
 0x2ee   : > { %v6062_v19 = vadd.f32 %v5320_v18, %v1482_v15 }
 0x2f3   : > { %v1483_v16 = vpop.f32.mrf.mxu3 }
 0x2f4   : > { %v1484_v17 = vadd.f32 %v5968_v62, %v1483_v16 }
 0x2f6   : > { %v6064_v21 = vadd.f32 %v5321_v20, %v1484_v17  ;;  %v5326_v17 = vld [vmem:[#allocation2 + $0xa0] sm:$0xff]  ;;  %v5327_v20 = vld [vmem:[#allocation2 + $0xa8] sm:$0xff] }
 0x2f8   : > { %v1565_v22 = vpack.c.bf16 %v6064_v21, %v6062_v19 }
 0x2fa   : > { %1687 = vmatmul.bf16.gmra.mxu0 %v1565_v22 }
 0x2fb   : > { %v1486_v23 = vpop.f32.mrf.mxu3 }
 0x2fc   : > { %v1487_v24 = vadd.f32 %v5968_v62, %v1486_v23  ;;  %v5031_v23 = vld [vmem:[%s7158_s3 + $0xd0] sm:$0xff] }
 0x2fd   : > { %2191 = vmatpush.bf16.msrb.mxu2 %v5031_v23 }
 0x2fe   : > { %v6070_v33 = vadd.f32 %v5322_v32, %v1487_v24 }
 0x303   : > { %v1488_v26 = vpop.f32.mrf.mxu3 }
 0x304   : > { %v1489_v29 = vadd.f32 %v5968_v62, %v1488_v26 }
 0x306   : > { %v6072_v35 = vadd.f32 %v5323_v34, %v1489_v29 }
 0x307   : > { %v1653_v37 = vpop.f32.mrf.mxu0 }
 0x308   : > { %v1566_v38 = vpack.c.bf16 %v6072_v35, %v6070_v33  ;;  %v1654_v40 = vadd.f32 %v6077_v60, %v1653_v37 }
 0x30a   : > { %1692 = vmatmul.bf16.gmra.mxu0 %v1566_v38  ;;  %v1765_v42 = vmul.f32 0.2, %v1654_v40  ;;  %vm1733_vm1 = vcmp.gt.f32.partialorder %v1654_v40, 0.0 }
 0x30b   : > { %v1491_v39 = vpop.f32.mrf.mxu3 }
 0x30c   : > { %v1492_v44 = vadd.f32 %v5968_v62, %v1491_v39  ;;  %v1797_v51 = vsel %vm1733_vm1, %v1654_v40, %v1765_v42 }
 0x30e   : > { %v6085_v56 = vadd.f32 %v5324_v55, %v1492_v44  ;;  %v5043_v55 = vld [vmem:[#allocation8 + $0x70] sm:$0xff] }
 0x30f   : > { %v1655_v41 = vpop.f32.mrf.mxu0  ;;  %2458 = vmatpush.bf16.msrb.mxu3 %v5043_v55  ;;  %v5042_v55 = vld [vmem:[#allocation8 + $0x68] sm:$0xff] }
 0x310   : > { %v1656_v43 = vadd.f32 %v6077_v60, %v1655_v41 }
 0x312   : > { %vm1734_vm2 = vcmp.gt.f32.partialorder %v1656_v43, 0.0  ;;  %v1766_v45 = vmul.f32 0.2, %v1656_v43 }
 0x313   : > { %v1493_v48 = vpop.f32.mrf.mxu3  ;;  %2459 = vmatpush.bf16.msrb.mxu3 %v5042_v55  ;;  %v5337_v55 = vld [vmem:[#allocation2 + $0xf8] sm:$0xff] }
 0x314   : > { %v1798_v52 = vsel %vm1734_vm2, %v1656_v43, %v1766_v45  ;;  %v1494_v53 = vadd.f32 %v5968_v62, %v1493_v48  ;;  %v5328_v45 = vld [vmem:[#allocation2 + $0xb0] sm:$0xff] }
 0x315   : > { %v1829_v54 = vpack.c.bf16 %v1798_v52, %v1797_v51  ;;  %v5329_v51 = vld [vmem:[#allocation2 + $0xb8] sm:$0xff] }
 0x316   : > { %v6087_v58 = vadd.f32 %v5325_v57, %v1494_v53 }
 0x317   : > { %v1658_v59 = vpop.f32.mrf.mxu0  ;;  %1923 = vmatmul.bf16.vlgmr.msrb.gmra.mxu1 %v1829_v54 }
 0x318   : > { %v1567_v61 = vpack.c.bf16 %v6087_v58, %v6085_v56  ;;  %v1659_v1 = vadd.f32 %v6077_v60, %v1658_v59 }
 0x31a   : > { %1697 = vmatmul.bf16.gmra.mxu0 %v1567_v61  ;;  %v1767_v4 = vmul.f32 0.2, %v1659_v1  ;;  %vm1735_vm3 = vcmp.gt.f32.partialorder %v1659_v1, 0.0 }
 0x31b   : > { %v1496_v0 = vpop.f32.mrf.mxu3 }
 0x31c   : > { %v1497_v9 = vadd.f32 %v5968_v62, %v1496_v0  ;;  %v1799_v14 = vsel %vm1735_vm3, %v1659_v1, %v1767_v4 }
 0x31e   : > { %v6095_v18 = vadd.f32 %v5326_v17, %v1497_v9  ;;  %v5030_v17 = vld [vmem:[%s7158_s3 + $0xc8] sm:$0xff] }
 0x31f   : > { %v1660_v2 = vpop.f32.mrf.mxu0  ;;  %2192 = vmatpush.bf16.msrb.mxu2 %v5030_v17 }
 0x320   : > { %v1661_v6 = vadd.f32 %v6077_v60, %v1660_v2 }
 0x322   : > { %vm1736_vm4 = vcmp.gt.f32.partialorder %v1661_v6, 0.0  ;;  %v1768_v12 = vmul.f32 0.2, %v1661_v6 }
 0x323   : > { %v1498_v31 = vpop.f32.mrf.mxu3 }
 0x324   : > { %v1499_v13 = vadd.f32 %v5968_v62, %v1498_v31  ;;  %v1800_v15 = vsel %vm1736_vm4, %v1661_v6, %v1768_v12 }
 0x325   : > { %v1830_v16 = vpack.c.bf16 %v1800_v15, %v1799_v14  ;;  %v5331_v15 = vld [vmem:[#allocation2 + $0xc8] sm:$0xff] }
 0x326   : > { %v6097_v22 = vadd.f32 %v5327_v20, %v1499_v13  ;;  %v5330_v13 = vld [vmem:[#allocation2 + $0xc0] sm:$0xff] }
 0x327   : > { %v1663_v24 = vpop.f32.mrf.mxu0  ;;  %1928 = vmatmul.bf16.gmra.mxu1 %v1830_v16 }
 0x328   : > { %v1568_v26 = vpack.c.bf16 %v6097_v22, %v6095_v18  ;;  %v1664_v32 = vadd.f32 %v6077_v60, %v1663_v24 }
 0x32a   : > { %1702 = vmatmul.bf16.gmra.mxu0 %v1568_v26  ;;  %v1769_v36 = vmul.f32 0.2, %v1664_v32  ;;  %vm1737_vm5 = vcmp.gt.f32.partialorder %v1664_v32, 0.0 }
 0x32b   : > { %v1501_v29 = vpop.f32.mrf.mxu3 }
 0x32c   : > { %v1502_v38 = vadd.f32 %v5968_v62, %v1501_v29  ;;  %v1801_v42 = vsel %vm1737_vm5, %v1664_v32, %v1769_v36 }
 0x32e   : > { %v6108_v48 = vadd.f32 %v5328_v45, %v1502_v38  ;;  %v5333_v45 = vld [vmem:[#allocation2 + $0xd8] sm:$0xff] }
 0x32f   : > { %v1665_v34 = vpop.f32.mrf.mxu0 }
 0x330   : > { %v1666_v37 = vadd.f32 %v6077_v60, %v1665_v34 }
 0x332   : > { %vm1738_vm6 = vcmp.gt.f32.partialorder %v1666_v37, 0.0  ;;  %v1770_v39 = vmul.f32 0.2, %v1666_v37 }
 0x333   : > { %v1503_v40 = vpop.f32.mrf.mxu3 }
 0x334   : > { %v1504_v41 = vadd.f32 %v5968_v62, %v1503_v40  ;;  %v1802_v43 = vsel %vm1738_vm6, %v1666_v37, %v1770_v39 }
 0x335   : > { %v1831_v44 = vpack.c.bf16 %v1802_v43, %v1801_v42  ;;  %v5332_v43 = vld [vmem:[#allocation2 + $0xd0] sm:$0xff] }
 0x336   : > { %v6110_v52 = vadd.f32 %v5329_v51, %v1504_v41 }
 0x337   : > { %v1668_v53 = vpop.f32.mrf.mxu0  ;;  %1933 = vmatmul.bf16.gmra.mxu1 %v1831_v44 }
 0x338   : > { %v1569_v54 = vpack.c.bf16 %v6110_v52, %v6108_v48  ;;  %v1669_v59 = vadd.f32 %v6077_v60, %v1668_v53 }
 0x33a   : > { %1707 = vmatmul.bf16.gmra.mxu0 %v1569_v54  ;;  %v1771_v63 = vmul.f32 0.2, %v1669_v59  ;;  %vm1739_vm7 = vcmp.gt.f32.partialorder %v1669_v59, 0.0 }
 0x33b   : > { %v1506_v57 = vpop.f32.mrf.mxu3 }
 0x33c   : > { %v1507_v1 = vadd.f32 %v5968_v62, %v1506_v57  ;;  %v1803_v9 = vsel %vm1739_vm7, %v1669_v59, %v1771_v63 }
 0x33e   : > { %v6118_v14 = vadd.f32 %v5330_v13, %v1507_v1 }
 0x33f   : > { %v1670_v61 = vpop.f32.mrf.mxu0 }
 0x340   : > { %v1671_v0 = vadd.f32 %v6077_v60, %v1670_v61 }
 0x342   : > { %vm1740_vm8 = vcmp.gt.f32.partialorder %v1671_v0, 0.0  ;;  %v1772_v2 = vmul.f32 0.2, %v1671_v0 }
 0x343   : > { %v1508_v4 = vpop.f32.mrf.mxu3 }
 0x344   : > { %v1509_v6 = vadd.f32 %v5968_v62, %v1508_v4  ;;  %v1804_v12 = vsel %vm1740_vm8, %v1671_v0, %v1772_v2  ;;  %v5029_v4 = vld [vmem:[%s7158_s3 + $0xc0] sm:$0xff] }
 0x345   : > { %v1832_v31 = vpack.c.bf16 %v1804_v12, %v1803_v9  ;;  %2193 = vmatpush.bf16.msrb.mxu2 %v5029_v4 }
 0x346   : > { %v6120_v16 = vadd.f32 %v5331_v15, %v1509_v6  ;;  %v5334_v15 = vld [vmem:[#allocation2 + $0xe0] sm:$0xff] }
 0x347   : > { %v1673_v20 = vpop.f32.mrf.mxu0  ;;  %1938 = vmatmul.bf16.gmra.mxu1 %v1832_v31 }
 0x348   : > { %v1570_v23 = vpack.c.bf16 %v6120_v16, %v6118_v14  ;;  %v1674_v26 = vadd.f32 %v6077_v60, %v1673_v20  ;;  %v5335_v20 = vld [vmem:[#allocation2 + $0xe8] sm:$0xff] }
 0x34a   : > { %1712 = vmatmul.bf16.gmra.mxu0 %v1570_v23  ;;  %v1773_v32 = vmul.f32 0.2, %v1674_v26  ;;  %vm1741_vm9 = vcmp.gt.f32.partialorder %v1674_v26, 0.0 }
 0x34b   : > { %v1511_v24 = vpop.f32.mrf.mxu3 }
 0x34c   : > { %v1512_v36 = vadd.f32 %v5968_v62, %v1511_v24  ;;  %v1805_v40 = vsel %vm1741_vm9, %v1674_v26, %v1773_v32 }
 0x34e   : > { %v6131_v44 = vadd.f32 %v5332_v43, %v1512_v36 }
 0x34f   : > { %v1675_v29 = vpop.f32.mrf.mxu0 }
 0x350   : > { %v1676_v34 = vadd.f32 %v6077_v60, %v1675_v29 }
 0x352   : > { %vm1742_vm10 = vcmp.gt.f32.partialorder %v1676_v34, 0.0  ;;  %v1774_v37 = vmul.f32 0.2, %v1676_v34 }
 0x353   : > { %v1513_v38 = vpop.f32.mrf.mxu3 }
 0x354   : > { %v1514_v39 = vadd.f32 %v5968_v62, %v1513_v38  ;;  %v1806_v41 = vsel %vm1742_vm10, %v1676_v34, %v1774_v37 }
 0x355   : > { %v1833_v42 = vpack.c.bf16 %v1806_v41, %v1805_v40 }
 0x356   : > { %v6133_v51 = vadd.f32 %v5333_v45, %v1514_v39 }
 0x357   : > { %v1678_v53 = vpop.f32.mrf.mxu0  ;;  %1943 = vmatmul.bf16.gmra.mxu1 %v1833_v42 }
 0x358   : > { %v1571_v54 = vpack.c.bf16 %v6133_v51, %v6131_v44  ;;  %v1679_v59 = vadd.f32 %v6077_v60, %v1678_v53  ;;  %v5336_v53 = vld [vmem:[#allocation2 + $0xf0] sm:$0xff] }
 0x35a   : > { %1717 = vmatmul.bf16.gmra.mxu0 %v1571_v54  ;;  %v1775_v63 = vmul.f32 0.2, %v1679_v59  ;;  %vm1743_vm11 = vcmp.gt.f32.partialorder %v1679_v59, 0.0 }
 0x35b   : > { %v1516_v57 = vpop.f32.mrf.mxu3 }
 0x35c   : > { %v1517_v1 = vadd.f32 %v5968_v62, %v1516_v57  ;;  %v1807_v12 = vsel %vm1743_vm11, %v1679_v59, %v1775_v63  ;;  %v5041_v63 = vld [vmem:[#allocation8 + $0x60] sm:$0xff] }
 0x35d   : > { %2460 = vmatpush.bf16.msrb.mxu3 %v5041_v63 }
 0x35e   : > { %v6144_v17 = vadd.f32 %v5334_v15, %v1517_v1 }
 0x35f   : > { %v1680_v61 = vpop.f32.mrf.mxu0 }
 0x360   : > { %v1681_v0 = vadd.f32 %v6077_v60, %v1680_v61 }
 0x362   : > { %vm1744_vm12 = vcmp.gt.f32.partialorder %v1681_v0, 0.0  ;;  %v1776_v2 = vmul.f32 0.2, %v1681_v0 }
 0x363   : > { %v1518_v6 = vpop.f32.mrf.mxu3 }
 0x364   : > { %v1519_v9 = vadd.f32 %v5968_v62, %v1518_v6  ;;  %v1808_v31 = vsel %vm1744_vm12, %v1681_v0, %v1776_v2 }
 0x365   : > { %v1834_v13 = vpack.c.bf16 %v1808_v31, %v1807_v12 }
 0x366   : > { %v6146_v23 = vadd.f32 %v5335_v20, %v1519_v9 }
 0x367   : > { %v1683_v24 = vpop.f32.mrf.mxu0  ;;  %1948 = vmatmul.bf16.gmra.mxu1 %v1834_v13 }
 0x368   : > { %v1572_v26 = vpack.c.bf16 %v6146_v23, %v6144_v17  ;;  %v1684_v32 = vadd.f32 %v6077_v60, %v1683_v24 }
 0x36a   : > { %1722 = vmatmul.bf16.gmra.mxu0 %v1572_v26  ;;  %v1777_v36 = vmul.f32 0.2, %v1684_v32  ;;  %vm1745_vm13 = vcmp.gt.f32.partialorder %v1684_v32, 0.0 }
 0x36b   : > { %v1521_v29 = vpop.f32.mrf.mxu3 }
 0x36c   : > { %v1522_v38 = vadd.f32 %v5968_v62, %v1521_v29  ;;  %v1809_v42 = vsel %vm1745_vm13, %v1684_v32, %v1777_v36  ;;  %v6164_v36 = vld [vmem:[#allocation6 + $0x2] ss:$0 sm:$0xff] }
 0x36e   : > { %v6154_v54 = vadd.f32 %v5336_v53, %v1522_v38 }
 0x36f   : > { %v1685_v34 = vpop.f32.mrf.mxu0 }
 0x370   : > { %v1686_v37 = vadd.f32 %v6077_v60, %v1685_v34 }
 0x372   : > { %vm1746_vm14 = vcmp.gt.f32.partialorder %v1686_v37, 0.0  ;;  %v1778_v39 = vmul.f32 0.2, %v1686_v37 }
 0x373   : > { %v1523_v40 = vpop.f32.mrf.mxu3 }
 0x374   : > { %v1524_v41 = vadd.f32 %v5968_v62, %v1523_v40  ;;  %v1810_v43 = vsel %vm1746_vm14, %v1686_v37, %v1778_v39  ;;  %v5040_v40 = vld [vmem:[#allocation8 + $0x58] sm:$0xff] }
 0x375   : > { %v1835_v45 = vpack.c.bf16 %v1810_v43, %v1809_v42  ;;  %2461 = vmatpush.bf16.msrb.mxu3 %v5040_v40 }
 0x376   : > { %v6156_v57 = vadd.f32 %v5337_v55, %v1524_v41 }
 0x377   : > { %v1688_v59 = vpop.f32.mrf.mxu0  ;;  %1953 = vmatmul.bf16.gmra.mxu1 %v1835_v45 }
 0x378   : > { %v1573_v61 = vpack.c.bf16 %v6156_v57, %v6154_v54  ;;  %v1689_v0 = vadd.f32 %v6077_v60, %v1688_v59 }
 0x37a   : > { %1727 = vmatmul.bf16.gmra.mxu0 %v1573_v61  ;;  %v1779_v1 = vmul.f32 0.2, %v1689_v0  ;;  %vm1747_vm15 = vcmp.gt.f32.partialorder %v1689_v0, 0.0 }
 0x37c   : > { %v1811_v6 = vsel %vm1747_vm15, %v1689_v0, %v1779_v1 }
 0x37f   : > { %v1690_v62 = vpop.f32.mrf.mxu0 }
 0x380   : > { %v1691_v2 = vadd.f32 %v6077_v60, %v1690_v62 }
 0x382   : > { %vm1748_vm0 = vcmp.gt.f32.partialorder %v1691_v2, 0.0  ;;  %v1780_v4 = vmul.f32 0.2, %v1691_v2 }
 0x384   : > { %v1812_v9 = vsel %vm1748_vm0, %v1691_v2, %v1780_v4 }
 0x385   : > { %v1836_v12 = vpack.c.bf16 %v1812_v9, %v1811_v6 }
 0x387   : > { %v1693_v31 = vpop.f32.mrf.mxu0  ;;  %1958 = vmatmul.bf16.gmra.mxu1 %v1836_v12 }
 0x388   : > { %v1694_v13 = vadd.f32 %v6077_v60, %v1693_v31 }
 0x38a   : > { %v1781_v20 = vmul.f32 0.2, %v1694_v13  ;;  %vm1749_vm1 = vcmp.gt.f32.partialorder %v1694_v13, 0.0 }
 0x38c   : > { %v1813_v32 = vsel %vm1749_vm1, %v1694_v13, %v1781_v20  ;;  %v5052_v13 = vld [vmem:[%s7156_s1 + $0xb8] sm:$0xff] }
 0x38d   : > { %2664 = vmatpush.bf16.msra.mxu0 %v5052_v13 }
 0x38f   : > { %v1695_v15 = vpop.f32.mrf.mxu0 }
 0x390   : > { %v1696_v24 = vadd.f32 %v6077_v60, %v1695_v15 }
 0x392   : > { %vm1750_vm2 = vcmp.gt.f32.partialorder %v1696_v24, 0.0  ;;  %v1782_v26 = vmul.f32 0.2, %v1696_v24 }
 0x394   : > { %v1924_v29 = vpop.f32.mrf.mxu1  ;;  %v1814_v34 = vsel %vm1750_vm2, %v1696_v24, %v1782_v26 }
 0x395   : > { %v1837_v37 = vpack.c.bf16 %v1814_v34, %v1813_v32  ;;  %v1925_v39 = vadd.f32 %v6164_v36, %v1924_v29 }
 0x397   : > { %v1698_v38 = vpop.f32.mrf.mxu0  ;;  %1963 = vmatmul.bf16.gmra.mxu1 %v1837_v37  ;;  %v2036_v43 = vmul.f32 0.2, %v1925_v39  ;;  %vm2004_vm3 = vcmp.gt.f32.partialorder %v1925_v39, 0.0 }
 0x398   : > { %v1699_v41 = vadd.f32 %v6077_v60, %v1698_v38 }
 0x399   : > { %v2068_v63 = vsel %vm2004_vm3, %v1925_v39, %v2036_v43 }
 0x39a   : > { %v1783_v59 = vmul.f32 0.2, %v1699_v41  ;;  %vm1751_vm5 = vcmp.gt.f32.partialorder %v1699_v41, 0.0 }
 0x39c   : > { %v1926_v42 = vpop.f32.mrf.mxu1  ;;  %v1815_v4 = vsel %vm1751_vm5, %v1699_v41, %v1783_v59 }
 0x39d   : > { %v1927_v45 = vadd.f32 %v6164_v36, %v1926_v42 }
 0x39f   : > { %vm2005_vm4 = vcmp.gt.f32.partialorder %v1927_v45, 0.0  ;;  %v2037_v53 = vmul.f32 0.2, %v1927_v45  ;;  %v1700_v55 = vpop.f32.mrf.mxu0 }
 0x3a0   : > { %v1701_v61 = vadd.f32 %v6077_v60, %v1700_v55 }
 0x3a1   : > { %v2069_v0 = vsel %vm2005_vm4, %v1927_v45, %v2037_v53 }
 0x3a2   : > { %v2100_v62 = vpack.c.bf16 %v2069_v0, %v2068_v63  ;;  %vm1752_vm6 = vcmp.gt.f32.partialorder %v1701_v61, 0.0  ;;  %v1784_v1 = vmul.f32 0.2, %v1701_v61 }
 0x3a4   : > { %v1929_v2 = vpop.f32.mrf.mxu1  ;;  %2194 = vmatmul.bf16.vlgmr.msrb.gmra.mxu2 %v2100_v62  ;;  %v1816_v6 = vsel %vm1752_vm6, %v1701_v61, %v1784_v1  ;;  %v5039_v61 = vld [vmem:[#allocation8 + $0x50] sm:$0xff] }
 0x3a5   : > { %v1838_v9 = vpack.c.bf16 %v1816_v6, %v1815_v4  ;;  %v1930_v31 = vadd.f32 %v6164_v36, %v1929_v2  ;;  %2462 = vmatpush.bf16.msrb.mxu3 %v5039_v61 }
 0x3a7   : > { %v1703_v12 = vpop.f32.mrf.mxu0  ;;  %1968 = vmatmul.bf16.gmra.mxu1 %v1838_v9  ;;  %v2038_v24 = vmul.f32 0.2, %v1930_v31  ;;  %vm2006_vm7 = vcmp.gt.f32.partialorder %v1930_v31, 0.0 }
 0x3a8   : > { %v1704_v15 = vadd.f32 %v6077_v60, %v1703_v12 }
 0x3a9   : > { %v2070_v38 = vsel %vm2006_vm7, %v1930_v31, %v2038_v24 }
 0x3aa   : > { %v1785_v34 = vmul.f32 0.2, %v1704_v15  ;;  %vm1753_vm9 = vcmp.gt.f32.partialorder %v1704_v15, 0.0 }
 0x3ac   : > { %v1931_v20 = vpop.f32.mrf.mxu1  ;;  %v1817_v43 = vsel %vm1753_vm9, %v1704_v15, %v1785_v34 }
 0x3ad   : > { %v1932_v26 = vadd.f32 %v6164_v36, %v1931_v20 }
 0x3af   : > { %vm2007_vm8 = vcmp.gt.f32.partialorder %v1932_v26, 0.0  ;;  %v2039_v29 = vmul.f32 0.2, %v1932_v26  ;;  %v1705_v32 = vpop.f32.mrf.mxu0 }
 0x3b0   : > { %v1706_v37 = vadd.f32 %v6077_v60, %v1705_v32 }
 0x3b1   : > { %v2071_v39 = vsel %vm2007_vm8, %v1932_v26, %v2039_v29 }
 0x3b2   : > { %vm1754_vm10 = vcmp.gt.f32.partialorder %v1706_v37, 0.0  ;;  %v1786_v40 = vmul.f32 0.2, %v1706_v37  ;;  %v2101_v41 = vpack.c.bf16 %v2071_v39, %v2070_v38 }
 0x3b4   : > { %v1934_v42 = vpop.f32.mrf.mxu1  ;;  %2199 = vmatmul.bf16.gmra.mxu2 %v2101_v41  ;;  %v1818_v45 = vsel %vm1754_vm10, %v1706_v37, %v1786_v40  ;;  %v5051_v37 = vld [vmem:[%s7156_s1 + $0xb0] sm:$0xff] }
 0x3b5   : > { %v1839_v53 = vpack.c.bf16 %v1818_v45, %v1817_v43  ;;  %v1935_v59 = vadd.f32 %v6164_v36, %v1934_v42  ;;  %2665 = vmatpush.bf16.msra.mxu0 %v5051_v37 }
 0x3b7   : > { %v1708_v55 = vpop.f32.mrf.mxu0  ;;  %1973 = vmatmul.bf16.gmra.mxu1 %v1839_v53  ;;  %v2040_v62 = vmul.f32 0.2, %v1935_v59  ;;  %vm2008_vm11 = vcmp.gt.f32.partialorder %v1935_v59, 0.0 }
 0x3b8   : > { %v1709_v63 = vadd.f32 %v6077_v60, %v1708_v55 }
 0x3b9   : > { %v2072_v12 = vsel %vm2008_vm11, %v1935_v59, %v2040_v62 }
 0x3ba   : > { %v1787_v6 = vmul.f32 0.2, %v1709_v63  ;;  %vm1755_vm13 = vcmp.gt.f32.partialorder %v1709_v63, 0.0 }
 0x3bc   : > { %v1936_v0 = vpop.f32.mrf.mxu1  ;;  %v1819_v24 = vsel %vm1755_vm13, %v1709_v63, %v1787_v6 }
 0x3bd   : > { %v1937_v1 = vadd.f32 %v6164_v36, %v1936_v0 }
 0x3bf   : > { %vm2009_vm12 = vcmp.gt.f32.partialorder %v1937_v1, 0.0  ;;  %v2041_v2 = vmul.f32 0.2, %v1937_v1  ;;  %v1710_v4 = vpop.f32.mrf.mxu0 }
 0x3c0   : > { %v1711_v9 = vadd.f32 %v6077_v60, %v1710_v4 }
 0x3c1   : > { %v2073_v31 = vsel %vm2009_vm12, %v1937_v1, %v2041_v2 }
 0x3c2   : > { %vm1756_vm14 = vcmp.gt.f32.partialorder %v1711_v9, 0.0  ;;  %v1788_v13 = vmul.f32 0.2, %v1711_v9  ;;  %v2102_v15 = vpack.c.bf16 %v2073_v31, %v2072_v12 }
 0x3c4   : > { %v1939_v20 = vpop.f32.mrf.mxu1  ;;  %2204 = vmatmul.bf16.gmra.mxu2 %v2102_v15  ;;  %v1820_v26 = vsel %vm1756_vm14, %v1711_v9, %v1788_v13  ;;  %v5038_v9 = vld [vmem:[#allocation8 + $0x48] sm:$0xff] }
 0x3c5   : > { %v1840_v29 = vpack.c.bf16 %v1820_v26, %v1819_v24  ;;  %v1940_v34 = vadd.f32 %v6164_v36, %v1939_v20  ;;  %2463 = vmatpush.bf16.msrb.mxu3 %v5038_v9 }
 0x3c7   : > { %v1713_v32 = vpop.f32.mrf.mxu0  ;;  %1978 = vmatmul.bf16.gmra.mxu1 %v1840_v29  ;;  %v2042_v40 = vmul.f32 0.2, %v1940_v34  ;;  %vm2010_vm15 = vcmp.gt.f32.partialorder %v1940_v34, 0.0 }
 0x3c8   : > { %v1714_v38 = vadd.f32 %v6077_v60, %v1713_v32 }
 0x3c9   : > { %v2074_v55 = vsel %vm2010_vm15, %v1940_v34, %v2042_v40 }
 0x3ca   : > { %v1789_v45 = vmul.f32 0.2, %v1714_v38  ;;  %vm1757_vm1 = vcmp.gt.f32.partialorder %v1714_v38, 0.0 }
 0x3cc   : > { %v1941_v39 = vpop.f32.mrf.mxu1  ;;  %v1821_v62 = vsel %vm1757_vm1, %v1714_v38, %v1789_v45  ;;  %v5050_v45 = vld [vmem:[%s7156_s1 + $0xa8] sm:$0xff] }
 0x3cd   : > { %v1942_v41 = vadd.f32 %v6164_v36, %v1941_v39  ;;  %2666 = vmatpush.bf16.msra.mxu0 %v5050_v45 }
 0x3cf   : > { %vm2011_vm0 = vcmp.gt.f32.partialorder %v1942_v41, 0.0  ;;  %v2043_v42 = vmul.f32 0.2, %v1942_v41  ;;  %v1715_v43 = vpop.f32.mrf.mxu0 }
 0x3d0   : > { %v1716_v53 = vadd.f32 %v6077_v60, %v1715_v43 }
 0x3d1   : > { %v2075_v59 = vsel %vm2011_vm0, %v1942_v41, %v2043_v42 }
 0x3d2   : > { %vm1758_vm2 = vcmp.gt.f32.partialorder %v1716_v53, 0.0  ;;  %v1790_v61 = vmul.f32 0.2, %v1716_v53  ;;  %v2103_v63 = vpack.c.bf16 %v2075_v59, %v2074_v55 }
 0x3d4   : > { %v1944_v0 = vpop.f32.mrf.mxu1  ;;  %2209 = vmatmul.bf16.gmra.mxu2 %v2103_v63  ;;  %v1822_v1 = vsel %vm1758_vm2, %v1716_v53, %v1790_v61 }
 0x3d5   : > { %v1841_v2 = vpack.c.bf16 %v1822_v1, %v1821_v62  ;;  %v1945_v6 = vadd.f32 %v6164_v36, %v1944_v0 }
 0x3d7   : > { %v1718_v4 = vpop.f32.mrf.mxu0  ;;  %1983 = vmatmul.bf16.gmra.mxu1 %v1841_v2  ;;  %v2044_v13 = vmul.f32 0.2, %v1945_v6  ;;  %vm2012_vm3 = vcmp.gt.f32.partialorder %v1945_v6, 0.0 }
 0x3d8   : > { %v1719_v12 = vadd.f32 %v6077_v60, %v1718_v4 }
 0x3d9   : > { %v2076_v32 = vsel %vm2012_vm3, %v1945_v6, %v2044_v13 }
 0x3da   : > { %v1791_v26 = vmul.f32 0.2, %v1719_v12  ;;  %vm1759_vm5 = vcmp.gt.f32.partialorder %v1719_v12, 0.0 }
 0x3dc   : > { %v1946_v31 = vpop.f32.mrf.mxu1  ;;  %v1823_v40 = vsel %vm1759_vm5, %v1719_v12, %v1791_v26  ;;  %v5037_v26 = vld [vmem:[#allocation8 + $0x40] sm:$0xff] }
 0x3dd   : > { %v1947_v15 = vadd.f32 %v6164_v36, %v1946_v31  ;;  %2464 = vmatpush.bf16.msrb.mxu3 %v5037_v26 }
 0x3df   : > { %vm2013_vm4 = vcmp.gt.f32.partialorder %v1947_v15, 0.0  ;;  %v2045_v20 = vmul.f32 0.2, %v1947_v15  ;;  %v1720_v24 = vpop.f32.mrf.mxu0 }
 0x3e0   : > { %v1721_v29 = vadd.f32 %v6077_v60, %v1720_v24 }
 0x3e1   : > { %v2077_v34 = vsel %vm2013_vm4, %v1947_v15, %v2045_v20 }
 0x3e2   : > { %vm1760_vm6 = vcmp.gt.f32.partialorder %v1721_v29, 0.0  ;;  %v1792_v37 = vmul.f32 0.2, %v1721_v29  ;;  %v2104_v38 = vpack.c.bf16 %v2077_v34, %v2076_v32 }
 0x3e4   : > { %v1949_v39 = vpop.f32.mrf.mxu1  ;;  %2214 = vmatmul.bf16.gmra.mxu2 %v2104_v38  ;;  %v1824_v41 = vsel %vm1760_vm6, %v1721_v29, %v1792_v37 }
 0x3e5   : > { %v1842_v42 = vpack.c.bf16 %v1824_v41, %v1823_v40  ;;  %v1950_v53 = vadd.f32 %v6164_v36, %v1949_v39 }
 0x3e7   : > { %v1723_v43 = vpop.f32.mrf.mxu0  ;;  %1988 = vmatmul.bf16.gmra.mxu1 %v1842_v42  ;;  %v2046_v61 = vmul.f32 0.2, %v1950_v53  ;;  %vm2014_vm7 = vcmp.gt.f32.partialorder %v1950_v53, 0.0 }
 0x3e8   : > { %v1724_v55 = vadd.f32 %v6077_v60, %v1723_v43 }
 0x3e9   : > { %v2078_v4 = vsel %vm2014_vm7, %v1950_v53, %v2046_v61 }
 0x3ea   : > { %v1793_v1 = vmul.f32 0.2, %v1724_v55  ;;  %vm1761_vm9 = vcmp.gt.f32.partialorder %v1724_v55, 0.0 }
 0x3ec   : > { %v1951_v59 = vpop.f32.mrf.mxu1  ;;  %v1825_v13 = vsel %vm1761_vm9, %v1724_v55, %v1793_v1 }
 0x3ed   : > { %v1952_v63 = vadd.f32 %v6164_v36, %v1951_v59 }
 0x3ef   : > { %vm2015_vm8 = vcmp.gt.f32.partialorder %v1952_v63, 0.0  ;;  %v2047_v0 = vmul.f32 0.2, %v1952_v63  ;;  %v1725_v62 = vpop.f32.mrf.mxu0 }
 0x3f0   : > { %v1726_v2 = vadd.f32 %v6077_v60, %v1725_v62 }
 0x3f1   : > { %v2079_v6 = vsel %vm2015_vm8, %v1952_v63, %v2047_v0 }
 0x3f2   : > { %vm1762_vm10 = vcmp.gt.f32.partialorder %v1726_v2, 0.0  ;;  %v1794_v9 = vmul.f32 0.2, %v1726_v2  ;;  %v2105_v12 = vpack.c.bf16 %v2079_v6, %v2078_v4 }
 0x3f4   : > { %v1954_v31 = vpop.f32.mrf.mxu1  ;;  %2219 = vmatmul.bf16.gmra.mxu2 %v2105_v12  ;;  %v1826_v15 = vsel %vm1762_vm10, %v1726_v2, %v1794_v9  ;;  %v5049_v2 = vld [vmem:[%s7156_s1 + $0xa0] sm:$0xff] }
 0x3f5   : > { %v1843_v20 = vpack.c.bf16 %v1826_v15, %v1825_v13  ;;  %v1955_v29 = vadd.f32 %v6164_v36, %v1954_v31  ;;  %2667 = vmatpush.bf16.msra.mxu0 %v5049_v2 }
 0x3f7   : > { %v1728_v24 = vpop.f32.mrf.mxu0  ;;  %1993 = vmatmul.bf16.gmra.mxu1 %v1843_v20  ;;  %v2048_v37 = vmul.f32 0.2, %v1955_v29  ;;  %vm2016_vm11 = vcmp.gt.f32.partialorder %v1955_v29, 0.0 }
 0x3f8   : > { %v1729_v32 = vadd.f32 %v6077_v60, %v1728_v24 }
 0x3f9   : > { %v2080_v43 = vsel %vm2016_vm11, %v1955_v29, %v2048_v37 }
 0x3fa   : > { %v1795_v41 = vmul.f32 0.2, %v1729_v32  ;;  %vm1763_vm13 = vcmp.gt.f32.partialorder %v1729_v32, 0.0 }
 0x3fc   : > { %v1956_v34 = vpop.f32.mrf.mxu1  ;;  %v1827_v61 = vsel %vm1763_vm13, %v1729_v32, %v1795_v41 }
 0x3fd   : > { %v1957_v38 = vadd.f32 %v6164_v36, %v1956_v34 }
 0x3ff   : > { %vm2017_vm12 = vcmp.gt.f32.partialorder %v1957_v38, 0.0  ;;  %v2049_v39 = vmul.f32 0.2, %v1957_v38  ;;  %v1730_v40 = vpop.f32.mrf.mxu0 }
 0x400   : > { %v1731_v42 = vadd.f32 %v6077_v60, %v1730_v40  ;;  %v6210_v40 = vld [vmem:[#allocation6 + $0x3] ss:$0 sm:$0xff] }
 0x401   : > { %v2081_v45 = vsel %vm2017_vm12, %v1957_v38, %v2049_v39 }
 0x402   : > { %vm1764_vm14 = vcmp.gt.f32.partialorder %v1731_v42, 0.0  ;;  %v1796_v53 = vmul.f32 0.2, %v1731_v42  ;;  %v2106_v55 = vpack.c.bf16 %v2081_v45, %v2080_v43 }
 0x404   : > { %v1959_v59 = vpop.f32.mrf.mxu1  ;;  %2224 = vmatmul.bf16.gmra.mxu2 %v2106_v55  ;;  %v1828_v63 = vsel %vm1764_vm14, %v1731_v42, %v1796_v53  ;;  %v5048_v42 = vld [vmem:[%s7156_s1 + $0x98] sm:$0xff] }
 0x405   : > { %v1844_v0 = vpack.c.bf16 %v1828_v63, %v1827_v61  ;;  %v1960_v62 = vadd.f32 %v6164_v36, %v1959_v59  ;;  %2668 = vmatpush.bf16.msra.mxu0 %v5048_v42 }
 0x407   : > { %1998 = vmatmul.bf16.gmra.mxu1 %v1844_v0  ;;  %v2050_v60 = vmul.f32 0.2, %v1960_v62  ;;  %vm2018_vm15 = vcmp.gt.f32.partialorder %v1960_v62, 0.0 }
 0x409   : > { %v2082_v9 = vsel %vm2018_vm15, %v1960_v62, %v2050_v60 }
 0x40c   : > { %v1961_v1 = vpop.f32.mrf.mxu1 }
 0x40d   : > { %v1962_v4 = vadd.f32 %v6164_v36, %v1961_v1 }
 0x40f   : > { %vm2019_vm0 = vcmp.gt.f32.partialorder %v1962_v4, 0.0  ;;  %v2051_v6 = vmul.f32 0.2, %v1962_v4 }
 0x411   : > { %v2083_v12 = vsel %vm2019_vm0, %v1962_v4, %v2051_v6 }
 0x412   : > { %v2107_v31 = vpack.c.bf16 %v2083_v12, %v2082_v9 }
 0x414   : > { %v1964_v13 = vpop.f32.mrf.mxu1  ;;  %2229 = vmatmul.bf16.gmra.mxu2 %v2107_v31 }
 0x415   : > { %v1965_v15 = vadd.f32 %v6164_v36, %v1964_v13  ;;  %v5060_v13 = vld [vmem:[%s7158_s3 + $0x138] sm:$0xff] }
 0x416   : > { %2935 = vmatpush.bf16.msra.mxu1 %v5060_v13 }
 0x417   : > { %v2052_v24 = vmul.f32 0.2, %v1965_v15  ;;  %vm2020_vm1 = vcmp.gt.f32.partialorder %v1965_v15, 0.0 }
 0x419   : > { %v2084_v32 = vsel %vm2020_vm1, %v1965_v15, %v2052_v24 }
 0x41c   : > { %v1966_v20 = vpop.f32.mrf.mxu1 }
 0x41d   : > { %v1967_v26 = vadd.f32 %v6164_v36, %v1966_v20 }
 0x41f   : > { %vm2021_vm2 = vcmp.gt.f32.partialorder %v1967_v26, 0.0  ;;  %v2053_v29 = vmul.f32 0.2, %v1967_v26 }
 0x421   : > { %v2085_v34 = vsel %vm2021_vm2, %v1967_v26, %v2053_v29 }
 0x422   : > { %v2108_v37 = vpack.c.bf16 %v2085_v34, %v2084_v32 }
 0x424   : > { %v1969_v38 = vpop.f32.mrf.mxu1  ;;  %2234 = vmatmul.bf16.gmra.mxu2 %v2108_v37 }
 0x425   : > { %v1970_v41 = vadd.f32 %v6164_v36, %v1969_v38 }
 0x427   : > { %v2195_v39 = vpop.f32.mrf.mxu2  ;;  %v2054_v53 = vmul.f32 0.2, %v1970_v41  ;;  %vm2022_vm3 = vcmp.gt.f32.partialorder %v1970_v41, 0.0 }
 0x428   : > { %v2196_v43 = vadd.f32 %v6210_v40, %v2195_v39 }
 0x429   : > { %v2086_v62 = vsel %vm2022_vm3, %v1970_v41, %v2054_v53 }
 0x42a   : > { %v2307_v63 = vmul.f32 0.2, %v2196_v43  ;;  %vm2275_vm5 = vcmp.gt.f32.partialorder %v2196_v43, 0.0 }
 0x42c   : > { %v1971_v45 = vpop.f32.mrf.mxu1  ;;  %v2339_v4 = vsel %vm2275_vm5, %v2196_v43, %v2307_v63 }
 0x42d   : > { %v1972_v55 = vadd.f32 %v6164_v36, %v1971_v45 }
 0x42f   : > { %vm2023_vm4 = vcmp.gt.f32.partialorder %v1972_v55, 0.0  ;;  %v2055_v59 = vmul.f32 0.2, %v1972_v55  ;;  %v2197_v61 = vpop.f32.mrf.mxu2 }
 0x430   : > { %v2198_v0 = vadd.f32 %v6210_v40, %v2197_v61 }
 0x431   : > { %v2087_v1 = vsel %vm2023_vm4, %v1972_v55, %v2055_v59 }
 0x432   : > { %vm2276_vm6 = vcmp.gt.f32.partialorder %v2198_v0, 0.0  ;;  %v2308_v2 = vmul.f32 0.2, %v2198_v0  ;;  %v2109_v60 = vpack.c.bf16 %v2087_v1, %v2086_v62 }
 0x434   : > { %v2340_v6 = vsel %vm2276_vm6, %v2198_v0, %v2308_v2  ;;  %v1974_v9 = vpop.f32.mrf.mxu1  ;;  %2239 = vmatmul.bf16.gmra.mxu2 %v2109_v60  ;;  %v5047_v0 = vld [vmem:[%s7156_s1 + $0x90] sm:$0xff] }
 0x435   : > { %v2371_v12 = vpack.c.bf16 %v2340_v6, %v2339_v4  ;;  %v1975_v15 = vadd.f32 %v6164_v36, %v1974_v9  ;;  %2669 = vmatpush.bf16.msra.mxu0 %v5047_v0 }
 0x437   : > { %v2200_v31 = vpop.f32.mrf.mxu2  ;;  %2465 = vmatmul.bf16.vlgmr.msrb.gmra.mxu3 %v2371_v12  ;;  %v2056_v26 = vmul.f32 0.2, %v1975_v15  ;;  %vm2024_vm7 = vcmp.gt.f32.partialorder %v1975_v15, 0.0 }
 0x438   : > { %v2201_v20 = vadd.f32 %v6210_v40, %v2200_v31 }
 0x439   : > { %v2088_v39 = vsel %vm2024_vm7, %v1975_v15, %v2056_v26 }
 0x43a   : > { %v2309_v37 = vmul.f32 0.2, %v2201_v20  ;;  %vm2277_vm9 = vcmp.gt.f32.partialorder %v2201_v20, 0.0 }
 0x43c   : > { %v1976_v24 = vpop.f32.mrf.mxu1  ;;  %v2341_v53 = vsel %vm2277_vm9, %v2201_v20, %v2309_v37  ;;  %v5059_v37 = vld [vmem:[%s7158_s3 + $0x130] sm:$0xff] }
 0x43d   : > { %v1977_v29 = vadd.f32 %v6164_v36, %v1976_v24  ;;  %2936 = vmatpush.bf16.msra.mxu1 %v5059_v37 }
 0x43f   : > { %vm2025_vm8 = vcmp.gt.f32.partialorder %v1977_v29, 0.0  ;;  %v2057_v32 = vmul.f32 0.2, %v1977_v29  ;;  %v2202_v34 = vpop.f32.mrf.mxu2 }
 0x440   : > { %v2203_v38 = vadd.f32 %v6210_v40, %v2202_v34 }
 0x441   : > { %v2089_v41 = vsel %vm2025_vm8, %v1977_v29, %v2057_v32 }
 0x442   : > { %vm2278_vm10 = vcmp.gt.f32.partialorder %v2203_v38, 0.0  ;;  %v2310_v42 = vmul.f32 0.2, %v2203_v38  ;;  %v2110_v43 = vpack.c.bf16 %v2089_v41, %v2088_v39 }
 0x444   : > { %v1979_v45 = vpop.f32.mrf.mxu1  ;;  %2244 = vmatmul.bf16.gmra.mxu2 %v2110_v43  ;;  %v2342_v55 = vsel %vm2278_vm10, %v2203_v38, %v2310_v42 }
 0x445   : > { %v2372_v59 = vpack.c.bf16 %v2342_v55, %v2341_v53  ;;  %v1980_v63 = vadd.f32 %v6164_v36, %v1979_v45 }
 0x447   : > { %v2205_v61 = vpop.f32.mrf.mxu2  ;;  %2470 = vmatmul.bf16.gmra.mxu3 %v2372_v59  ;;  %v2058_v2 = vmul.f32 0.2, %v1980_v63  ;;  %vm2026_vm11 = vcmp.gt.f32.partialorder %v1980_v63, 0.0 }
 0x448   : > { %v2206_v62 = vadd.f32 %v6210_v40, %v2205_v61 }
 0x449   : > { %v2090_v31 = vsel %vm2026_vm11, %v1980_v63, %v2058_v2 }
 0x44a   : > { %v2311_v9 = vmul.f32 0.2, %v2206_v62  ;;  %vm2279_vm13 = vcmp.gt.f32.partialorder %v2206_v62, 0.0 }
 0x44c   : > { %v1981_v1 = vpop.f32.mrf.mxu1  ;;  %v2343_v26 = vsel %vm2279_vm13, %v2206_v62, %v2311_v9 }
 0x44d   : > { %v1982_v60 = vadd.f32 %v6164_v36, %v1981_v1 }
 0x44f   : > { %vm2027_vm12 = vcmp.gt.f32.partialorder %v1982_v60, 0.0  ;;  %v2059_v4 = vmul.f32 0.2, %v1982_v60  ;;  %v2207_v6 = vpop.f32.mrf.mxu2 }
 0x450   : > { %v2208_v12 = vadd.f32 %v6210_v40, %v2207_v6 }
 0x451   : > { %v2091_v13 = vsel %vm2027_vm12, %v1982_v60, %v2059_v4 }
 0x452   : > { %vm2280_vm14 = vcmp.gt.f32.partialorder %v2208_v12, 0.0  ;;  %v2312_v15 = vmul.f32 0.2, %v2208_v12  ;;  %v2111_v20 = vpack.c.bf16 %v2091_v13, %v2090_v31 }
 0x454   : > { %v1984_v24 = vpop.f32.mrf.mxu1  ;;  %2249 = vmatmul.bf16.gmra.mxu2 %v2111_v20  ;;  %v2344_v29 = vsel %vm2280_vm14, %v2208_v12, %v2312_v15  ;;  %v5046_v12 = vld [vmem:[%s7156_s1 + $0x88] sm:$0xff] }
 0x455   : > { %v2373_v32 = vpack.c.bf16 %v2344_v29, %v2343_v26  ;;  %v1985_v38 = vadd.f32 %v6164_v36, %v1984_v24  ;;  %2670 = vmatpush.bf16.msra.mxu0 %v5046_v12 }
 0x457   : > { %v2210_v34 = vpop.f32.mrf.mxu2  ;;  %2475 = vmatmul.bf16.gmra.mxu3 %v2373_v32  ;;  %v2060_v42 = vmul.f32 0.2, %v1985_v38  ;;  %vm2028_vm15 = vcmp.gt.f32.partialorder %v1985_v38, 0.0 }
 0x458   : > { %v2211_v39 = vadd.f32 %v6210_v40, %v2210_v34 }
 0x459   : > { %v2092_v61 = vsel %vm2028_vm15, %v1985_v38, %v2060_v42 }
 0x45a   : > { %v2313_v55 = vmul.f32 0.2, %v2211_v39  ;;  %vm2281_vm1 = vcmp.gt.f32.partialorder %v2211_v39, 0.0 }
 0x45c   : > { %v1986_v41 = vpop.f32.mrf.mxu1  ;;  %v2345_v2 = vsel %vm2281_vm1, %v2211_v39, %v2313_v55 }
 0x45d   : > { %v1987_v43 = vadd.f32 %v6164_v36, %v1986_v41 }
 0x45f   : > { %vm2029_vm0 = vcmp.gt.f32.partialorder %v1987_v43, 0.0  ;;  %v2061_v45 = vmul.f32 0.2, %v1987_v43  ;;  %v2212_v53 = vpop.f32.mrf.mxu2 }
 0x460   : > { %v2213_v59 = vadd.f32 %v6210_v40, %v2212_v53 }
 0x461   : > { %v2093_v63 = vsel %vm2029_vm0, %v1987_v43, %v2061_v45  ;;  %v5058_v45 = vld [vmem:[%s7158_s3 + $0x128] sm:$0xff] }
 0x462   : > { %vm2282_vm2 = vcmp.gt.f32.partialorder %v2213_v59, 0.0  ;;  %v2314_v0 = vmul.f32 0.2, %v2213_v59  ;;  %v2112_v62 = vpack.c.bf16 %v2093_v63, %v2092_v61  ;;  %2937 = vmatpush.bf16.msra.mxu1 %v5058_v45 }
 0x464   : > { %v1989_v1 = vpop.f32.mrf.mxu1  ;;  %2254 = vmatmul.bf16.gmra.mxu2 %v2112_v62  ;;  %v2346_v60 = vsel %vm2282_vm2, %v2213_v59, %v2314_v0 }
 0x465   : > { %v2374_v4 = vpack.c.bf16 %v2346_v60, %v2345_v2  ;;  %v1990_v9 = vadd.f32 %v6164_v36, %v1989_v1 }
 0x467   : > { %v2215_v6 = vpop.f32.mrf.mxu2  ;;  %2480 = vmatmul.bf16.gmra.mxu3 %v2374_v4  ;;  %v2062_v15 = vmul.f32 0.2, %v1990_v9  ;;  %vm2030_vm3 = vcmp.gt.f32.partialorder %v1990_v9, 0.0 }
 0x468   : > { %v2216_v31 = vadd.f32 %v6210_v40, %v2215_v6 }
 0x469   : > { %v2094_v34 = vsel %vm2030_vm3, %v1990_v9, %v2062_v15 }
 0x46a   : > { %v2315_v29 = vmul.f32 0.2, %v2216_v31  ;;  %vm2283_vm5 = vcmp.gt.f32.partialorder %v2216_v31, 0.0 }
 0x46c   : > { %v1991_v13 = vpop.f32.mrf.mxu1  ;;  %v2347_v42 = vsel %vm2283_vm5, %v2216_v31, %v2315_v29 }
 0x46d   : > { %v1992_v20 = vadd.f32 %v6164_v36, %v1991_v13 }
 0x46f   : > { %vm2031_vm4 = vcmp.gt.f32.partialorder %v1992_v20, 0.0  ;;  %v2063_v24 = vmul.f32 0.2, %v1992_v20  ;;  %v2217_v26 = vpop.f32.mrf.mxu2 }
 0x470   : > { %v2218_v32 = vadd.f32 %v6210_v40, %v2217_v26 }
 0x471   : > { %v2095_v37 = vsel %vm2031_vm4, %v1992_v20, %v2063_v24 }
 0x472   : > { %vm2284_vm6 = vcmp.gt.f32.partialorder %v2218_v32, 0.0  ;;  %v2316_v38 = vmul.f32 0.2, %v2218_v32  ;;  %v2113_v39 = vpack.c.bf16 %v2095_v37, %v2094_v34 }
 0x474   : > { %v1994_v41 = vpop.f32.mrf.mxu1  ;;  %2259 = vmatmul.bf16.gmra.mxu2 %v2113_v39  ;;  %v2348_v43 = vsel %vm2284_vm6, %v2218_v32, %v2316_v38  ;;  %v5045_v32 = vld [vmem:[%s7156_s1 + $0x80] sm:$0xff] }
 0x475   : > { %v2375_v53 = vpack.c.bf16 %v2348_v43, %v2347_v42  ;;  %v1995_v59 = vadd.f32 %v6164_v36, %v1994_v41  ;;  %2671 = vmatpush.bf16.msra.mxu0 %v5045_v32 }
 0x477   : > { %v2220_v55 = vpop.f32.mrf.mxu2  ;;  %2485 = vmatmul.bf16.gmra.mxu3 %v2375_v53  ;;  %v2064_v0 = vmul.f32 0.2, %v1995_v59  ;;  %vm2032_vm7 = vcmp.gt.f32.partialorder %v1995_v59, 0.0 }
 0x478   : > { %v2221_v61 = vadd.f32 %v6210_v40, %v2220_v55 }
 0x479   : > { %v2096_v6 = vsel %vm2032_vm7, %v1995_v59, %v2064_v0 }
 0x47a   : > { %v2317_v60 = vmul.f32 0.2, %v2221_v61  ;;  %vm2285_vm9 = vcmp.gt.f32.partialorder %v2221_v61, 0.0 }
 0x47c   : > { %v1996_v63 = vpop.f32.mrf.mxu1  ;;  %v2349_v15 = vsel %vm2285_vm9, %v2221_v61, %v2317_v60 }
 0x47d   : > { %v1997_v62 = vadd.f32 %v6164_v36, %v1996_v63  ;;  %v5057_v63 = vld [vmem:[%s7158_s3 + $0x120] sm:$0xff] }
 0x47e   : > { %2938 = vmatpush.bf16.msra.mxu1 %v5057_v63 }
 0x47f   : > { %vm2033_vm8 = vcmp.gt.f32.partialorder %v1997_v62, 0.0  ;;  %v2065_v1 = vmul.f32 0.2, %v1997_v62  ;;  %v2222_v2 = vpop.f32.mrf.mxu2 }
 0x480   : > { %v2223_v4 = vadd.f32 %v6210_v40, %v2222_v2 }
 0x481   : > { %v2097_v9 = vsel %vm2033_vm8, %v1997_v62, %v2065_v1 }
 0x482   : > { %vm2286_vm10 = vcmp.gt.f32.partialorder %v2223_v4, 0.0  ;;  %v2318_v12 = vmul.f32 0.2, %v2223_v4  ;;  %v2114_v31 = vpack.c.bf16 %v2097_v9, %v2096_v6 }
 0x484   : > { %v1999_v13 = vpop.f32.mrf.mxu1  ;;  %2264 = vmatmul.bf16.gmra.mxu2 %v2114_v31  ;;  %v2350_v20 = vsel %vm2286_vm10, %v2223_v4, %v2318_v12 }
 0x485   : > { %v2376_v24 = vpack.c.bf16 %v2350_v20, %v2349_v15  ;;  %v2000_v29 = vadd.f32 %v6164_v36, %v1999_v13 }
 0x487   : > { %v2225_v26 = vpop.f32.mrf.mxu2  ;;  %2490 = vmatmul.bf16.gmra.mxu3 %v2376_v24  ;;  %v2066_v38 = vmul.f32 0.2, %v2000_v29  ;;  %vm2034_vm11 = vcmp.gt.f32.partialorder %v2000_v29, 0.0 }
 0x488   : > { %v2226_v34 = vadd.f32 %v6210_v40, %v2225_v26 }
 0x489   : > { %v2098_v53 = vsel %vm2034_vm11, %v2000_v29, %v2066_v38 }
 0x48a   : > { %v2319_v43 = vmul.f32 0.2, %v2226_v34  ;;  %vm2287_vm13 = vcmp.gt.f32.partialorder %v2226_v34, 0.0 }
 0x48c   : > { %v2001_v37 = vpop.f32.mrf.mxu1  ;;  %v2351_v0 = vsel %vm2287_vm13, %v2226_v34, %v2319_v43 }
 0x48d   : > { %v2002_v39 = vadd.f32 %v6164_v36, %v2001_v37 }
 0x48f   : > { %vm2035_vm12 = vcmp.gt.f32.partialorder %v2002_v39, 0.0  ;;  %v2067_v41 = vmul.f32 0.2, %v2002_v39  ;;  %v2227_v42 = vpop.f32.mrf.mxu2 }
 0x490   : > { %v2228_v45 = vadd.f32 %v6210_v40, %v2227_v42 }
 0x491   : > { %v2099_v55 = vsel %vm2035_vm12, %v2002_v39, %v2067_v41  ;;  %v5056_v39 = vld [vmem:[%s7158_s3 + $0x118] sm:$0xff] }
 0x492   : > { %vm2288_vm14 = vcmp.gt.f32.partialorder %v2228_v45, 0.0  ;;  %v2320_v59 = vmul.f32 0.2, %v2228_v45  ;;  %v2115_v61 = vpack.c.bf16 %v2099_v55, %v2098_v53  ;;  %2939 = vmatpush.bf16.msra.mxu1 %v5056_v39 }
 0x494   : > { %2269 = vmatmul.bf16.gmra.mxu2 %v2115_v61  ;;  %v2352_v36 = vsel %vm2288_vm14, %v2228_v45, %v2320_v59  ;;  %v6272_v45 = vld [vmem:[#allocation9 + $0x1] ss:$0 sm:$0xff] }
 0x495   : > { %v2377_v62 = vpack.c.bf16 %v2352_v36, %v2351_v0 }
 0x497   : > { %v2230_v1 = vpop.f32.mrf.mxu2  ;;  %2495 = vmatmul.bf16.gmra.mxu3 %v2377_v62 }
 0x498   : > { %v2231_v2 = vadd.f32 %v6210_v40, %v2230_v1 }
 0x49a   : > { %v2321_v4 = vmul.f32 0.2, %v2231_v2  ;;  %vm2289_vm15 = vcmp.gt.f32.partialorder %v2231_v2, 0.0 }
 0x49c   : > { %v2353_v12 = vsel %vm2289_vm15, %v2231_v2, %v2321_v4 }
 0x49f   : > { %v2232_v60 = vpop.f32.mrf.mxu2 }
 0x4a0   : > { %v2233_v6 = vadd.f32 %v6210_v40, %v2232_v60 }
 0x4a2   : > { %vm2290_vm0 = vcmp.gt.f32.partialorder %v2233_v6, 0.0  ;;  %v2322_v9 = vmul.f32 0.2, %v2233_v6 }
 0x4a4   : > { %v2354_v31 = vsel %vm2290_vm0, %v2233_v6, %v2322_v9  ;;  %v5068_v6 = vld [vmem:[%s7158_s3 + $0x178] sm:$0xff] }
 0x4a5   : > { %v2378_v13 = vpack.c.bf16 %v2354_v31, %v2353_v12  ;;  %3206 = vmatpush.bf16.msra.mxu2 %v5068_v6 }
 0x4a7   : > { %v2235_v15 = vpop.f32.mrf.mxu2  ;;  %2500 = vmatmul.bf16.gmra.mxu3 %v2378_v13 }
 0x4a8   : > { %v2236_v20 = vadd.f32 %v6210_v40, %v2235_v15 }
 0x4aa   : > { %v2323_v26 = vmul.f32 0.2, %v2236_v20  ;;  %vm2291_vm1 = vcmp.gt.f32.partialorder %v2236_v20, 0.0 }
 0x4ac   : > { %v2355_v34 = vsel %vm2291_vm1, %v2236_v20, %v2323_v26 }
 0x4af   : > { %v2237_v24 = vpop.f32.mrf.mxu2 }
 0x4b0   : > { %v2238_v29 = vadd.f32 %v6210_v40, %v2237_v24 }
 0x4b2   : > { %vm2292_vm2 = vcmp.gt.f32.partialorder %v2238_v29, 0.0  ;;  %v2324_v32 = vmul.f32 0.2, %v2238_v29 }
 0x4b4   : > { %v2356_v37 = vsel %vm2292_vm2, %v2238_v29, %v2324_v32 }
 0x4b5   : > { %v2379_v38 = vpack.c.bf16 %v2356_v37, %v2355_v34 }
 0x4b7   : > { %v2240_v41 = vpop.f32.mrf.mxu2  ;;  %2505 = vmatmul.bf16.gmra.mxu3 %v2379_v38 }
 0x4b8   : > { %v2241_v43 = vadd.f32 %v6210_v40, %v2240_v41  ;;  %v5055_v41 = vld [vmem:[%s7158_s3 + $0x110] sm:$0xff] }
 0x4b9   : > { %2940 = vmatpush.bf16.msra.mxu1 %v5055_v41 }
 0x4ba   : > { %v2466_v42 = vpop.f32.mrf.mxu3  ;;  %v2325_v55 = vmul.f32 0.2, %v2241_v43  ;;  %vm2293_vm3 = vcmp.gt.f32.partialorder %v2241_v43, 0.0 }
 0x4bb   : > { %v2467_v61 = vadd.f32 %v6272_v45, %v2466_v42 }
 0x4bc   : > { %v2357_v62 = vsel %vm2293_vm3, %v2241_v43, %v2325_v55 }
 0x4bd   : > { %v6278_v2 = vadd.f32 %v2467_v61, %v5973_v3 }
 0x4bf   : > { %v2242_v53 = vpop.f32.mrf.mxu2 }
 0x4c0   : > { %v2243_v59 = vadd.f32 %v6210_v40, %v2242_v53 }
 0x4c2   : > { %vm2294_vm4 = vcmp.gt.f32.partialorder %v2243_v59, 0.0  ;;  %v2326_v63 = vmul.f32 0.2, %v2243_v59  ;;  %v2468_v0 = vpop.f32.mrf.mxu3 }
 0x4c3   : > { %v2469_v36 = vadd.f32 %v6272_v45, %v2468_v0 }
 0x4c4   : > { %v2358_v1 = vsel %vm2294_vm4, %v2243_v59, %v2326_v63 }
 0x4c5   : > { %v6281_v60 = vadd.f32 %v2469_v36, %v5975_v11  ;;  %v2380_v4 = vpack.c.bf16 %v2358_v1, %v2357_v62 }
 0x4c7   : > { %v2578_v9 = vpack.c.bf16 %v6281_v60, %v6278_v2  ;;  %v2245_v12 = vpop.f32.mrf.mxu2  ;;  %2510 = vmatmul.bf16.gmra.mxu3 %v2380_v4 }
 0x4c8   : > { %v2246_v13 = vadd.f32 %v6210_v40, %v2245_v12  ;;  %v5067_v12 = vld [vmem:[%s7158_s3 + $0x170] sm:$0xff] }
 0x4c9   : > { %2672 = vmatmul.bf16.vlgmr.msra.gmra.mxu0 %v2578_v9  ;;  %3207 = vmatpush.bf16.msra.mxu2 %v5067_v12 }
 0x4ca   : > { %v2471_v31 = vpop.f32.mrf.mxu3  ;;  %v2327_v15 = vmul.f32 0.2, %v2246_v13  ;;  %vm2295_vm5 = vcmp.gt.f32.partialorder %v2246_v13, 0.0 }
 0x4cb   : > { %v2472_v20 = vadd.f32 %v6272_v45, %v2471_v31 }
 0x4cc   : > { %v2359_v32 = vsel %vm2295_vm5, %v2246_v13, %v2327_v15 }
 0x4cd   : > { %v6293_v37 = vadd.f32 %v2472_v20, %v5986_v28 }
 0x4cf   : > { %v2247_v3 = vpop.f32.mrf.mxu2 }
 0x4d0   : > { %v2248_v11 = vadd.f32 %v6210_v40, %v2247_v3 }
 0x4d2   : > { %vm2296_vm6 = vcmp.gt.f32.partialorder %v2248_v11, 0.0  ;;  %v2328_v24 = vmul.f32 0.2, %v2248_v11  ;;  %v2473_v26 = vpop.f32.mrf.mxu3 }
 0x4d3   : > { %v2474_v29 = vadd.f32 %v6272_v45, %v2473_v26 }
 0x4d4   : > { %v2360_v34 = vsel %vm2296_vm6, %v2248_v11, %v2328_v24 }
 0x4d5   : > { %v6296_v38 = vadd.f32 %v2474_v29, %v5988_v30  ;;  %v2381_v39 = vpack.c.bf16 %v2360_v34, %v2359_v32 }
 0x4d7   : > { %v2250_v42 = vpop.f32.mrf.mxu2  ;;  %2515 = vmatmul.bf16.gmra.mxu3 %v2381_v39  ;;  %v2579_v43 = vpack.c.bf16 %v6296_v38, %v6293_v37 }
 0x4d8   : > { %v2251_v55 = vadd.f32 %v6210_v40, %v2250_v42 }
 0x4d9   : > { %2677 = vmatmul.bf16.gmra.mxu0 %v2579_v43  ;;  %v5054_v43 = vld [vmem:[%s7158_s3 + $0x108] sm:$0xff] }
 0x4da   : > { %v2476_v53 = vpop.f32.mrf.mxu3  ;;  %v2329_v59 = vmul.f32 0.2, %v2251_v55  ;;  %vm2297_vm7 = vcmp.gt.f32.partialorder %v2251_v55, 0.0  ;;  %2941 = vmatpush.bf16.msra.mxu1 %v5054_v43 }
 0x4db   : > { %v2477_v61 = vadd.f32 %v6272_v45, %v2476_v53 }
 0x4dc   : > { %v2361_v62 = vsel %vm2297_vm7, %v2251_v55, %v2329_v59 }
 0x4dd   : > { %v6308_v4 = vadd.f32 %v2477_v61, %v5999_v47 }
 0x4df   : > { %v2252_v28 = vpop.f32.mrf.mxu2 }
 0x4e0   : > { %v2253_v30 = vadd.f32 %v6210_v40, %v2252_v28 }
 0x4e2   : > { %vm2298_vm8 = vcmp.gt.f32.partialorder %v2253_v30, 0.0  ;;  %v2330_v63 = vmul.f32 0.2, %v2253_v30  ;;  %v2478_v0 = vpop.f32.mrf.mxu3 }
 0x4e3   : > { %v2479_v36 = vadd.f32 %v6272_v45, %v2478_v0 }
 0x4e4   : > { %v2362_v1 = vsel %vm2298_vm8, %v2253_v30, %v2330_v63 }
 0x4e5   : > { %v6311_v6 = vadd.f32 %v2479_v36, %v6001_v49  ;;  %v2382_v9 = vpack.c.bf16 %v2362_v1, %v2361_v62 }
 0x4e7   : > { %v2255_v31 = vpop.f32.mrf.mxu2  ;;  %2520 = vmatmul.bf16.gmra.mxu3 %v2382_v9  ;;  %v2580_v13 = vpack.c.bf16 %v6311_v6, %v6308_v4 }
 0x4e8   : > { %v2256_v15 = vadd.f32 %v6210_v40, %v2255_v31 }
 0x4e9   : > { %2682 = vmatmul.bf16.gmra.mxu0 %v2580_v13  ;;  %v5066_v13 = vld [vmem:[%s7158_s3 + $0x168] sm:$0xff] }
 0x4ea   : > { %v2481_v3 = vpop.f32.mrf.mxu3  ;;  %v2331_v11 = vmul.f32 0.2, %v2256_v15  ;;  %vm2299_vm9 = vcmp.gt.f32.partialorder %v2256_v15, 0.0  ;;  %3208 = vmatpush.bf16.msra.mxu2 %v5066_v13 }
 0x4eb   : > { %v2482_v20 = vadd.f32 %v6272_v45, %v2481_v3 }
 0x4ec   : > { %v2363_v32 = vsel %vm2299_vm9, %v2256_v15, %v2331_v11 }
 0x4ed   : > { %v6323_v39 = vadd.f32 %v2482_v20, %v6012_v5 }
 0x4ef   : > { %v2257_v47 = vpop.f32.mrf.mxu2 }
 0x4f0   : > { %v2258_v49 = vadd.f32 %v6210_v40, %v2257_v47 }
 0x4f2   : > { %vm2300_vm10 = vcmp.gt.f32.partialorder %v2258_v49, 0.0  ;;  %v2332_v24 = vmul.f32 0.2, %v2258_v49  ;;  %v2483_v26 = vpop.f32.mrf.mxu3 }
 0x4f3   : > { %v2484_v29 = vadd.f32 %v6272_v45, %v2483_v26 }
 0x4f4   : > { %v2364_v34 = vsel %vm2300_vm10, %v2258_v49, %v2332_v24 }
 0x4f5   : > { %v6326_v41 = vadd.f32 %v2484_v29, %v6014_v7  ;;  %v2383_v42 = vpack.c.bf16 %v2364_v34, %v2363_v32 }
 0x4f7   : > { %v2260_v53 = vpop.f32.mrf.mxu2  ;;  %2525 = vmatmul.bf16.gmra.mxu3 %v2383_v42  ;;  %v2581_v55 = vpack.c.bf16 %v6326_v41, %v6323_v39 }
 0x4f8   : > { %v2261_v59 = vadd.f32 %v6210_v40, %v2260_v53 }
 0x4f9   : > { %2687 = vmatmul.bf16.gmra.mxu0 %v2581_v55  ;;  %v5053_v55 = vld [vmem:[%s7158_s3 + $0x100] sm:$0xff] }
 0x4fa   : > { %v2486_v28 = vpop.f32.mrf.mxu3  ;;  %v2333_v30 = vmul.f32 0.2, %v2261_v59  ;;  %vm2301_vm11 = vcmp.gt.f32.partialorder %v2261_v59, 0.0  ;;  %2942 = vmatpush.bf16.msra.mxu1 %v5053_v55 }
 0x4fb   : > { %v2487_v61 = vadd.f32 %v6272_v45, %v2486_v28 }
 0x4fc   : > { %v2365_v62 = vsel %vm2301_vm11, %v2261_v59, %v2333_v30 }
 0x4fd   : > { %v6338_v9 = vadd.f32 %v2487_v61, %v6025_v25 }
 0x4ff   : > { %v2262_v5 = vpop.f32.mrf.mxu2 }
 0x500   : > { %v2263_v7 = vadd.f32 %v6210_v40, %v2262_v5 }
 0x502   : > { %vm2302_vm12 = vcmp.gt.f32.partialorder %v2263_v7, 0.0  ;;  %v2334_v63 = vmul.f32 0.2, %v2263_v7  ;;  %v2488_v0 = vpop.f32.mrf.mxu3 }
 0x503   : > { %v2489_v36 = vadd.f32 %v6272_v45, %v2488_v0 }
 0x504   : > { %v2366_v1 = vsel %vm2302_vm12, %v2263_v7, %v2334_v63 }
 0x505   : > { %v6341_v12 = vadd.f32 %v2489_v36, %v6027_v27  ;;  %v2384_v31 = vpack.c.bf16 %v2366_v1, %v2365_v62 }
 0x507   : > { %v2265_v3 = vpop.f32.mrf.mxu2  ;;  %2530 = vmatmul.bf16.gmra.mxu3 %v2384_v31  ;;  %v2582_v15 = vpack.c.bf16 %v6341_v12, %v6338_v9 }
 0x508   : > { %v2266_v11 = vadd.f32 %v6210_v40, %v2265_v3 }
 0x509   : > { %2692 = vmatmul.bf16.gmra.mxu0 %v2582_v15 }
 0x50a   : > { %v2491_v47 = vpop.f32.mrf.mxu3  ;;  %v2335_v49 = vmul.f32 0.2, %v2266_v11  ;;  %vm2303_vm13 = vcmp.gt.f32.partialorder %v2266_v11, 0.0 }
 0x50b   : > { %v2492_v20 = vadd.f32 %v6272_v45, %v2491_v47 }
 0x50c   : > { %v2367_v32 = vsel %vm2303_vm13, %v2266_v11, %v2335_v49 }
 0x50d   : > { %v6353_v42 = vadd.f32 %v2492_v20, %v6038_v46 }
 0x50f   : > { %v2267_v25 = vpop.f32.mrf.mxu2 }
 0x510   : > { %v2268_v27 = vadd.f32 %v6210_v40, %v2267_v25 }
 0x512   : > { %vm2304_vm14 = vcmp.gt.f32.partialorder %v2268_v27, 0.0  ;;  %v2336_v24 = vmul.f32 0.2, %v2268_v27  ;;  %v2493_v26 = vpop.f32.mrf.mxu3 }
 0x513   : > { %v2494_v29 = vadd.f32 %v6272_v45, %v2493_v26 }
 0x514   : > { %v2368_v34 = vsel %vm2304_vm14, %v2268_v27, %v2336_v24 }
 0x515   : > { %v6356_v43 = vadd.f32 %v2494_v29, %v6040_v50  ;;  %v2385_v53 = vpack.c.bf16 %v2368_v34, %v2367_v32 }
 0x517   : > { %v2270_v28 = vpop.f32.mrf.mxu2  ;;  %2535 = vmatmul.bf16.gmra.mxu3 %v2385_v53  ;;  %v2583_v59 = vpack.c.bf16 %v6356_v43, %v6353_v42  ;;  %v6399_v53 = vld [vmem:[#allocation3 + $0x2] ss:$0 sm:$0xff] }
 0x518   : > { %v2271_v30 = vadd.f32 %v6210_v40, %v2270_v28 }
 0x519   : > { %2697 = vmatmul.bf16.gmra.mxu0 %v2583_v59 }
 0x51a   : > { %v2496_v5 = vpop.f32.mrf.mxu3  ;;  %v2337_v7 = vmul.f32 0.2, %v2271_v30  ;;  %vm2305_vm15 = vcmp.gt.f32.partialorder %v2271_v30, 0.0 }
 0x51b   : > { %v2497_v61 = vadd.f32 %v6272_v45, %v2496_v5 }
 0x51c   : > { %v2369_v62 = vsel %vm2305_vm15, %v2271_v30, %v2337_v7 }
 0x51d   : > { %v6368_v31 = vadd.f32 %v2497_v61, %v6051_v8 }
 0x51f   : > { %v2272_v46 = vpop.f32.mrf.mxu2 }
 0x520   : > { %v2273_v50 = vadd.f32 %v6210_v40, %v2272_v46  ;;  %v5065_v40 = vld [vmem:[%s7158_s3 + $0x160] sm:$0xff] }
 0x521   : > { %3209 = vmatpush.bf16.msra.mxu2 %v5065_v40  ;;  %v5076_v40 = vld [vmem:[#allocation8 + $0xb8] sm:$0xff] }
 0x522   : > { %vm2306_vm0 = vcmp.gt.f32.partialorder %v2273_v50, 0.0  ;;  %v2338_v63 = vmul.f32 0.2, %v2273_v50  ;;  %v2498_v0 = vpop.f32.mrf.mxu3  ;;  %3477 = vmatpush.bf16.msra.mxu3 %v5076_v40 }
 0x523   : > { %v2499_v36 = vadd.f32 %v6272_v45, %v2498_v0 }
 0x524   : > { %v2370_v1 = vsel %vm2306_vm0, %v2273_v50, %v2338_v63 }
 0x525   : > { %v6371_v13 = vadd.f32 %v2499_v36, %v6053_v10  ;;  %v2386_v3 = vpack.c.bf16 %v2370_v1, %v2369_v62 }
 0x527   : > { %2540 = vmatmul.bf16.gmra.mxu3 %v2386_v3  ;;  %v2584_v15 = vpack.c.bf16 %v6371_v13, %v6368_v31 }
 0x529   : > { %2702 = vmatmul.bf16.gmra.mxu0 %v2584_v15 }
 0x52a   : > { %v2501_v47 = vpop.f32.mrf.mxu3 }
 0x52b   : > { %v2502_v11 = vadd.f32 %v6272_v45, %v2501_v47 }
 0x52d   : > { %v6381_v10 = vadd.f32 %v2502_v11, %v6062_v19  ;;  %v5064_v19 = vld [vmem:[%s7158_s3 + $0x158] sm:$0xff] }
 0x52e   : > { %3210 = vmatpush.bf16.msra.mxu2 %v5064_v19 }
 0x532   : > { %v2503_v25 = vpop.f32.mrf.mxu3 }
 0x533   : > { %v2504_v8 = vadd.f32 %v6272_v45, %v2503_v25 }
 0x535   : > { %v6384_v49 = vadd.f32 %v2504_v8, %v6064_v21 }
 0x537   : > { %v2585_v27 = vpack.c.bf16 %v6384_v49, %v6381_v10 }
 0x539   : > { %2707 = vmatmul.bf16.gmra.mxu0 %v2585_v27 }
 0x53a   : > { %v2506_v20 = vpop.f32.mrf.mxu3 }
 0x53b   : > { %v2507_v24 = vadd.f32 %v6272_v45, %v2506_v20 }
 0x53d   : > { %v6391_v32 = vadd.f32 %v2507_v24, %v6070_v33 }
 0x542   : > { %v2508_v26 = vpop.f32.mrf.mxu3 }
 0x543   : > { %v2509_v29 = vadd.f32 %v6272_v45, %v2508_v26 }
 0x545   : > { %v6394_v34 = vadd.f32 %v2509_v29, %v6072_v35 }
 0x546   : > { %v2673_v21 = vpop.f32.mrf.mxu0 }
 0x547   : > { %v2586_v55 = vpack.c.bf16 %v6394_v34, %v6391_v32  ;;  %v2674_v59 = vadd.f32 %v6399_v53, %v2673_v21 }
 0x549   : > { %2712 = vmatmul.bf16.gmra.mxu0 %v2586_v55  ;;  %v2785_v5 = vmul.f32 0.2, %v2674_v59  ;;  %vm2753_vm1 = vcmp.gt.f32.partialorder %v2674_v59, 0.0  ;;  %v5063_v55 = vld [vmem:[%s7158_s3 + $0x150] sm:$0xff] }
 0x54a   : > { %v2511_v28 = vpop.f32.mrf.mxu3  ;;  %3211 = vmatpush.bf16.msra.mxu2 %v5063_v55 }
 0x54b   : > { %v2512_v30 = vadd.f32 %v6272_v45, %v2511_v28  ;;  %v2817_v50 = vsel %vm2753_vm1, %v2674_v59, %v2785_v5 }
 0x54d   : > { %v6408_v36 = vadd.f32 %v2512_v30, %v6085_v56 }
 0x54e   : > { %v2675_v33 = vpop.f32.mrf.mxu0 }
 0x54f   : > { %v2676_v35 = vadd.f32 %v6399_v53, %v2675_v33 }
 0x551   : > { %vm2754_vm2 = vcmp.gt.f32.partialorder %v2676_v35, 0.0  ;;  %v2786_v46 = vmul.f32 0.2, %v2676_v35 }
 0x552   : > { %v2513_v7 = vpop.f32.mrf.mxu3 }
 0x553   : > { %v2818_v61 = vsel %vm2754_vm2, %v2676_v35, %v2786_v46  ;;  %v2514_v63 = vadd.f32 %v6272_v45, %v2513_v7 }
 0x554   : > { %v2849_v0 = vpack.c.bf16 %v2818_v61, %v2817_v50 }
 0x555   : > { %v6411_v62 = vadd.f32 %v2514_v63, %v6087_v58 }
 0x556   : > { %v2678_v1 = vpop.f32.mrf.mxu0  ;;  %2943 = vmatmul.bf16.vlgmr.msra.gmra.mxu1 %v2849_v0 }
 0x557   : > { %v2587_v3 = vpack.c.bf16 %v6411_v62, %v6408_v36  ;;  %v2679_v47 = vadd.f32 %v6399_v53, %v2678_v1 }
 0x559   : > { %2717 = vmatmul.bf16.gmra.mxu0 %v2587_v3  ;;  %v2787_v25 = vmul.f32 0.2, %v2679_v47  ;;  %vm2755_vm3 = vcmp.gt.f32.partialorder %v2679_v47, 0.0 }
 0x55a   : > { %v2516_v15 = vpop.f32.mrf.mxu3 }
 0x55b   : > { %v2517_v56 = vadd.f32 %v6272_v45, %v2516_v15  ;;  %v2819_v24 = vsel %vm2755_vm3, %v2679_v47, %v2787_v25  ;;  %v5075_v47 = vld [vmem:[#allocation8 + $0xb0] sm:$0xff] }
 0x55c   : > { %3478 = vmatpush.bf16.msra.mxu3 %v5075_v47 }
 0x55d   : > { %v6420_v19 = vadd.f32 %v2517_v56, %v6095_v18 }
 0x55e   : > { %v2680_v11 = vpop.f32.mrf.mxu0 }
 0x55f   : > { %v2681_v8 = vadd.f32 %v6399_v53, %v2680_v11 }
 0x561   : > { %vm2756_vm4 = vcmp.gt.f32.partialorder %v2681_v8, 0.0  ;;  %v2788_v58 = vmul.f32 0.2, %v2681_v8 }
 0x562   : > { %v2518_v27 = vpop.f32.mrf.mxu3 }
 0x563   : > { %v2519_v20 = vadd.f32 %v6272_v45, %v2518_v27  ;;  %v2820_v26 = vsel %vm2756_vm4, %v2681_v8, %v2788_v58 }
 0x564   : > { %v2850_v29 = vpack.c.bf16 %v2820_v26, %v2819_v24 }
 0x565   : > { %v6423_v21 = vadd.f32 %v2519_v20, %v6097_v22 }
 0x566   : > { %v2683_v28 = vpop.f32.mrf.mxu0  ;;  %2948 = vmatmul.bf16.gmra.mxu1 %v2850_v29 }
 0x567   : > { %v2588_v59 = vpack.c.bf16 %v6423_v21, %v6420_v19  ;;  %v2684_v5 = vadd.f32 %v6399_v53, %v2683_v28 }
 0x569   : > { %2722 = vmatmul.bf16.gmra.mxu0 %v2588_v59  ;;  %v2789_v18 = vmul.f32 0.2, %v2684_v5  ;;  %vm2757_vm5 = vcmp.gt.f32.partialorder %v2684_v5, 0.0  ;;  %v5062_v59 = vld [vmem:[%s7158_s3 + $0x148] sm:$0xff] }
 0x56a   : > { %v2521_v33 = vpop.f32.mrf.mxu3  ;;  %3212 = vmatpush.bf16.msra.mxu2 %v5062_v59 }
 0x56b   : > { %v2522_v22 = vadd.f32 %v6272_v45, %v2521_v33  ;;  %v2821_v61 = vsel %vm2757_vm5, %v2684_v5, %v2789_v18 }
 0x56d   : > { %v6435_v1 = vadd.f32 %v2522_v22, %v6108_v48 }
 0x56e   : > { %v2685_v35 = vpop.f32.mrf.mxu0 }
 0x56f   : > { %v2686_v30 = vadd.f32 %v6399_v53, %v2685_v35 }
 0x571   : > { %vm2758_vm6 = vcmp.gt.f32.partialorder %v2686_v30, 0.0  ;;  %v2790_v46 = vmul.f32 0.2, %v2686_v30 }
 0x572   : > { %v2523_v7 = vpop.f32.mrf.mxu3 }
 0x573   : > { %v2524_v50 = vadd.f32 %v6272_v45, %v2523_v7  ;;  %v2822_v63 = vsel %vm2758_vm6, %v2686_v30, %v2790_v46 }
 0x574   : > { %v2851_v0 = vpack.c.bf16 %v2822_v63, %v2821_v61 }
 0x575   : > { %v6438_v3 = vadd.f32 %v2524_v50, %v6110_v52 }
 0x576   : > { %v2688_v40 = vpop.f32.mrf.mxu0  ;;  %2953 = vmatmul.bf16.gmra.mxu1 %v2851_v0 }
 0x577   : > { %v2589_v15 = vpack.c.bf16 %v6438_v3, %v6435_v1  ;;  %v2689_v25 = vadd.f32 %v6399_v53, %v2688_v40 }
 0x579   : > { %2727 = vmatmul.bf16.gmra.mxu0 %v2589_v15  ;;  %v2791_v56 = vmul.f32 0.2, %v2689_v25  ;;  %vm2759_vm7 = vcmp.gt.f32.partialorder %v2689_v25, 0.0 }
 0x57a   : > { %v2526_v11 = vpop.f32.mrf.mxu3 }
 0x57b   : > { %v2527_v48 = vadd.f32 %v6272_v45, %v2526_v11  ;;  %v2823_v24 = vsel %vm2759_vm7, %v2689_v25, %v2791_v56  ;;  %v5074_v25 = vld [vmem:[#allocation8 + $0xa8] sm:$0xff] }
 0x57c   : > { %3479 = vmatpush.bf16.msra.mxu3 %v5074_v25 }
 0x57d   : > { %v6447_v55 = vadd.f32 %v2527_v48, %v6118_v14 }
 0x57e   : > { %v2690_v8 = vpop.f32.mrf.mxu0 }
 0x57f   : > { %v2691_v58 = vadd.f32 %v6399_v53, %v2690_v8 }
 0x581   : > { %vm2760_vm8 = vcmp.gt.f32.partialorder %v2691_v58, 0.0  ;;  %v2792_v52 = vmul.f32 0.2, %v2691_v58 }
 0x582   : > { %v2528_v27 = vpop.f32.mrf.mxu3 }
 0x583   : > { %v2529_v20 = vadd.f32 %v6272_v45, %v2528_v27  ;;  %v2824_v26 = vsel %vm2760_vm8, %v2691_v58, %v2792_v52  ;;  %v5061_v27 = vld [vmem:[%s7158_s3 + $0x140] sm:$0xff] }
 0x584   : > { %v2852_v29 = vpack.c.bf16 %v2824_v26, %v2823_v24  ;;  %3213 = vmatpush.bf16.msra.mxu2 %v5061_v27 }
 0x585   : > { %v6450_v28 = vadd.f32 %v2529_v20, %v6120_v16 }
 0x586   : > { %v2693_v33 = vpop.f32.mrf.mxu0  ;;  %2958 = vmatmul.bf16.gmra.mxu1 %v2852_v29 }
 0x587   : > { %v2590_v5 = vpack.c.bf16 %v6450_v28, %v6447_v55  ;;  %v2694_v18 = vadd.f32 %v6399_v53, %v2693_v33 }
 0x589   : > { %2732 = vmatmul.bf16.gmra.mxu0 %v2590_v5  ;;  %v2793_v14 = vmul.f32 0.2, %v2694_v18  ;;  %vm2761_vm9 = vcmp.gt.f32.partialorder %v2694_v18, 0.0 }
 0x58a   : > { %v2531_v35 = vpop.f32.mrf.mxu3 }
 0x58b   : > { %v2532_v16 = vadd.f32 %v6272_v45, %v2531_v35  ;;  %v2825_v61 = vsel %vm2761_vm9, %v2694_v18, %v2793_v14 }
 0x58d   : > { %v6462_v40 = vadd.f32 %v2532_v16, %v6131_v44 }
 0x58e   : > { %v2695_v30 = vpop.f32.mrf.mxu0 }
 0x58f   : > { %v2696_v22 = vadd.f32 %v6399_v53, %v2695_v30 }
 0x591   : > { %vm2762_vm10 = vcmp.gt.f32.partialorder %v2696_v22, 0.0  ;;  %v2794_v46 = vmul.f32 0.2, %v2696_v22 }
 0x592   : > { %v2533_v7 = vpop.f32.mrf.mxu3 }
 0x593   : > { %v2534_v50 = vadd.f32 %v6272_v45, %v2533_v7  ;;  %v2826_v63 = vsel %vm2762_vm10, %v2696_v22, %v2794_v46 }
 0x594   : > { %v2853_v0 = vpack.c.bf16 %v2826_v63, %v2825_v61 }
 0x595   : > { %v6465_v15 = vadd.f32 %v2534_v50, %v6133_v51 }
 0x596   : > { %v2698_v47 = vpop.f32.mrf.mxu0  ;;  %2963 = vmatmul.bf16.gmra.mxu1 %v2853_v0 }
 0x597   : > { %v2591_v11 = vpack.c.bf16 %v6465_v15, %v6462_v40  ;;  %v2699_v56 = vadd.f32 %v6399_v53, %v2698_v47 }
 0x599   : > { %2737 = vmatmul.bf16.gmra.mxu0 %v2591_v11  ;;  %v2795_v48 = vmul.f32 0.2, %v2699_v56  ;;  %vm2763_vm11 = vcmp.gt.f32.partialorder %v2699_v56, 0.0 }
 0x59a   : > { %v2536_v8 = vpop.f32.mrf.mxu3 }
 0x59b   : > { %v2537_v44 = vadd.f32 %v6272_v45, %v2536_v8  ;;  %v2827_v26 = vsel %vm2763_vm11, %v2699_v56, %v2795_v48  ;;  %v5073_v56 = vld [vmem:[#allocation8 + $0xa0] sm:$0xff] }
 0x59c   : > { %3480 = vmatpush.bf16.msra.mxu3 %v5073_v56 }
 0x59d   : > { %v6477_v33 = vadd.f32 %v2537_v44, %v6144_v17 }
 0x59e   : > { %v2700_v58 = vpop.f32.mrf.mxu0 }
 0x59f   : > { %v2701_v52 = vadd.f32 %v6399_v53, %v2700_v58 }
 0x5a1   : > { %vm2764_vm12 = vcmp.gt.f32.partialorder %v2701_v52, 0.0  ;;  %v2796_v51 = vmul.f32 0.2, %v2701_v52 }
 0x5a2   : > { %v2538_v20 = vpop.f32.mrf.mxu3 }
 0x5a3   : > { %v2539_v24 = vadd.f32 %v6272_v45, %v2538_v20  ;;  %v2828_v29 = vsel %vm2764_vm12, %v2701_v52, %v2796_v51 }
 0x5a4   : > { %v2854_v59 = vpack.c.bf16 %v2828_v29, %v2827_v26 }
 0x5a5   : > { %v6480_v5 = vadd.f32 %v2539_v24, %v6146_v23 }
 0x5a6   : > { %v2703_v35 = vpop.f32.mrf.mxu0  ;;  %2968 = vmatmul.bf16.gmra.mxu1 %v2854_v59 }
 0x5a7   : > { %v2592_v18 = vpack.c.bf16 %v6480_v5, %v6477_v33  ;;  %v2704_v14 = vadd.f32 %v6399_v53, %v2703_v35 }
 0x5a9   : > { %2742 = vmatmul.bf16.gmra.mxu0 %v2592_v18  ;;  %v2797_v16 = vmul.f32 0.2, %v2704_v14  ;;  %vm2765_vm13 = vcmp.gt.f32.partialorder %v2704_v14, 0.0 }
 0x5aa   : > { %v2541_v30 = vpop.f32.mrf.mxu3 }
 0x5ab   : > { %v2542_v17 = vadd.f32 %v6272_v45, %v2541_v30  ;;  %v2829_v61 = vsel %vm2765_vm13, %v2704_v14, %v2797_v16  ;;  %v6500_v14 = vld [vmem:[#allocation6 + $0x4] ss:$0 sm:$0xff] }
 0x5ad   : > { %v6489_v47 = vadd.f32 %v2542_v17, %v6154_v54  ;;  %v5072_v17 = vld [vmem:[#allocation8 + $0x98] sm:$0xff] }
 0x5ae   : > { %v2705_v22 = vpop.f32.mrf.mxu0  ;;  %3481 = vmatpush.bf16.msra.mxu3 %v5072_v17 }
 0x5af   : > { %v2706_v46 = vadd.f32 %v6399_v53, %v2705_v22 }
 0x5b1   : > { %vm2766_vm14 = vcmp.gt.f32.partialorder %v2706_v46, 0.0  ;;  %v2798_v7 = vmul.f32 0.2, %v2706_v46 }
 0x5b2   : > { %v2543_v23 = vpop.f32.mrf.mxu3 }
 0x5b3   : > { %v2544_v50 = vadd.f32 %v6272_v45, %v2543_v23  ;;  %v2830_v63 = vsel %vm2766_vm14, %v2706_v46, %v2798_v7 }
 0x5b4   : > { %v2855_v0 = vpack.c.bf16 %v2830_v63, %v2829_v61 }
 0x5b5   : > { %v6492_v11 = vadd.f32 %v2544_v50, %v6156_v57 }
 0x5b6   : > { %v2708_v25 = vpop.f32.mrf.mxu0  ;;  %2973 = vmatmul.bf16.gmra.mxu1 %v2855_v0 }
 0x5b7   : > { %v2593_v8 = vpack.c.bf16 %v6492_v11, %v6489_v47  ;;  %v2709_v58 = vadd.f32 %v6399_v53, %v2708_v25 }
 0x5b9   : > { %2747 = vmatmul.bf16.gmra.mxu0 %v2593_v8  ;;  %v2799_v48 = vmul.f32 0.2, %v2709_v58  ;;  %vm2767_vm15 = vcmp.gt.f32.partialorder %v2709_v58, 0.0 }
 0x5bb   : > { %v2831_v44 = vsel %vm2767_vm15, %v2709_v58, %v2799_v48 }
 0x5be   : > { %v2710_v45 = vpop.f32.mrf.mxu0 }
 0x5bf   : > { %v2711_v52 = vadd.f32 %v6399_v53, %v2710_v45 }
 0x5c1   : > { %vm2768_vm0 = vcmp.gt.f32.partialorder %v2711_v52, 0.0  ;;  %v2800_v54 = vmul.f32 0.2, %v2711_v52 }
 0x5c3   : > { %v2832_v57 = vsel %vm2768_vm0, %v2711_v52, %v2800_v54 }
 0x5c4   : > { %v2856_v51 = vpack.c.bf16 %v2832_v57, %v2831_v44 }
 0x5c6   : > { %v2713_v27 = vpop.f32.mrf.mxu0  ;;  %2978 = vmatmul.bf16.gmra.mxu1 %v2856_v51 }
 0x5c7   : > { %v2714_v20 = vadd.f32 %v6399_v53, %v2713_v27 }
 0x5c9   : > { %v2801_v26 = vmul.f32 0.2, %v2714_v20  ;;  %vm2769_vm1 = vcmp.gt.f32.partialorder %v2714_v20, 0.0 }
 0x5cb   : > { %v2833_v18 = vsel %vm2769_vm1, %v2714_v20, %v2801_v26 }
 0x5ce   : > { %v2715_v24 = vpop.f32.mrf.mxu0 }
 0x5cf   : > { %v2716_v29 = vadd.f32 %v6399_v53, %v2715_v24 }
 0x5d1   : > { %vm2770_vm2 = vcmp.gt.f32.partialorder %v2716_v29, 0.0  ;;  %v2802_v59 = vmul.f32 0.2, %v2716_v29 }
 0x5d3   : > { %v2944_v35 = vpop.f32.mrf.mxu1  ;;  %v2834_v30 = vsel %vm2770_vm2, %v2716_v29, %v2802_v59 }
 0x5d4   : > { %v2857_v22 = vpack.c.bf16 %v2834_v30, %v2833_v18  ;;  %v2945_v46 = vadd.f32 %v6500_v14, %v2944_v35 }
 0x5d6   : > { %v2718_v16 = vpop.f32.mrf.mxu0  ;;  %2983 = vmatmul.bf16.gmra.mxu1 %v2857_v22  ;;  %v3056_v50 = vmul.f32 0.2, %v2945_v46  ;;  %vm3024_vm3 = vcmp.gt.f32.partialorder %v2945_v46, 0.0 }
 0x5d7   : > { %v2719_v7 = vadd.f32 %v6399_v53, %v2718_v16 }
 0x5d8   : > { %v3088_v56 = vsel %vm3024_vm3, %v2945_v46, %v3056_v50 }
 0x5d9   : > { %v2803_v25 = vmul.f32 0.2, %v2719_v7  ;;  %vm2771_vm5 = vcmp.gt.f32.partialorder %v2719_v7, 0.0 }
 0x5db   : > { %v2946_v23 = vpop.f32.mrf.mxu1  ;;  %v2835_v54 = vsel %vm2771_vm5, %v2719_v7, %v2803_v25  ;;  %v5071_v25 = vld [vmem:[#allocation8 + $0x90] sm:$0xff] }
 0x5dc   : > { %v2947_v61 = vadd.f32 %v6500_v14, %v2946_v23  ;;  %3482 = vmatpush.bf16.msra.mxu3 %v5071_v25 }
 0x5de   : > { %vm3025_vm4 = vcmp.gt.f32.partialorder %v2947_v61, 0.0  ;;  %v3057_v63 = vmul.f32 0.2, %v2947_v61  ;;  %v2720_v0 = vpop.f32.mrf.mxu0 }
 0x5df   : > { %v2721_v8 = vadd.f32 %v6399_v53, %v2720_v0 }
 0x5e0   : > { %v3089_v58 = vsel %vm3025_vm4, %v2947_v61, %v3057_v63 }
 0x5e1   : > { %v3120_v45 = vpack.c.bf16 %v3089_v58, %v3088_v56  ;;  %vm2772_vm6 = vcmp.gt.f32.partialorder %v2721_v8, 0.0  ;;  %v2804_v48 = vmul.f32 0.2, %v2721_v8 }
 0x5e3   : > { %v2949_v52 = vpop.f32.mrf.mxu1  ;;  %3214 = vmatmul.bf16.vlgmr.msra.gmra.mxu2 %v3120_v45  ;;  %v2836_v44 = vsel %vm2772_vm6, %v2721_v8, %v2804_v48 }
 0x5e4   : > { %v2858_v57 = vpack.c.bf16 %v2836_v44, %v2835_v54  ;;  %v2950_v27 = vadd.f32 %v6500_v14, %v2949_v52 }
 0x5e6   : > { %v2723_v51 = vpop.f32.mrf.mxu0  ;;  %2988 = vmatmul.bf16.gmra.mxu1 %v2858_v57  ;;  %v3058_v26 = vmul.f32 0.2, %v2950_v27  ;;  %vm3026_vm7 = vcmp.gt.f32.partialorder %v2950_v27, 0.0 }
 0x5e7   : > { %v2724_v20 = vadd.f32 %v6399_v53, %v2723_v51 }
 0x5e8   : > { %v3090_v22 = vsel %vm3026_vm7, %v2950_v27, %v3058_v26 }
 0x5e9   : > { %v2805_v18 = vmul.f32 0.2, %v2724_v20  ;;  %vm2773_vm9 = vcmp.gt.f32.partialorder %v2724_v20, 0.0 }
 0x5eb   : > { %v2951_v24 = vpop.f32.mrf.mxu1  ;;  %v2837_v23 = vsel %vm2773_vm9, %v2724_v20, %v2805_v18 }
 0x5ec   : > { %v2952_v29 = vadd.f32 %v6500_v14, %v2951_v24 }
 0x5ee   : > { %vm3027_vm8 = vcmp.gt.f32.partialorder %v2952_v29, 0.0  ;;  %v3059_v59 = vmul.f32 0.2, %v2952_v29  ;;  %v2725_v35 = vpop.f32.mrf.mxu0 }
 0x5ef   : > { %v2726_v30 = vadd.f32 %v6399_v53, %v2725_v35 }
 0x5f0   : > { %v3091_v16 = vsel %vm3027_vm8, %v2952_v29, %v3059_v59 }
 0x5f1   : > { %vm2774_vm10 = vcmp.gt.f32.partialorder %v2726_v30, 0.0  ;;  %v2806_v46 = vmul.f32 0.2, %v2726_v30  ;;  %v3121_v17 = vpack.c.bf16 %v3091_v16, %v3090_v22 }
 0x5f3   : > { %v2954_v7 = vpop.f32.mrf.mxu1  ;;  %3219 = vmatmul.bf16.gmra.mxu2 %v3121_v17  ;;  %v2838_v50 = vsel %vm2774_vm10, %v2726_v30, %v2806_v46 }
 0x5f4   : > { %v2859_v61 = vpack.c.bf16 %v2838_v50, %v2837_v23  ;;  %v2955_v0 = vadd.f32 %v6500_v14, %v2954_v7 }
 0x5f6   : > { %v2728_v63 = vpop.f32.mrf.mxu0  ;;  %2993 = vmatmul.bf16.gmra.mxu1 %v2859_v61  ;;  %v3060_v58 = vmul.f32 0.2, %v2955_v0  ;;  %vm3028_vm11 = vcmp.gt.f32.partialorder %v2955_v0, 0.0 }
 0x5f7   : > { %v2729_v8 = vadd.f32 %v6399_v53, %v2728_v63 }
 0x5f8   : > { %v3092_v57 = vsel %vm3028_vm11, %v2955_v0, %v3060_v58 }
 0x5f9   : > { %v2807_v54 = vmul.f32 0.2, %v2729_v8  ;;  %vm2775_vm13 = vcmp.gt.f32.partialorder %v2729_v8, 0.0 }
 0x5fb   : > { %v2956_v56 = vpop.f32.mrf.mxu1  ;;  %v2839_v26 = vsel %vm2775_vm13, %v2729_v8, %v2807_v54  ;;  %v5070_v54 = vld [vmem:[#allocation8 + $0x88] sm:$0xff] }
 0x5fc   : > { %v2957_v45 = vadd.f32 %v6500_v14, %v2956_v56  ;;  %3483 = vmatpush.bf16.msra.mxu3 %v5070_v54 }
 0x5fe   : > { %vm3029_vm12 = vcmp.gt.f32.partialorder %v2957_v45, 0.0  ;;  %v3061_v48 = vmul.f32 0.2, %v2957_v45  ;;  %v2730_v52 = vpop.f32.mrf.mxu0 }
 0x5ff   : > { %v2731_v44 = vadd.f32 %v6399_v53, %v2730_v52 }
 0x600   : > { %v3093_v51 = vsel %vm3029_vm12, %v2957_v45, %v3061_v48 }
 0x601   : > { %vm2776_vm14 = vcmp.gt.f32.partialorder %v2731_v44, 0.0  ;;  %v2808_v27 = vmul.f32 0.2, %v2731_v44  ;;  %v3122_v20 = vpack.c.bf16 %v3093_v51, %v3092_v57 }
 0x603   : > { %v2959_v24 = vpop.f32.mrf.mxu1  ;;  %3224 = vmatmul.bf16.gmra.mxu2 %v3122_v20  ;;  %v2840_v29 = vsel %vm2776_vm14, %v2731_v44, %v2808_v27 }
 0x604   : > { %v2860_v59 = vpack.c.bf16 %v2840_v29, %v2839_v26  ;;  %v2960_v18 = vadd.f32 %v6500_v14, %v2959_v24 }
 0x606   : > { %v2733_v35 = vpop.f32.mrf.mxu0  ;;  %2998 = vmatmul.bf16.gmra.mxu1 %v2860_v59  ;;  %v3062_v16 = vmul.f32 0.2, %v2960_v18  ;;  %vm3030_vm15 = vcmp.gt.f32.partialorder %v2960_v18, 0.0 }
 0x607   : > { %v2734_v30 = vadd.f32 %v6399_v53, %v2733_v35 }
 0x608   : > { %v3094_v61 = vsel %vm3030_vm15, %v2960_v18, %v3062_v16 }
 0x609   : > { %v2809_v23 = vmul.f32 0.2, %v2734_v30  ;;  %vm2777_vm1 = vcmp.gt.f32.partialorder %v2734_v30, 0.0 }
 0x60b   : > { %v2961_v22 = vpop.f32.mrf.mxu1  ;;  %v2841_v56 = vsel %vm2777_vm1, %v2734_v30, %v2809_v23 }
 0x60c   : > { %v2962_v46 = vadd.f32 %v6500_v14, %v2961_v22 }
 0x60e   : > { %vm3031_vm0 = vcmp.gt.f32.partialorder %v2962_v46, 0.0  ;;  %v3063_v17 = vmul.f32 0.2, %v2962_v46  ;;  %v2735_v7 = vpop.f32.mrf.mxu0 }
 0x60f   : > { %v2736_v50 = vadd.f32 %v6399_v53, %v2735_v7 }
 0x610   : > { %v3095_v63 = vsel %vm3031_vm0, %v2962_v46, %v3063_v17 }
 0x611   : > { %vm2778_vm2 = vcmp.gt.f32.partialorder %v2736_v50, 0.0  ;;  %v2810_v0 = vmul.f32 0.2, %v2736_v50  ;;  %v3123_v25 = vpack.c.bf16 %v3095_v63, %v3094_v61 }
 0x613   : > { %v2964_v8 = vpop.f32.mrf.mxu1  ;;  %3229 = vmatmul.bf16.gmra.mxu2 %v3123_v25  ;;  %v2842_v58 = vsel %vm2778_vm2, %v2736_v50, %v2810_v0 }
 0x614   : > { %v2861_v45 = vpack.c.bf16 %v2842_v58, %v2841_v56  ;;  %v2965_v52 = vadd.f32 %v6500_v14, %v2964_v8 }
 0x616   : > { %v2738_v48 = vpop.f32.mrf.mxu0  ;;  %3003 = vmatmul.bf16.gmra.mxu1 %v2861_v45  ;;  %v3064_v51 = vmul.f32 0.2, %v2965_v52  ;;  %vm3032_vm3 = vcmp.gt.f32.partialorder %v2965_v52, 0.0 }
 0x617   : > { %v2739_v44 = vadd.f32 %v6399_v53, %v2738_v48 }
 0x618   : > { %v3096_v59 = vsel %vm3032_vm3, %v2965_v52, %v3064_v51 }
 0x619   : > { %v2811_v26 = vmul.f32 0.2, %v2739_v44  ;;  %vm2779_vm5 = vcmp.gt.f32.partialorder %v2739_v44, 0.0 }
 0x61b   : > { %v2966_v57 = vpop.f32.mrf.mxu1  ;;  %v2843_v16 = vsel %vm2779_vm5, %v2739_v44, %v2811_v26 }
 0x61c   : > { %v2967_v27 = vadd.f32 %v6500_v14, %v2966_v57 }
 0x61e   : > { %vm3033_vm4 = vcmp.gt.f32.partialorder %v2967_v27, 0.0  ;;  %v3065_v20 = vmul.f32 0.2, %v2967_v27  ;;  %v2740_v24 = vpop.f32.mrf.mxu0 }
 0x61f   : > { %v2741_v29 = vadd.f32 %v6399_v53, %v2740_v24  ;;  %v5069_v24 = vld [vmem:[#allocation8 + $0x80] sm:$0xff] }
 0x620   : > { %v3097_v35 = vsel %vm3033_vm4, %v2967_v27, %v3065_v20  ;;  %3484 = vmatpush.bf16.msra.mxu3 %v5069_v24 }
 0x621   : > { %vm2780_vm6 = vcmp.gt.f32.partialorder %v2741_v29, 0.0  ;;  %v2812_v18 = vmul.f32 0.2, %v2741_v29  ;;  %v3124_v30 = vpack.c.bf16 %v3097_v35, %v3096_v59 }
 0x623   : > { %v2969_v22 = vpop.f32.mrf.mxu1  ;;  %3234 = vmatmul.bf16.gmra.mxu2 %v3124_v30  ;;  %v2844_v46 = vsel %vm2780_vm6, %v2741_v29, %v2812_v18 }
 0x624   : > { %v2862_v17 = vpack.c.bf16 %v2844_v46, %v2843_v16  ;;  %v2970_v23 = vadd.f32 %v6500_v14, %v2969_v22 }
 0x626   : > { %v2743_v7 = vpop.f32.mrf.mxu0  ;;  %3008 = vmatmul.bf16.gmra.mxu1 %v2862_v17  ;;  %v3066_v63 = vmul.f32 0.2, %v2970_v23  ;;  %vm3034_vm7 = vcmp.gt.f32.partialorder %v2970_v23, 0.0 }
 0x627   : > { %v2744_v50 = vadd.f32 %v6399_v53, %v2743_v7 }
 0x628   : > { %v3098_v45 = vsel %vm3034_vm7, %v2970_v23, %v3066_v63 }
 0x629   : > { %v2813_v56 = vmul.f32 0.2, %v2744_v50  ;;  %vm2781_vm9 = vcmp.gt.f32.partialorder %v2744_v50, 0.0 }
 0x62b   : > { %v2971_v61 = vpop.f32.mrf.mxu1  ;;  %v2845_v57 = vsel %vm2781_vm9, %v2744_v50, %v2813_v56 }
 0x62c   : > { %v2972_v0 = vadd.f32 %v6500_v14, %v2971_v61 }
 0x62e   : > { %vm3035_vm8 = vcmp.gt.f32.partialorder %v2972_v0, 0.0  ;;  %v3067_v25 = vmul.f32 0.2, %v2972_v0  ;;  %v2745_v8 = vpop.f32.mrf.mxu0 }
 0x62f   : > { %v2746_v58 = vadd.f32 %v6399_v53, %v2745_v8 }
 0x630   : > { %v3099_v48 = vsel %vm3035_vm8, %v2972_v0, %v3067_v25 }
 0x631   : > { %vm2782_vm10 = vcmp.gt.f32.partialorder %v2746_v58, 0.0  ;;  %v2814_v52 = vmul.f32 0.2, %v2746_v58  ;;  %v3125_v54 = vpack.c.bf16 %v3099_v48, %v3098_v45 }
 0x633   : > { %v2974_v44 = vpop.f32.mrf.mxu1  ;;  %3239 = vmatmul.bf16.gmra.mxu2 %v3125_v54  ;;  %v2846_v51 = vsel %vm2782_vm10, %v2746_v58, %v2814_v52 }
 0x634   : > { %v2863_v27 = vpack.c.bf16 %v2846_v51, %v2845_v57  ;;  %v2975_v26 = vadd.f32 %v6500_v14, %v2974_v44 }
 0x636   : > { %v2748_v20 = vpop.f32.mrf.mxu0  ;;  %3013 = vmatmul.bf16.gmra.mxu1 %v2863_v27  ;;  %v3068_v35 = vmul.f32 0.2, %v2975_v26  ;;  %vm3036_vm11 = vcmp.gt.f32.partialorder %v2975_v26, 0.0 }
 0x637   : > { %v2749_v29 = vadd.f32 %v6399_v53, %v2748_v20 }
 0x638   : > { %v3100_v17 = vsel %vm3036_vm11, %v2975_v26, %v3068_v35 }
 0x639   : > { %v2815_v16 = vmul.f32 0.2, %v2749_v29  ;;  %vm2783_vm13 = vcmp.gt.f32.partialorder %v2749_v29, 0.0 }
 0x63b   : > { %v2976_v59 = vpop.f32.mrf.mxu1  ;;  %v2847_v63 = vsel %vm2783_vm13, %v2749_v29, %v2815_v16 }
 0x63c   : > { %v2977_v18 = vadd.f32 %v6500_v14, %v2976_v59 }
 0x63e   : > { %vm3037_vm12 = vcmp.gt.f32.partialorder %v2977_v18, 0.0  ;;  %v3069_v30 = vmul.f32 0.2, %v2977_v18  ;;  %v2750_v22 = vpop.f32.mrf.mxu0 }
 0x63f   : > { %v2751_v46 = vadd.f32 %v6399_v53, %v2750_v22 }
 0x640   : > { %v3101_v7 = vsel %vm3037_vm12, %v2977_v18, %v3069_v30  ;;  %v6534_v30 = vld [vmem:[#allocation6 + $0x5] ss:$0 sm:$0xff] }
 0x641   : > { %vm2784_vm14 = vcmp.gt.f32.partialorder %v2751_v46, 0.0  ;;  %v2816_v23 = vmul.f32 0.2, %v2751_v46  ;;  %v3126_v50 = vpack.c.bf16 %v3101_v7, %v3100_v17 }
 0x643   : > { %v2979_v61 = vpop.f32.mrf.mxu1  ;;  %3244 = vmatmul.bf16.gmra.mxu2 %v3126_v50  ;;  %v2848_v0 = vsel %vm2784_vm14, %v2751_v46, %v2816_v23 }
 0x644   : > { %v2864_v25 = vpack.c.bf16 %v2848_v0, %v2847_v63  ;;  %v2980_v8 = vadd.f32 %v6500_v14, %v2979_v61 }
 0x646   : > { %3018 = vmatmul.bf16.gmra.mxu1 %v2864_v25  ;;  %v3070_v58 = vmul.f32 0.2, %v2980_v8  ;;  %vm3038_vm15 = vcmp.gt.f32.partialorder %v2980_v8, 0.0 }
 0x648   : > { %v3102_v48 = vsel %vm3038_vm15, %v2980_v8, %v3070_v58 }
 0x64b   : > { %v2981_v56 = vpop.f32.mrf.mxu1 }
 0x64c   : > { %v2982_v45 = vadd.f32 %v6500_v14, %v2981_v56 }
 0x64e   : > { %vm3039_vm0 = vcmp.gt.f32.partialorder %v2982_v45, 0.0  ;;  %v3071_v53 = vmul.f32 0.2, %v2982_v45 }
 0x650   : > { %v3103_v52 = vsel %vm3039_vm0, %v2982_v45, %v3071_v53 }
 0x651   : > { %v3127_v54 = vpack.c.bf16 %v3103_v52, %v3102_v48 }
 0x653   : > { %v2984_v44 = vpop.f32.mrf.mxu1  ;;  %3249 = vmatmul.bf16.gmra.mxu2 %v3127_v54 }
 0x654   : > { %v2985_v57 = vadd.f32 %v6500_v14, %v2984_v44 }
 0x656   : > { %v3072_v27 = vmul.f32 0.2, %v2985_v57  ;;  %vm3040_vm1 = vcmp.gt.f32.partialorder %v2985_v57, 0.0 }
 0x658   : > { %v3104_v26 = vsel %vm3040_vm1, %v2985_v57, %v3072_v27 }
 0x65b   : > { %v2986_v51 = vpop.f32.mrf.mxu1 }
 0x65c   : > { %v2987_v20 = vadd.f32 %v6500_v14, %v2986_v51 }
 0x65e   : > { %vm3041_vm2 = vcmp.gt.f32.partialorder %v2987_v20, 0.0  ;;  %v3073_v24 = vmul.f32 0.2, %v2987_v20 }
 0x660   : > { %v3105_v29 = vsel %vm3041_vm2, %v2987_v20, %v3073_v24 }
 0x661   : > { %v3128_v59 = vpack.c.bf16 %v3105_v29, %v3104_v26 }
 0x663   : > { %v2989_v35 = vpop.f32.mrf.mxu1  ;;  %3254 = vmatmul.bf16.gmra.mxu2 %v3128_v59 }
 0x664   : > { %v2990_v22 = vadd.f32 %v6500_v14, %v2989_v35 }
 0x666   : > { %v3215_v18 = vpop.f32.mrf.mxu2  ;;  %v3074_v17 = vmul.f32 0.2, %v2990_v22  ;;  %vm3042_vm3 = vcmp.gt.f32.partialorder %v2990_v22, 0.0 }
 0x667   : > { %v3216_v16 = vadd.f32 %v6534_v30, %v3215_v18 }
 0x668   : > { %v3106_v0 = vsel %vm3042_vm3, %v2990_v22, %v3074_v17 }
 0x669   : > { %v3327_v61 = vmul.f32 0.2, %v3216_v16  ;;  %vm3295_vm5 = vcmp.gt.f32.partialorder %v3216_v16, 0.0 }
 0x66b   : > { %v2991_v46 = vpop.f32.mrf.mxu1  ;;  %v3359_v58 = vsel %vm3295_vm5, %v3216_v16, %v3327_v61 }
 0x66c   : > { %v2992_v7 = vadd.f32 %v6500_v14, %v2991_v46 }
 0x66e   : > { %vm3043_vm4 = vcmp.gt.f32.partialorder %v2992_v7, 0.0  ;;  %v3075_v23 = vmul.f32 0.2, %v2992_v7  ;;  %v3217_v50 = vpop.f32.mrf.mxu2 }
 0x66f   : > { %v3218_v63 = vadd.f32 %v6534_v30, %v3217_v50 }
 0x670   : > { %v3107_v25 = vsel %vm3043_vm4, %v2992_v7, %v3075_v23 }
 0x671   : > { %vm3296_vm6 = vcmp.gt.f32.partialorder %v3218_v63, 0.0  ;;  %v3328_v8 = vmul.f32 0.2, %v3218_v63  ;;  %v3129_v56 = vpack.c.bf16 %v3107_v25, %v3106_v0 }
 0x673   : > { %v3360_v45 = vsel %vm3296_vm6, %v3218_v63, %v3328_v8  ;;  %v2994_v53 = vpop.f32.mrf.mxu1  ;;  %3259 = vmatmul.bf16.gmra.mxu2 %v3129_v56 }
 0x674   : > { %v3391_v48 = vpack.c.bf16 %v3360_v45, %v3359_v58  ;;  %v2995_v54 = vadd.f32 %v6500_v14, %v2994_v53 }
 0x676   : > { %v3220_v52 = vpop.f32.mrf.mxu2  ;;  %3485 = vmatmul.bf16.vlgmr.msra.gmra.mxu3 %v3391_v48  ;;  %v3076_v51 = vmul.f32 0.2, %v2995_v54  ;;  %vm3044_vm7 = vcmp.gt.f32.partialorder %v2995_v54, 0.0 }
 0x677   : > { %v3221_v44 = vadd.f32 %v6534_v30, %v3220_v52 }
 0x678   : > { %v3108_v59 = vsel %vm3044_vm7, %v2995_v54, %v3076_v51 }
 0x679   : > { %v3329_v26 = vmul.f32 0.2, %v3221_v44  ;;  %vm3297_vm9 = vcmp.gt.f32.partialorder %v3221_v44, 0.0 }
 0x67b   : > { %v2996_v57 = vpop.f32.mrf.mxu1  ;;  %v3361_v46 = vsel %vm3297_vm9, %v3221_v44, %v3329_v26 }
 0x67c   : > { %v2997_v27 = vadd.f32 %v6500_v14, %v2996_v57 }
 0x67e   : > { %vm3045_vm8 = vcmp.gt.f32.partialorder %v2997_v27, 0.0  ;;  %v3077_v20 = vmul.f32 0.2, %v2997_v27  ;;  %v3222_v24 = vpop.f32.mrf.mxu2 }
 0x67f   : > { %v3223_v29 = vadd.f32 %v6534_v30, %v3222_v24 }
 0x680   : > { %v3109_v35 = vsel %vm3045_vm8, %v2997_v27, %v3077_v20 }
 0x681   : > { %vm3298_vm10 = vcmp.gt.f32.partialorder %v3223_v29, 0.0  ;;  %v3330_v18 = vmul.f32 0.2, %v3223_v29  ;;  %v3130_v22 = vpack.c.bf16 %v3109_v35, %v3108_v59 }
 0x683   : > { %v2999_v16 = vpop.f32.mrf.mxu1  ;;  %3264 = vmatmul.bf16.gmra.mxu2 %v3130_v22  ;;  %v3362_v17 = vsel %vm3298_vm10, %v3223_v29, %v3330_v18 }
 0x684   : > { %v3392_v7 = vpack.c.bf16 %v3362_v17, %v3361_v46  ;;  %v3000_v50 = vadd.f32 %v6500_v14, %v2999_v16 }
 0x686   : > { %v3225_v23 = vpop.f32.mrf.mxu2  ;;  %3490 = vmatmul.bf16.gmra.mxu3 %v3392_v7  ;;  %v3078_v0 = vmul.f32 0.2, %v3000_v50  ;;  %vm3046_vm11 = vcmp.gt.f32.partialorder %v3000_v50, 0.0 }
 0x687   : > { %v3226_v61 = vadd.f32 %v6534_v30, %v3225_v23 }
 0x688   : > { %v3110_v53 = vsel %vm3046_vm11, %v3000_v50, %v3078_v0 }
 0x689   : > { %v3331_v58 = vmul.f32 0.2, %v3226_v61  ;;  %vm3299_vm13 = vcmp.gt.f32.partialorder %v3226_v61, 0.0 }
 0x68b   : > { %v3001_v63 = vpop.f32.mrf.mxu1  ;;  %v3363_v57 = vsel %vm3299_vm13, %v3226_v61, %v3331_v58 }
 0x68c   : > { %v3002_v25 = vadd.f32 %v6500_v14, %v3001_v63 }
 0x68e   : > { %vm3047_vm12 = vcmp.gt.f32.partialorder %v3002_v25, 0.0  ;;  %v3079_v8 = vmul.f32 0.2, %v3002_v25  ;;  %v3227_v56 = vpop.f32.mrf.mxu2 }
 0x68f   : > { %v3228_v45 = vadd.f32 %v6534_v30, %v3227_v56 }
 0x690   : > { %v3111_v48 = vsel %vm3047_vm12, %v3002_v25, %v3079_v8 }
 0x691   : > { %vm3300_vm14 = vcmp.gt.f32.partialorder %v3228_v45, 0.0  ;;  %v3332_v52 = vmul.f32 0.2, %v3228_v45  ;;  %v3131_v54 = vpack.c.bf16 %v3111_v48, %v3110_v53 }
 0x693   : > { %v3004_v44 = vpop.f32.mrf.mxu1  ;;  %3269 = vmatmul.bf16.gmra.mxu2 %v3131_v54  ;;  %v3364_v51 = vsel %vm3300_vm14, %v3228_v45, %v3332_v52 }
 0x694   : > { %v3393_v27 = vpack.c.bf16 %v3364_v51, %v3363_v57  ;;  %v3005_v24 = vadd.f32 %v6500_v14, %v3004_v44 }
 0x696   : > { %v3230_v20 = vpop.f32.mrf.mxu2  ;;  %3495 = vmatmul.bf16.gmra.mxu3 %v3393_v27  ;;  %v3080_v59 = vmul.f32 0.2, %v3005_v24  ;;  %vm3048_vm15 = vcmp.gt.f32.partialorder %v3005_v24, 0.0 }
 0x697   : > { %v3231_v26 = vadd.f32 %v6534_v30, %v3230_v20 }
 0x698   : > { %v3112_v17 = vsel %vm3048_vm15, %v3005_v24, %v3080_v59 }
 0x699   : > { %v3333_v16 = vmul.f32 0.2, %v3231_v26  ;;  %vm3301_vm1 = vcmp.gt.f32.partialorder %v3231_v26, 0.0 }
 0x69b   : > { %v3006_v29 = vpop.f32.mrf.mxu1  ;;  %v3365_v63 = vsel %vm3301_vm1, %v3231_v26, %v3333_v16 }
 0x69c   : > { %v3007_v35 = vadd.f32 %v6500_v14, %v3006_v29 }
 0x69e   : > { %vm3049_vm0 = vcmp.gt.f32.partialorder %v3007_v35, 0.0  ;;  %v3081_v18 = vmul.f32 0.2, %v3007_v35  ;;  %v3232_v22 = vpop.f32.mrf.mxu2 }
 0x69f   : > { %v3233_v46 = vadd.f32 %v6534_v30, %v3232_v22 }
 0x6a0   : > { %v3113_v7 = vsel %vm3049_vm0, %v3007_v35, %v3081_v18 }
 0x6a1   : > { %vm3302_vm2 = vcmp.gt.f32.partialorder %v3233_v46, 0.0  ;;  %v3334_v23 = vmul.f32 0.2, %v3233_v46  ;;  %v3132_v50 = vpack.c.bf16 %v3113_v7, %v3112_v17 }
 0x6a3   : > { %v3009_v61 = vpop.f32.mrf.mxu1  ;;  %3274 = vmatmul.bf16.gmra.mxu2 %v3132_v50  ;;  %v3366_v0 = vsel %vm3302_vm2, %v3233_v46, %v3334_v23 }
 0x6a4   : > { %v3394_v25 = vpack.c.bf16 %v3366_v0, %v3365_v63  ;;  %v3010_v56 = vadd.f32 %v6500_v14, %v3009_v61 }
 0x6a6   : > { %v3235_v8 = vpop.f32.mrf.mxu2  ;;  %3500 = vmatmul.bf16.gmra.mxu3 %v3394_v25  ;;  %v3082_v53 = vmul.f32 0.2, %v3010_v56  ;;  %vm3050_vm3 = vcmp.gt.f32.partialorder %v3010_v56, 0.0 }
 0x6a7   : > { %v3236_v58 = vadd.f32 %v6534_v30, %v3235_v8 }
 0x6a8   : > { %v3114_v51 = vsel %vm3050_vm3, %v3010_v56, %v3082_v53 }
 0x6a9   : > { %v3335_v44 = vmul.f32 0.2, %v3236_v58  ;;  %vm3303_vm5 = vcmp.gt.f32.partialorder %v3236_v58, 0.0 }
 0x6ab   : > { %v3011_v45 = vpop.f32.mrf.mxu1  ;;  %v3367_v29 = vsel %vm3303_vm5, %v3236_v58, %v3335_v44 }
 0x6ac   : > { %v3012_v48 = vadd.f32 %v6500_v14, %v3011_v45 }
 0x6ae   : > { %vm3051_vm4 = vcmp.gt.f32.partialorder %v3012_v48, 0.0  ;;  %v3083_v52 = vmul.f32 0.2, %v3012_v48  ;;  %v3237_v54 = vpop.f32.mrf.mxu2 }
 0x6af   : > { %v3238_v57 = vadd.f32 %v6534_v30, %v3237_v54 }
 0x6b0   : > { %v3115_v27 = vsel %vm3051_vm4, %v3012_v48, %v3083_v52 }
 0x6b1   : > { %vm3304_vm6 = vcmp.gt.f32.partialorder %v3238_v57, 0.0  ;;  %v3336_v20 = vmul.f32 0.2, %v3238_v57  ;;  %v3133_v24 = vpack.c.bf16 %v3115_v27, %v3114_v51 }
 0x6b3   : > { %v3014_v26 = vpop.f32.mrf.mxu1  ;;  %3279 = vmatmul.bf16.gmra.mxu2 %v3133_v24  ;;  %v3368_v59 = vsel %vm3304_vm6, %v3238_v57, %v3336_v20 }
 0x6b4   : > { %v3395_v35 = vpack.c.bf16 %v3368_v59, %v3367_v29  ;;  %v3015_v22 = vadd.f32 %v6500_v14, %v3014_v26 }
 0x6b6   : > { %v3240_v18 = vpop.f32.mrf.mxu2  ;;  %3505 = vmatmul.bf16.gmra.mxu3 %v3395_v35  ;;  %v3084_v17 = vmul.f32 0.2, %v3015_v22  ;;  %vm3052_vm7 = vcmp.gt.f32.partialorder %v3015_v22, 0.0 }
 0x6b7   : > { %v3241_v16 = vadd.f32 %v6534_v30, %v3240_v18 }
 0x6b8   : > { %v3116_v0 = vsel %vm3052_vm7, %v3015_v22, %v3084_v17 }
 0x6b9   : > { %v3337_v61 = vmul.f32 0.2, %v3241_v16  ;;  %vm3305_vm9 = vcmp.gt.f32.partialorder %v3241_v16, 0.0 }
 0x6bb   : > { %v3016_v46 = vpop.f32.mrf.mxu1  ;;  %v3369_v45 = vsel %vm3305_vm9, %v3241_v16, %v3337_v61 }
 0x6bc   : > { %v3017_v7 = vadd.f32 %v6500_v14, %v3016_v46 }
 0x6be   : > { %vm3053_vm8 = vcmp.gt.f32.partialorder %v3017_v7, 0.0  ;;  %v3085_v23 = vmul.f32 0.2, %v3017_v7  ;;  %v3242_v50 = vpop.f32.mrf.mxu2 }
 0x6bf   : > { %v3243_v63 = vadd.f32 %v6534_v30, %v3242_v50 }
 0x6c0   : > { %v3117_v25 = vsel %vm3053_vm8, %v3017_v7, %v3085_v23 }
 0x6c1   : > { %vm3306_vm10 = vcmp.gt.f32.partialorder %v3243_v63, 0.0  ;;  %v3338_v8 = vmul.f32 0.2, %v3243_v63  ;;  %v3134_v56 = vpack.c.bf16 %v3117_v25, %v3116_v0 }
 0x6c3   : > { %v3019_v58 = vpop.f32.mrf.mxu1  ;;  %3284 = vmatmul.bf16.gmra.mxu2 %v3134_v56  ;;  %v3370_v53 = vsel %vm3306_vm10, %v3243_v63, %v3338_v8 }
 0x6c4   : > { %v3396_v48 = vpack.c.bf16 %v3370_v53, %v3369_v45  ;;  %v3020_v54 = vadd.f32 %v6500_v14, %v3019_v58 }
 0x6c6   : > { %v3245_v52 = vpop.f32.mrf.mxu2  ;;  %3510 = vmatmul.bf16.gmra.mxu3 %v3396_v48  ;;  %v3086_v51 = vmul.f32 0.2, %v3020_v54  ;;  %vm3054_vm11 = vcmp.gt.f32.partialorder %v3020_v54, 0.0 }
 0x6c7   : > { %v3246_v44 = vadd.f32 %v6534_v30, %v3245_v52 }
 0x6c8   : > { %v3118_v59 = vsel %vm3054_vm11, %v3020_v54, %v3086_v51 }
 0x6c9   : > { %v3339_v26 = vmul.f32 0.2, %v3246_v44  ;;  %vm3307_vm13 = vcmp.gt.f32.partialorder %v3246_v44, 0.0 }
 0x6cb   : > { %v3021_v57 = vpop.f32.mrf.mxu1  ;;  %v3371_v16 = vsel %vm3307_vm13, %v3246_v44, %v3339_v26  ;;  %v6577_v26 = vld [vmem:[%s7162_s7] ss:$0 sm:$0xff] }
 0x6cc   : > { %v3022_v27 = vadd.f32 %v6500_v14, %v3021_v57 }
 0x6ce   : > { %vm3055_vm12 = vcmp.gt.f32.partialorder %v3022_v27, 0.0  ;;  %v3087_v20 = vmul.f32 0.2, %v3022_v27  ;;  %v3247_v24 = vpop.f32.mrf.mxu2 }
 0x6cf   : > { %v3248_v29 = vadd.f32 %v6534_v30, %v3247_v24 }
 0x6d0   : > { %v3119_v35 = vsel %vm3055_vm12, %v3022_v27, %v3087_v20  ;;  %v6568_v27 = vld [vmem:[#allocation9 + $0x2] ss:$0 sm:$0xff] }
 0x6d1   : > { %vm3308_vm14 = vcmp.gt.f32.partialorder %v3248_v29, 0.0  ;;  %v3340_v18 = vmul.f32 0.2, %v3248_v29  ;;  %v3135_v22 = vpack.c.bf16 %v3119_v35, %v3118_v59 }
 0x6d3   : > { %3289 = vmatmul.bf16.gmra.mxu2 %v3135_v22  ;;  %v3372_v46 = vsel %vm3308_vm14, %v3248_v29, %v3340_v18 }
 0x6d4   : > { %v3397_v17 = vpack.c.bf16 %v3372_v46, %v3371_v16 }
 0x6d6   : > { %v3250_v7 = vpop.f32.mrf.mxu2  ;;  %3515 = vmatmul.bf16.gmra.mxu3 %v3397_v17 }
 0x6d7   : > { %v3251_v14 = vadd.f32 %v6534_v30, %v3250_v7 }
 0x6d9   : > { %v3341_v50 = vmul.f32 0.2, %v3251_v14  ;;  %vm3309_vm15 = vcmp.gt.f32.partialorder %v3251_v14, 0.0 }
 0x6db   : > { %v3373_v0 = vsel %vm3309_vm15, %v3251_v14, %v3341_v50 }
 0x6de   : > { %v3252_v23 = vpop.f32.mrf.mxu2 }
 0x6df   : > { %v3253_v61 = vadd.f32 %v6534_v30, %v3252_v23 }
 0x6e1   : > { %vm3310_vm0 = vcmp.gt.f32.partialorder %v3253_v61, 0.0  ;;  %v3342_v63 = vmul.f32 0.2, %v3253_v61 }
 0x6e3   : > { %v3374_v25 = vsel %vm3310_vm0, %v3253_v61, %v3342_v63 }
 0x6e4   : > { %v3398_v8 = vpack.c.bf16 %v3374_v25, %v3373_v0 }
 0x6e6   : > { %v3255_v56 = vpop.f32.mrf.mxu2  ;;  %3520 = vmatmul.bf16.gmra.mxu3 %v3398_v8 }
 0x6e7   : > { %v3256_v58 = vadd.f32 %v6534_v30, %v3255_v56 }
 0x6e9   : > { %v3343_v53 = vmul.f32 0.2, %v3256_v58  ;;  %vm3311_vm1 = vcmp.gt.f32.partialorder %v3256_v58, 0.0 }
 0x6eb   : > { %v3375_v54 = vsel %vm3311_vm1, %v3256_v58, %v3343_v53 }
 0x6ee   : > { %v3257_v45 = vpop.f32.mrf.mxu2 }
 0x6ef   : > { %v3258_v48 = vadd.f32 %v6534_v30, %v3257_v45 }
 0x6f1   : > { %vm3312_vm2 = vcmp.gt.f32.partialorder %v3258_v48, 0.0  ;;  %v3344_v52 = vmul.f32 0.2, %v3258_v48 }
 0x6f3   : > { %v3376_v44 = vsel %vm3312_vm2, %v3258_v48, %v3344_v52 }
 0x6f4   : > { %v3399_v57 = vpack.c.bf16 %v3376_v44, %v3375_v54 }
 0x6f6   : > { %v3260_v51 = vpop.f32.mrf.mxu2  ;;  %3525 = vmatmul.bf16.gmra.mxu3 %v3399_v57 }
 0x6f7   : > { %v3261_v29 = vadd.f32 %v6534_v30, %v3260_v51 }
 0x6f9   : > { %v3486_v20 = vpop.f32.mrf.mxu3  ;;  %v3345_v22 = vmul.f32 0.2, %v3261_v29  ;;  %vm3313_vm3 = vcmp.gt.f32.partialorder %v3261_v29, 0.0 }
 0x6fa   : > { %v3487_v24 = vadd.f32 %v6568_v27, %v3486_v20 }
 0x6fb   : > { %v3377_v23 = vsel %vm3313_vm3, %v3261_v29, %v3345_v22 }
 0x6fc   : > { %v3566_v59 = vadd.f32 %v3487_v24, %v6278_v2 }
 0x6fe   : > { %v6582_v35 = vmul.f32 %v6577_v26, %v3566_v59  ;;  %v3262_v18 = vpop.f32.mrf.mxu2 }
 0x6ff   : > { %v3263_v16 = vadd.f32 %v6534_v30, %v3262_v18 }
 0x700   : > { %3634 = vst [vmem:[%s6585_s17] sm:$0xff] %v6582_v35  ;;  %v3666_v46 = vand.u32 2147483647, %v6582_v35 }
 0x701   : > { %vm3314_vm4 = vcmp.gt.f32.partialorder %v3263_v16, 0.0  ;;  %v3346_v17 = vmul.f32 0.2, %v3263_v16  ;;  %v3488_v7 = vpop.f32.mrf.mxu3 }
 0x702   : > { %v3489_v2 = vadd.f32 %v6568_v27, %v3488_v7  ;;  %v3698_v14 = vsub.f32 0.0, %v3666_v46 }
 0x703   : > { %v3378_v50 = vsel %vm3314_vm4, %v3263_v16, %v3346_v17  ;;  %v4146_v16 = vlaneseq }
 0x704   : > { %v3567_v61 = vadd.f32 %v3489_v2, %v6281_v60  ;;  %v3400_v63 = vpack.c.bf16 %v3378_v50, %v3377_v23  ;;  %v3730_v0 = vmul.f32 1.442695, %v3698_v14 }
 0x706   : > { %v6595_v25 = vmul.f32 %v6577_v26, %v3567_v61  ;;  %v3265_v8 = vpop.f32.mrf.mxu2  ;;  %3530 = vmatmul.bf16.gmra.mxu3 %v3400_v63  ;;  %5178 = vpow2.f32 %v3730_v0 }
 0x707   : > { %v3266_v60 = vadd.f32 %v6534_v30, %v3265_v8 }
 0x708   : > { %3635 = vst [vmem:[%s6585_s17 + $0x8] sm:$0xff] %v6595_v25  ;;  %v3667_v56 = vand.u32 2147483647, %v6595_v25 }
 0x709   : > { %v3491_v58 = vpop.f32.mrf.mxu3  ;;  %v3347_v24 = vmul.f32 0.2, %v3266_v60  ;;  %vm3315_vm5 = vcmp.gt.f32.partialorder %v3266_v60, 0.0 }
 0x70a   : > { %v3492_v45 = vadd.f32 %v6568_v27, %v3491_v58  ;;  %v3699_v53 = vsub.f32 0.0, %v3667_v56 }
 0x70b   : > { %v3379_v2 = vsel %vm3315_vm5, %v3266_v60, %v3347_v24 }
 0x70c   : > { %v5179_v48 = vpop.eup %5178  ;;  %v3568_v52 = vadd.f32 %v3492_v45, %v6293_v37  ;;  %v3732_v54 = vmul.f32 1.442695, %v3699_v53  ;;  %v6616_v45 = vand.u32 127, %v4146_v16 }
 0x70d   : > { %v3794_v44 = vadd.f32 1.0, %v5179_v48  ;;  %v3797_v57 = vmul.f32 -0.5, %v5179_v48  ;;  %v3800_v23 = vand.u32 2147483647, %v5179_v48 }
 0x70e   : > { %v6606_v51 = vmul.f32 %v6577_v26, %v3568_v52  ;;  %v3267_v20 = vpop.f32.mrf.mxu2  ;;  %5180 = vpow2.f32 %v3732_v54  ;;  %vm4148_vm8 = vcmp.lt.s32.totalorder %v6616_v45, 16 }
 0x70f   : > { %v3268_v29 = vadd.f32 %v6534_v30, %v3267_v20  ;;  %5182 = vlog2.f32 %v3794_v44  ;;  %v3798_v22 = vadd.f32 1.0, %v3797_v57  ;;  %vm3801_vm7 = vcmp.lt.f32.partialorder %v3800_v23, 0.0004427343 }
 0x710   : > { %3636 = vst [vmem:[%s6585_s17 + $0x10] sm:$0xff] %v6606_v51  ;;  %v3668_v59 = vand.u32 2147483647, %v6606_v51 }
 0x711   : > { %vm3316_vm6 = vcmp.gt.f32.partialorder %v3268_v29, 0.0  ;;  %v3348_v18 = vmul.f32 0.2, %v3268_v29  ;;  %v3493_v37 = vpop.f32.mrf.mxu3  ;;  %v3799_v58 = vmul.f32 %v5179_v48, %v3798_v22 }
 0x712   : > { %v3494_v17 = vadd.f32 %v6568_v27, %v3493_v37  ;;  %v3700_v7 = vsub.f32 0.0, %v3668_v59 }
 0x713   : > { %v3380_v14 = vsel %vm3316_vm6, %v3268_v29, %v3348_v18 }
 0x714   : > { %v5181_v50 = vpop.eup %5180  ;;  %v3569_v61 = vadd.f32 %v3494_v17, %v6296_v38  ;;  %v3401_v63 = vpack.c.bf16 %v3380_v14, %v3379_v2  ;;  %v3734_v0 = vmul.f32 1.442695, %v3700_v7 }
 0x715   : > { %v5183_v8 = vpop.eup %5182  ;;  %v3803_v53 = vadd.f32 1.0, %v5181_v50  ;;  %v3806_v60 = vmul.f32 -0.5, %v5181_v50  ;;  %v3809_v16 = vand.u32 2147483647, %v5181_v50 }
 0x716   : > { %v6619_v52 = vmul.f32 %v6577_v26, %v3569_v61  ;;  %v3270_v54 = vpop.f32.mrf.mxu2  ;;  %3535 = vmatmul.bf16.gmra.mxu3 %v3401_v63  ;;  %v3796_v44 = vmul.f32 0.6931472, %v5183_v8  ;;  %5184 = vpow2.f32 %v3734_v0 }
 0x717   : > { %5186 = vlog2.f32 %v3803_v53  ;;  %v3807_v29 = vadd.f32 1.0, %v3806_v60  ;;  %v3271_v37 = vadd.f32 %v6534_v30, %v3270_v54  ;;  %vm3810_vm9 = vcmp.lt.f32.partialorder %v3809_v16, 0.0004427343 }
 0x718   : > { %3637 = vst [vmem:[%s6585_s17 + $0x18] sm:$0xff] %v6619_v52  ;;  %v3802_v38 = vsel %vm3801_vm7, %v3799_v58, %v3796_v44  ;;  %v3669_v57 = vand.u32 2147483647, %v6619_v52 }
 0x719   : > { %v3496_v20 = vpop.f32.mrf.mxu3  ;;  %v4082_v48 = vmul.f32 2.0, %v3802_v38  ;;  %v3808_v35 = vmul.f32 %v5181_v50, %v3807_v29  ;;  %vm3317_vm10 = vcmp.gt.f32.partialorder %v3271_v37, 0.0 }
 0x71a   : > { %v3497_v24 = vadd.f32 %v6568_v27, %v3496_v20  ;;  %v3701_v18 = vsub.f32 0.0, %v3669_v57 }
 0x71b   : > { %v4114_v22 = vadd.f32 %v4082_v48, %v3666_v46  ;;  %v3349_v46 = vmul.f32 0.2, %v3271_v37 }
 0x71c   : > { %v5185_v17 = vpop.eup %5184  ;;  %v3570_v7 = vadd.f32 %v3497_v24, %v6308_v4  ;;  %v3736_v2 = vmul.f32 1.442695, %v3701_v18 }
 0x71d   : > { %v5187_v14 = vpop.eup %5186  ;;  %v4149_v23 = vsel %vm4148_vm8, %v4114_v22, 0.0  ;;  %v3812_v61 = vadd.f32 1.0, %v5185_v17  ;;  %v3815_v63 = vmul.f32 -0.5, %v5185_v17  ;;  %v3381_v24 = vsel %vm3317_vm10, %v3271_v37, %v3349_v46 }
 0x71e   : > { %v6635_v0 = vmul.f32 %v6577_v26, %v3570_v7  ;;  %v3272_v8 = vpop.f32.mrf.mxu2  ;;  %4181 = vadd.xlane.f32.xlu0 %v4149_v23  ;;  %v3805_v58 = vmul.f32 0.6931472, %v5187_v14  ;;  %5188 = vpow2.f32 %v3736_v2  ;;  %v3818_v22 = vand.u32 2147483647, %v5185_v17 }
 0x71f   : > { %v3273_v53 = vadd.f32 %v6534_v30, %v3272_v8  ;;  %5190 = vlog2.f32 %v3812_v61  ;;  %v3816_v20 = vadd.f32 1.0, %v3815_v63 }
 0x720   : > { %3638 = vst [vmem:[%s6585_s17 + $0x20] sm:$0xff] %v6635_v0  ;;  %v3811_v4 = vsel %vm3810_vm9, %v3808_v35, %v3805_v58  ;;  %v3670_v54 = vand.u32 2147483647, %v6635_v0  ;;  %vm3819_vm12 = vcmp.lt.f32.partialorder %v3818_v22, 0.0004427343 }
 0x721   : > { %vm3318_vm11 = vcmp.gt.f32.partialorder %v3273_v53, 0.0  ;;  %v3350_v44 = vmul.f32 0.2, %v3273_v53  ;;  %v3498_v60 = vpop.f32.mrf.mxu3  ;;  %v4083_v38 = vmul.f32 2.0, %v3811_v4  ;;  %v3817_v63 = vmul.f32 %v5185_v17, %v3816_v20 }
 0x722   : > { %v3499_v48 = vadd.f32 %v6568_v27, %v3498_v60  ;;  %v3702_v50 = vsub.f32 0.0, %v3670_v54 }
 0x723   : > { %v3382_v29 = vsel %vm3318_vm11, %v3273_v53, %v3350_v44  ;;  %v4115_v18 = vadd.f32 %v4083_v38, %v3667_v56 }
 0x724   : > { %v5189_v16 = vpop.eup %5188  ;;  %v3571_v7 = vadd.f32 %v3499_v48, %v6311_v6  ;;  %v3402_v2 = vpack.c.bf16 %v3382_v29, %v3381_v24  ;;  %v3738_v14 = vmul.f32 1.442695, %v3702_v50 }
 0x725   : > { %v5191_v23 = vpop.eup %5190  ;;  %v4150_v61 = vsel %vm4148_vm8, %v4115_v18, 0.0  ;;  %v3821_v8 = vadd.f32 1.0, %v5189_v16  ;;  %v3824_v56 = vmul.f32 -0.5, %v5189_v16  ;;  %v3827_v20 = vand.u32 2147483647, %v5189_v16 }
 0x726   : > { %v6650_v58 = vmul.f32 %v6577_v26, %v3571_v7  ;;  %v3275_v37 = vpop.f32.mrf.mxu2  ;;  %3540 = vmatmul.bf16.gmra.mxu3 %v3402_v2  ;;  %4183 = vadd.xlane.f32.xlu0 %v4150_v61  ;;  %v3814_v25 = vmul.f32 0.6931472, %v5191_v23  ;;  %5192 = vpow2.f32 %v3738_v14 }
 0x727   : > { %5194 = vlog2.f32 %v3821_v8  ;;  %v3825_v4 = vadd.f32 1.0, %v3824_v56  ;;  %v3276_v60 = vadd.f32 %v6534_v30, %v3275_v37  ;;  %vm3828_vm13 = vcmp.lt.f32.partialorder %v3827_v20, 0.0004427343 }
 0x728   : > { %3639 = vst [vmem:[%s6585_s17 + $0x28] sm:$0xff] %v6650_v58  ;;  %v3820_v6 = vsel %vm3819_vm12, %v3817_v63, %v3814_v25  ;;  %v3671_v35 = vand.u32 2147483647, %v6650_v58 }
 0x729   : > { %v3501_v46 = vpop.f32.mrf.mxu3  ;;  %v4084_v53 = vmul.f32 2.0, %v3820_v6  ;;  %v3826_v51 = vmul.f32 %v5189_v16, %v3825_v4  ;;  %vm3319_vm14 = vcmp.gt.f32.partialorder %v3276_v60, 0.0 }
 0x72a   : > { %v3502_v17 = vadd.f32 %v6568_v27, %v3501_v46  ;;  %v3703_v44 = vsub.f32 0.0, %v3671_v35 }
 0x72b   : > { %v4116_v38 = vadd.f32 %v4084_v53, %v3668_v59  ;;  %v3351_v59 = vmul.f32 0.2, %v3276_v60 }
 0x72c   : > { %v5193_v48 = vpop.eup %5192  ;;  %v3572_v50 = vadd.f32 %v3502_v17, %v6323_v39  ;;  %v3740_v24 = vmul.f32 1.442695, %v3703_v44 }
 0x72d   : > { %v5195_v29 = vpop.eup %5194  ;;  %v4151_v18 = vsel %vm4148_vm8, %v4116_v38, 0.0  ;;  %v3830_v22 = vadd.f32 1.0, %v5193_v48  ;;  %v3833_v7 = vmul.f32 -0.5, %v5193_v48  ;;  %v3383_v46 = vsel %vm3319_vm14, %v3276_v60, %v3351_v59 }
 0x72e   : > { %v6665_v2 = vmul.f32 %v6577_v26, %v3572_v50  ;;  %v3277_v14 = vpop.f32.mrf.mxu2  ;;  %4185 = vadd.xlane.f32.xlu1 %v4151_v18  ;;  %v3823_v23 = vmul.f32 0.6931472, %v5195_v29  ;;  %5196 = vpow2.f32 %v3740_v24  ;;  %v3836_v4 = vand.u32 2147483647, %v5193_v48 }
 0x72f   : > { %v3278_v61 = vadd.f32 %v6534_v30, %v3277_v14  ;;  %5198 = vlog2.f32 %v3830_v22  ;;  %v3834_v56 = vadd.f32 1.0, %v3833_v7 }
 0x730   : > { %3640 = vst [vmem:[%s6585_s17 + $0x30] sm:$0xff] %v6665_v2  ;;  %v3829_v39 = vsel %vm3828_vm13, %v3826_v51, %v3823_v23  ;;  %v3672_v63 = vand.u32 2147483647, %v6665_v2  ;;  %vm3837_vm0 = vcmp.lt.f32.partialorder %v3836_v4, 0.0004427343 }
 0x731   : > { %vm3320_vm15 = vcmp.gt.f32.partialorder %v3278_v61, 0.0  ;;  %v3352_v8 = vmul.f32 0.2, %v3278_v61  ;;  %v3503_v37 = vpop.f32.mrf.mxu3  ;;  %v4085_v25 = vmul.f32 2.0, %v3829_v39  ;;  %v3835_v18 = vmul.f32 %v5193_v48, %v3834_v56 }
 0x732   : > { %v3504_v6 = vadd.f32 %v6568_v27, %v3503_v37  ;;  %v3704_v16 = vsub.f32 0.0, %v3672_v63 }
 0x733   : > { %v3384_v53 = vsel %vm3320_vm15, %v3278_v61, %v3352_v8  ;;  %v4117_v17 = vadd.f32 %v4085_v25, %v3669_v57 }
 0x734   : > { %v5197_v44 = vpop.eup %5196  ;;  %v3573_v38 = vadd.f32 %v3504_v6, %v6326_v41  ;;  %v3403_v20 = vpack.c.bf16 %v3384_v53, %v3383_v46  ;;  %v3742_v50 = vmul.f32 1.442695, %v3704_v16 }
 0x735   : > { %v5199_v24 = vpop.eup %5198  ;;  %v4152_v29 = vsel %vm4148_vm8, %v4117_v17, 0.0  ;;  %v3839_v22 = vadd.f32 1.0, %v5197_v44  ;;  %v3842_v57 = vmul.f32 -0.5, %v5197_v44  ;;  %v3845_v37 = vand.u32 2147483647, %v5197_v44 }
 0x736   : > { %v6680_v7 = vmul.f32 %v6577_v26, %v3573_v38  ;;  %v3280_v60 = vpop.f32.mrf.mxu2  ;;  %3545 = vmatmul.bf16.gmra.mxu3 %v3403_v20  ;;  %4187 = vadd.xlane.f32.xlu1 %v4152_v29  ;;  %v3832_v52 = vmul.f32 0.6931472, %v5199_v24  ;;  %5200 = vpow2.f32 %v3742_v50 }
 0x737   : > { %5202 = vlog2.f32 %v3839_v22  ;;  %v3843_v59 = vadd.f32 1.0, %v3842_v57  ;;  %v3281_v39 = vadd.f32 %v6534_v30, %v3280_v60  ;;  %vm3846_vm1 = vcmp.lt.f32.partialorder %v3845_v37, 0.0004427343 }
 0x738   : > { %3641 = vst [vmem:[%s6585_s17 + $0x38] sm:$0xff] %v6680_v7  ;;  %v3838_v41 = vsel %vm3837_vm0, %v3835_v18, %v3832_v52  ;;  %v3673_v14 = vand.u32 2147483647, %v6680_v7 }
 0x739   : > { %v3506_v23 = vpop.f32.mrf.mxu3  ;;  %v4086_v51 = vmul.f32 2.0, %v3838_v41  ;;  %v3844_v0 = vmul.f32 %v5197_v44, %v3843_v59  ;;  %vm3321_vm2 = vcmp.gt.f32.partialorder %v3281_v39, 0.0 }
 0x73a   : > { %v3507_v48 = vadd.f32 %v6568_v27, %v3506_v23  ;;  %v3705_v61 = vsub.f32 0.0, %v3673_v14 }
 0x73b   : > { %v4118_v8 = vadd.f32 %v4086_v51, %v3670_v54  ;;  %v3353_v54 = vmul.f32 0.2, %v3281_v39 }
 0x73c   : > { %v5201_v25 = vpop.eup %5200  ;;  %v3574_v56 = vadd.f32 %v3507_v48, %v6338_v9  ;;  %v3744_v6 = vmul.f32 1.442695, %v3705_v61 }
 0x73d   : > { %v5203_v16 = vpop.eup %5202  ;;  %v4153_v46 = vsel %vm4148_vm8, %v4118_v8, 0.0  ;;  %v3848_v53 = vadd.f32 1.0, %v5201_v25  ;;  %v3851_v17 = vmul.f32 -0.5, %v5201_v25  ;;  %v3385_v57 = vsel %vm3321_vm2, %v3281_v39, %v3353_v54 }
 0x73e   : > { %v6695_v4 = vmul.f32 %v6577_v26, %v3574_v56  ;;  %v3282_v38 = vpop.f32.mrf.mxu2  ;;  %4189 = vadd.xlane.f32.xlu2 %v4153_v46  ;;  %v3841_v20 = vmul.f32 0.6931472, %v5203_v16  ;;  %5204 = vpow2.f32 %v3744_v6  ;;  %v3854_v51 = vand.u32 2147483647, %v5201_v25 }
 0x73f   : > { %v3283_v50 = vadd.f32 %v6534_v30, %v3282_v38  ;;  %5206 = vlog2.f32 %v3848_v53  ;;  %v3852_v60 = vadd.f32 1.0, %v3851_v17 }
 0x740   : > { %3642 = vst [vmem:[%s6585_s17 + $0x40] sm:$0xff] %v6695_v4  ;;  %v3847_v9 = vsel %vm3846_vm1, %v3844_v0, %v3841_v20  ;;  %v3674_v24 = vand.u32 2147483647, %v6695_v4  ;;  %vm3855_vm4 = vcmp.lt.f32.partialorder %v3854_v51, 0.0004427343 }
 0x741   : > { %vm3322_vm3 = vcmp.gt.f32.partialorder %v3283_v50, 0.0  ;;  %v3354_v29 = vmul.f32 0.2, %v3283_v50  ;;  %v3508_v18 = vpop.f32.mrf.mxu3  ;;  %v4087_v22 = vmul.f32 2.0, %v3847_v9  ;;  %v3853_v6 = vmul.f32 %v5201_v25, %v3852_v60 }
 0x742   : > { %v3509_v52 = vadd.f32 %v6568_v27, %v3508_v18  ;;  %v3706_v44 = vsub.f32 0.0, %v3674_v24 }
 0x743   : > { %v3386_v41 = vsel %vm3322_vm3, %v3283_v50, %v3354_v29  ;;  %v4119_v23 = vadd.f32 %v4087_v22, %v3671_v35  ;;  %vm4277_vm3 = vcmask 7168  }
 0x744   : > { %v5205_v48 = vpop.eup %5204  ;;  %v3575_v59 = vadd.f32 %v3509_v52, %v6341_v12  ;;  %v3404_v61 = vpack.c.bf16 %v3386_v41, %v3385_v57  ;;  %v3746_v8 = vmul.f32 1.442695, %v3706_v44 }
 0x745   : > { %v5207_v37 = vpop.eup %5206  ;;  %v4154_v56 = vsel %vm4148_vm8, %v4119_v23, 0.0  ;;  %v3857_v16 = vadd.f32 1.0, %v5205_v48  ;;  %v3860_v35 = vmul.f32 -0.5, %v5205_v48  ;;  %v3863_v9 = vand.u32 2147483647, %v5205_v48 }
 0x746   : > { %v6710_v46 = vmul.f32 %v6577_v26, %v3575_v59  ;;  %v3285_v39 = vpop.f32.mrf.mxu2  ;;  %3550 = vmatmul.bf16.gmra.mxu3 %v3404_v61  ;;  %4191 = vadd.xlane.f32.xlu2 %v4154_v56  ;;  %v3850_v58 = vmul.f32 0.6931472, %v5207_v37  ;;  %5208 = vpow2.f32 %v3746_v8 }
 0x747   : > { %5210 = vlog2.f32 %v3857_v16  ;;  %v3861_v20 = vadd.f32 1.0, %v3860_v35  ;;  %v3286_v54 = vadd.f32 %v6534_v30, %v3285_v39  ;;  %vm3864_vm5 = vcmp.lt.f32.partialorder %v3863_v9, 0.0004427343 }
 0x748   : > { %3643 = vst [vmem:[%s6585_s17 + $0x48] sm:$0xff] %v6710_v46  ;;  %v3856_v12 = vsel %vm3855_vm4, %v3853_v6, %v3850_v58  ;;  %v3675_v53 = vand.u32 2147483647, %v6710_v46 }
 0x749   : > { %v3511_v17 = vpop.f32.mrf.mxu3  ;;  %v4088_v38 = vmul.f32 2.0, %v3856_v12  ;;  %v3862_v2 = vmul.f32 %v5205_v48, %v3861_v20  ;;  %vm3323_vm6 = vcmp.gt.f32.partialorder %v3286_v54, 0.0 }
 0x74a   : > { %v3512_v25 = vadd.f32 %v6568_v27, %v3511_v17  ;;  %v3707_v0 = vsub.f32 0.0, %v3675_v53 }
 0x74b   : > { %v4120_v50 = vadd.f32 %v4088_v38, %v3672_v63  ;;  %v3355_v63 = vmul.f32 0.2, %v3286_v54 }
 0x74c   : > { %v5209_v29 = vpop.eup %5208  ;;  %v3576_v18 = vadd.f32 %v3512_v25, %v6353_v42  ;;  %v3748_v22 = vmul.f32 1.442695, %v3707_v0 }
 0x74d   : > { %v5211_v60 = vpop.eup %5210  ;;  %v4155_v52 = vsel %vm4148_vm8, %v4120_v50, 0.0  ;;  %v3866_v44 = vadd.f32 1.0, %v5209_v29  ;;  %v3869_v57 = vmul.f32 -0.5, %v5209_v29  ;;  %v3387_v39 = vsel %vm3323_vm6, %v3286_v54, %v3355_v63 }
 0x74e   : > { %v6725_v41 = vmul.f32 %v6577_v26, %v3576_v18  ;;  %v3287_v23 = vpop.f32.mrf.mxu2  ;;  %4193 = vadd.xlane.f32.xlu0 %v4155_v52  ;;  %v3859_v51 = vmul.f32 0.6931472, %v5211_v60  ;;  %5212 = vpow2.f32 %v3748_v22  ;;  %v3872_v35 = vand.u32 2147483647, %v5209_v29 }
 0x74f   : > { %v3288_v59 = vadd.f32 %v6534_v30, %v3287_v23  ;;  %5214 = vlog2.f32 %v3866_v44  ;;  %v3870_v6 = vadd.f32 1.0, %v3869_v57  ;;  %v5338_v23 = vld [vmem:[#allocation6 + $0x5] ss:$0 sm:$0xff] }
 0x750   : > { %3644 = vst [vmem:[%s6585_s17 + $0x50] sm:$0xff] %v6725_v41  ;;  %v3865_v42 = vsel %vm3864_vm5, %v3862_v2, %v3859_v51  ;;  %v3676_v61 = vand.u32 2147483647, %v6725_v41  ;;  %vm3873_vm9 = vcmp.lt.f32.partialorder %v3872_v35, 0.0004427343 }
 0x751   : > { %vm3324_vm7 = vcmp.gt.f32.partialorder %v3288_v59, 0.0  ;;  %v3356_v8 = vmul.f32 0.2, %v3288_v59  ;;  %v3513_v37 = vpop.f32.mrf.mxu3  ;;  %v4089_v56 = vmul.f32 2.0, %v3865_v42  ;;  %v3871_v50 = vmul.f32 %v5209_v29, %v3870_v6 }
 0x752   : > { %v3514_v16 = vadd.f32 %v6568_v27, %v3513_v37  ;;  %v3708_v48 = vsub.f32 0.0, %v3676_v61 }
 0x753   : > { %v3388_v30 = vsel %vm3324_vm7, %v3288_v59, %v3356_v8  ;;  %v4121_v58 = vadd.f32 %v4089_v56, %v3673_v14 }
 0x754   : > { %v5213_v12 = vpop.eup %5212  ;;  %v3577_v17 = vadd.f32 %v3514_v16, %v6356_v43  ;;  %v3405_v38 = vpack.c.bf16 %v3388_v30, %v3387_v39  ;;  %v3750_v25 = vmul.f32 1.442695, %v3708_v48 }
 0x755   : > { %v5215_v20 = vpop.eup %5214  ;;  %v4156_v0 = vsel %vm4148_vm8, %v4121_v58, 0.0  ;;  %v3875_v9 = vadd.f32 1.0, %v5213_v12  ;;  %v3878_v14 = vmul.f32 -0.5, %v5213_v12  ;;  %v3881_v63 = vand.u32 2147483647, %v5213_v12 }
 0x756   : > { %v6740_v18 = vmul.f32 %v6577_v26, %v3577_v17  ;;  %v3290_v54 = vpop.f32.mrf.mxu2  ;;  %3555 = vmatmul.bf16.gmra.mxu3 %v3405_v38  ;;  %4195 = vadd.xlane.f32.xlu1 %v4156_v0  ;;  %v3868_v7 = vmul.f32 0.6931472, %v5215_v20  ;;  %5216 = vpow2.f32 %v3750_v25 }
 0x757   : > { %5218 = vlog2.f32 %v3875_v9  ;;  %v3879_v44 = vadd.f32 1.0, %v3878_v14  ;;  %v3291_v51 = vadd.f32 %v5338_v23, %v3290_v54  ;;  %vm3882_vm10 = vcmp.lt.f32.partialorder %v3881_v63, 0.0004427343 }
 0x758   : > { %3645 = vst [vmem:[%s6585_s17 + $0x58] sm:$0xff] %v6740_v18  ;;  %v3874_v43 = vsel %vm3873_vm9, %v3871_v50, %v3868_v7  ;;  %v3677_v22 = vand.u32 2147483647, %v6740_v18 }
 0x759   : > { %v3516_v60 = vpop.f32.mrf.mxu3  ;;  %v4090_v52 = vmul.f32 2.0, %v3874_v43  ;;  %v3880_v4 = vmul.f32 %v5213_v12, %v3879_v44  ;;  %vm3325_vm11 = vcmp.gt.f32.partialorder %v3291_v51, 0.0 }
 0x75a   : > { %v3517_v29 = vadd.f32 %v6568_v27, %v3516_v60  ;;  %v3709_v57 = vsub.f32 0.0, %v3677_v22 }
 0x75b   : > { %v4122_v2 = vadd.f32 %v4090_v52, %v3674_v24  ;;  %v3357_v24 = vmul.f32 0.2, %v3291_v51 }
 0x75c   : > { %v5217_v59 = vpop.eup %5216  ;;  %v3578_v42 = vadd.f32 %v3517_v29, %v6368_v31  ;;  %v3752_v8 = vmul.f32 1.442695, %v3709_v57 }
 0x75d   : > { %v5219_v37 = vpop.eup %5218  ;;  %v4157_v56 = vsel %vm4148_vm8, %v4122_v2, 0.0  ;;  %v3884_v6 = vadd.f32 1.0, %v5217_v59  ;;  %v3887_v16 = vmul.f32 -0.5, %v5217_v59  ;;  %v3389_v50 = vsel %vm3325_vm11, %v3291_v51, %v3357_v24 }
 0x75e   : > { %v6754_v48 = vmul.f32 %v6577_v26, %v3578_v42  ;;  %v3292_v39 = vpop.f32.mrf.mxu2  ;;  %4197 = vadd.xlane.f32.xlu2 %v4157_v56  ;;  %v3877_v30 = vmul.f32 0.6931472, %v5219_v37  ;;  %5220 = vpow2.f32 %v3752_v8  ;;  %v3890_v7 = vand.u32 2147483647, %v5217_v59 }
 0x75f   : > { %v3293_v58 = vadd.f32 %v5338_v23, %v3292_v39  ;;  %5222 = vlog2.f32 %v3884_v6  ;;  %v3888_v20 = vadd.f32 1.0, %v3887_v16 }
 0x760   : > { %3646 = vst [vmem:[%s6585_s17 + $0x60] sm:$0xff] %v6754_v48  ;;  %v3883_v31 = vsel %vm3882_vm10, %v3880_v4, %v3877_v30  ;;  %v3678_v35 = vand.u32 2147483647, %v6754_v48  ;;  %vm3891_vm13 = vcmp.lt.f32.partialorder %v3890_v7, 0.0004427343 }
 0x761   : > { %vm3326_vm12 = vcmp.gt.f32.partialorder %v3293_v58, 0.0  ;;  %v3358_v17 = vmul.f32 0.2, %v3293_v58  ;;  %v3518_v38 = vpop.f32.mrf.mxu3  ;;  %v4091_v25 = vmul.f32 2.0, %v3883_v31  ;;  %v3889_v57 = vmul.f32 %v5217_v59, %v3888_v20 }
 0x762   : > { %v3519_v0 = vadd.f32 %v6568_v27, %v3518_v38  ;;  %v3710_v12 = vsub.f32 0.0, %v3678_v35 }
 0x763   : > { %v3390_v9 = vsel %vm3326_vm12, %v3293_v58, %v3358_v17  ;;  %v4123_v54 = vadd.f32 %v4091_v25, %v3675_v53 }
 0x764   : > { %v5221_v14 = vpop.eup %5220  ;;  %v3579_v43 = vadd.f32 %v3519_v0, %v6371_v13  ;;  %v3406_v60 = vpack.c.bf16 %v3390_v9, %v3389_v50  ;;  %v3754_v52 = vmul.f32 1.442695, %v3710_v12 }
 0x765   : > { %v5223_v29 = vpop.eup %5222  ;;  %v4158_v44 = vsel %vm4148_vm8, %v4123_v54, 0.0  ;;  %v3893_v23 = vadd.f32 1.0, %v5221_v14  ;;  %v3896_v53 = vmul.f32 -0.5, %v5221_v14  ;;  %v3899_v6 = vand.u32 2147483647, %v5221_v14 }
 0x766   : > { %v6768_v2 = vmul.f32 %v6577_v26, %v3579_v43  ;;  %3560 = vmatmul.bf16.gmra.mxu3 %v3406_v60  ;;  %4199 = vadd.xlane.f32.xlu0 %v4158_v44  ;;  %v3886_v46 = vmul.f32 0.6931472, %v5223_v29  ;;  %5224 = vpow2.f32 %v3754_v52 }
 0x767   : > { %5226 = vlog2.f32 %v3893_v23  ;;  %v3897_v8 = vadd.f32 1.0, %v3896_v53  ;;  %vm3900_vm14 = vcmp.lt.f32.partialorder %v3899_v6, 0.0004427343 }
 0x768   : > { %3647 = vst [vmem:[%s6585_s17 + $0x68] sm:$0xff] %v6768_v2  ;;  %v3892_v13 = vsel %vm3891_vm13, %v3889_v57, %v3886_v46  ;;  %v3679_v51 = vand.u32 2147483647, %v6768_v2 }
 0x769   : > { %v3521_v63 = vpop.f32.mrf.mxu3  ;;  %v4092_v42 = vmul.f32 2.0, %v3892_v13  ;;  %v3898_v25 = vmul.f32 %v5221_v14, %v3897_v8 }
 0x76a   : > { %v3522_v59 = vadd.f32 %v6568_v27, %v3521_v63  ;;  %v3711_v37 = vsub.f32 0.0, %v3679_v51 }
 0x76b   : > { %v4124_v56 = vadd.f32 %v4092_v42, %v3676_v61 }
 0x76c   : > { %v5225_v16 = vpop.eup %5224  ;;  %v3580_v39 = vadd.f32 %v3522_v59, %v6381_v10  ;;  %v3756_v30 = vmul.f32 1.442695, %v3711_v37 }
 0x76d   : > { %v5227_v4 = vpop.eup %5226  ;;  %v4159_v24 = vsel %vm4148_vm8, %v4124_v56, 0.0  ;;  %v3902_v58 = vadd.f32 1.0, %v5225_v16  ;;  %v3905_v31 = vmul.f32 -0.5, %v5225_v16  ;;  %v3908_v54 = vand.u32 2147483647, %v5225_v16 }
 0x76e   : > { %v6782_v17 = vmul.f32 %v6577_v26, %v3580_v39  ;;  %4201 = vadd.xlane.f32.xlu1 %v4159_v24  ;;  %v3895_v38 = vmul.f32 0.6931472, %v5227_v4  ;;  %5228 = vpow2.f32 %v3756_v30 }
 0x76f   : > { %5230 = vlog2.f32 %v3902_v58  ;;  %v3906_v0 = vadd.f32 1.0, %v3905_v31  ;;  %vm3909_vm15 = vcmp.lt.f32.partialorder %v3908_v54, 0.0004427343 }
 0x770   : > { %3648 = vst [vmem:[%s6585_s17 + $0x70] sm:$0xff] %v6782_v17  ;;  %v3901_v41 = vsel %vm3900_vm14, %v3898_v25, %v3895_v38  ;;  %v3680_v10 = vand.u32 2147483647, %v6782_v17 }
 0x771   : > { %v3523_v61 = vpop.f32.mrf.mxu3  ;;  %v4093_v20 = vmul.f32 2.0, %v3901_v41  ;;  %v3907_v29 = vmul.f32 %v5225_v16, %v3906_v0 }
 0x772   : > { %v3524_v12 = vadd.f32 %v6568_v27, %v3523_v61  ;;  %v3712_v50 = vsub.f32 0.0, %v3680_v10 }
 0x773   : > { %v4125_v9 = vadd.f32 %v4093_v20, %v3677_v22 }
 0x774   : > { %v5229_v7 = vpop.eup %5228  ;;  %v3581_v14 = vadd.f32 %v3524_v12, %v6384_v49  ;;  %v3758_v43 = vmul.f32 1.442695, %v3712_v50 }
 0x775   : > { %v5231_v60 = vpop.eup %5230  ;;  %v4160_v52 = vsel %vm4148_vm8, %v4125_v9, 0.0  ;;  %v3911_v44 = vadd.f32 1.0, %v5229_v7  ;;  %v3914_v46 = vmul.f32 -0.5, %v5229_v7  ;;  %v3917_v8 = vand.u32 2147483647, %v5229_v7 }
 0x776   : > { %v6796_v57 = vmul.f32 %v6577_v26, %v3581_v14  ;;  %4203 = vadd.xlane.f32.xlu2 %v4160_v52  ;;  %v3904_v23 = vmul.f32 0.6931472, %v5231_v60  ;;  %5232 = vpow2.f32 %v3758_v43 }
 0x777   : > { %5234 = vlog2.f32 %v3911_v44  ;;  %v3915_v63 = vadd.f32 1.0, %v3914_v46  ;;  %vm3918_vm0 = vcmp.lt.f32.partialorder %v3917_v8, 0.0004427343 }
 0x778   : > { %3649 = vst [vmem:[%s6585_s17 + $0x78] sm:$0xff] %v6796_v57  ;;  %v3910_v18 = vsel %vm3909_vm15, %v3907_v29, %v3904_v23  ;;  %v3681_v49 = vand.u32 2147483647, %v6796_v57 }
 0x779   : > { %v3526_v22 = vpop.f32.mrf.mxu3  ;;  %v4094_v53 = vmul.f32 2.0, %v3910_v18  ;;  %v3916_v31 = vmul.f32 %v5229_v7, %v3915_v63 }
 0x77a   : > { %v3527_v13 = vadd.f32 %v6568_v27, %v3526_v22  ;;  %v3713_v42 = vsub.f32 0.0, %v3681_v49 }
 0x77b   : > { %v4126_v59 = vadd.f32 %v4094_v53, %v3678_v35 }
 0x77c   : > { %v5233_v37 = vpop.eup %5232  ;;  %v3582_v56 = vadd.f32 %v3527_v13, %v6391_v32  ;;  %v3760_v6 = vmul.f32 1.442695, %v3713_v42 }
 0x77d   : > { %v5235_v16 = vpop.eup %5234  ;;  %v4161_v39 = vsel %vm4148_vm8, %v4126_v59, 0.0  ;;  %v3920_v30 = vadd.f32 1.0, %v5233_v37  ;;  %v3923_v4 = vmul.f32 -0.5, %v5233_v37  ;;  %v3926_v0 = vand.u32 2147483647, %v5233_v37 }
 0x77e   : > { %v6810_v24 = vmul.f32 %v6577_v26, %v3582_v56  ;;  %4205 = vadd.xlane.f32.xlu0 %v4161_v39  ;;  %v3913_v58 = vmul.f32 0.6931472, %v5235_v16  ;;  %5236 = vpow2.f32 %v3760_v6 }
 0x77f   : > { %5238 = vlog2.f32 %v3920_v30  ;;  %v3924_v25 = vadd.f32 1.0, %v3923_v4  ;;  %vm3927_vm1 = vcmp.lt.f32.partialorder %v3926_v0, 0.0004427343 }
 0x780   : > { %3650 = vst [vmem:[%s6585_s17 + $0x80] sm:$0xff] %v6810_v24  ;;  %v3919_v48 = vsel %vm3918_vm0, %v3916_v31, %v3913_v58  ;;  %v3682_v32 = vand.u32 2147483647, %v6810_v24 }
 0x781   : > { %v3528_v35 = vpop.f32.mrf.mxu3  ;;  %v4095_v38 = vmul.f32 2.0, %v3919_v48  ;;  %v3925_v14 = vmul.f32 %v5233_v37, %v3924_v25 }
 0x782   : > { %v3529_v41 = vadd.f32 %v6568_v27, %v3528_v35  ;;  %v3714_v61 = vsub.f32 0.0, %v3682_v32 }
 0x783   : > { %v4127_v20 = vadd.f32 %v4095_v38, %v3679_v51 }
 0x784   : > { %v5237_v12 = vpop.eup %5236  ;;  %v3583_v50 = vadd.f32 %v3529_v41, %v6394_v34  ;;  %v3762_v9 = vmul.f32 1.442695, %v3714_v61 }
 0x785   : > { %v5239_v54 = vpop.eup %5238  ;;  %v4162_v7 = vsel %vm4148_vm8, %v4127_v20, 0.0  ;;  %v3929_v43 = vadd.f32 1.0, %v5237_v12  ;;  %v3932_v29 = vmul.f32 -0.5, %v5237_v12  ;;  %v3935_v53 = vand.u32 2147483647, %v5237_v12 }
 0x786   : > { %v6824_v60 = vmul.f32 %v6577_v26, %v3583_v50  ;;  %4207 = vadd.xlane.f32.xlu1 %v4162_v7  ;;  %v3922_v52 = vmul.f32 0.6931472, %v5239_v54  ;;  %5240 = vpow2.f32 %v3762_v9  ;;  %v6863_v50 = vld [vmem:[%s7162_s7] ss:$0 sm:$0xff] }
 0x787   : > { %5242 = vlog2.f32 %v3929_v43  ;;  %v3933_v46 = vadd.f32 1.0, %v3932_v29  ;;  %vm3936_vm2 = vcmp.lt.f32.partialorder %v3935_v53, 0.0004427343 }
 0x788   : > { %3651 = vst [vmem:[%s6585_s17 + $0x88] sm:$0xff] %v6824_v60  ;;  %v3928_v2 = vsel %vm3927_vm1, %v3925_v14, %v3922_v52  ;;  %v3683_v34 = vand.u32 2147483647, %v6824_v60  ;;  %v6871_v52 = vld [vmem:[#allocation9 + $0x2] ss:$0 sm:$0xff] }
 0x789   : > { %v3531_v51 = vpop.f32.mrf.mxu3  ;;  %v4096_v44 = vmul.f32 2.0, %v3928_v2  ;;  %v3934_v17 = vmul.f32 %v5237_v12, %v3933_v46 }
 0x78a   : > { %v3532_v23 = vadd.f32 %v6568_v27, %v3531_v51  ;;  %v3715_v18 = vsub.f32 0.0, %v3683_v34 }
 0x78b   : > { %v4128_v22 = vadd.f32 %v4096_v44, %v3680_v10 }
 0x78c   : > { %v5241_v13 = vpop.eup %5240  ;;  %v3584_v63 = vadd.f32 %v3532_v23, %v6408_v36  ;;  %v3764_v42 = vmul.f32 1.442695, %v3715_v18 }
 0x78d   : > { %v5243_v59 = vpop.eup %5242  ;;  %v4163_v8 = vsel %vm4148_vm8, %v4128_v22, 0.0  ;;  %v3938_v37 = vadd.f32 1.0, %v5241_v13  ;;  %v3941_v56 = vmul.f32 -0.5, %v5241_v13  ;;  %v3944_v38 = vand.u32 2147483647, %v5241_v13 }
 0x78e   : > { %v6838_v6 = vmul.f32 %v6577_v26, %v3584_v63  ;;  %4209 = vadd.xlane.f32.xlu2 %v4163_v8  ;;  %v3931_v16 = vmul.f32 0.6931472, %v5243_v59  ;;  %5244 = vpow2.f32 %v3764_v42 }
 0x78f   : > { %5246 = vlog2.f32 %v3938_v37  ;;  %v3942_v4 = vadd.f32 1.0, %v3941_v56  ;;  %vm3945_vm4 = vcmp.lt.f32.partialorder %v3944_v38, 0.0004427343 }
 0x790   : > { %3652 = vst [vmem:[%s6585_s17 + $0x90] sm:$0xff] %v6838_v6  ;;  %v3937_v36 = vsel %vm3936_vm2, %v3934_v17, %v3931_v16  ;;  %v3684_v10 = vand.u32 2147483647, %v6838_v6 }
 0x791   : > { %v3533_v39 = vpop.f32.mrf.mxu3  ;;  %v4182_v26 = vpop.xlane.xlu0 %4181  ;;  %v4097_v30 = vmul.f32 2.0, %v3937_v36 }
 0x792   : > { %v3534_v58 = vadd.f32 %v6568_v27, %v3533_v39  ;;  %v4245_v31 = vsub.f32 0.0, %v4182_v26  ;;  %v3716_v48 = vsub.f32 0.0, %v3684_v10  ;;  %v3943_v27 = vmul.f32 %v5241_v13, %v3942_v4 }
 0x793   : > { %v4129_v35 = vadd.f32 %v4097_v30, %v3681_v49 }
 0x794   : > { %v5245_v25 = vpop.eup %5244  ;;  %v3585_v41 = vadd.f32 %v3534_v58, %v6411_v62  ;;  %4278 = vst.msk [vmem:[%s6848_s26] sm:$0xff] %vm4277_vm3, %v4245_v31  ;;  %v3766_v61 = vmul.f32 1.442695, %v3716_v48 }
 0x795   : > { %v5247_v20 = vpop.eup %5246  ;;  %v4164_v0 = vsel %vm4148_vm8, %v4129_v35, 0.0  ;;  %v3947_v12 = vadd.f32 1.0, %v5245_v25  ;;  %v3950_v62 = vmul.f32 -0.5, %v5245_v25  ;;  %v3953_v46 = vand.u32 2147483647, %v5245_v25 }
 0x796   : > { %v6866_v57 = vmul.f32 %v6863_v50, %v3585_v41  ;;  %4211 = vadd.xlane.f32.xlu0 %v4164_v0  ;;  %v3940_v49 = vmul.f32 0.6931472, %v5247_v20  ;;  %5248 = vpow2.f32 %v3766_v61 }
 0x797   : > { %5250 = vlog2.f32 %v3947_v12  ;;  %v3951_v51 = vadd.f32 1.0, %v3950_v62  ;;  %vm3954_vm5 = vcmp.lt.f32.partialorder %v3953_v46, 0.0004427343 }
 0x798   : > { %3653 = vst [vmem:[%s6585_s17 + $0x98] sm:$0xff] %v6866_v57  ;;  %v3946_v9 = vsel %vm3945_vm4, %v3943_v27, %v3940_v49  ;;  %v3685_v54 = vand.u32 2147483647, %v6866_v57 }
 0x799   : > { %v3536_v7 = vpop.f32.mrf.mxu3  ;;  %v4184_v14 = vpop.xlane.xlu0 %4183  ;;  %v4098_v43 = vmul.f32 2.0, %v3946_v9 }
 0x79a   : > { %v3537_v29 = vadd.f32 %v6871_v52, %v3536_v7  ;;  %v4246_v2 = vsub.f32 0.0, %v4184_v14  ;;  %v3717_v44 = vsub.f32 0.0, %v3685_v54 }
 0x79b   : > { %v4130_v23 = vadd.f32 %v4098_v43, %v3682_v32  ;;  %v3952_v32 = vmul.f32 %v5245_v25, %v3951_v51 }
 0x79c   : > { %v5249_v18 = vpop.eup %5248  ;;  %v3586_v22 = vadd.f32 %v3537_v29, %v6420_v19  ;;  %4279 = vst.msk [vmem:[%s6848_s26 + $0x8] sm:$0xff] %vm4277_vm3, %v4246_v2  ;;  %v3768_v53 = vmul.f32 1.442695, %v3717_v44 }
 0x79d   : > { %v5251_v13 = vpop.eup %5250  ;;  %v4165_v63 = vsel %vm4148_vm8, %v4130_v23, 0.0  ;;  %v3956_v42 = vadd.f32 1.0, %v5249_v18  ;;  %v3959_v59 = vmul.f32 -0.5, %v5249_v18  ;;  %v3962_v58 = vand.u32 2147483647, %v5249_v18 }
 0x79e   : > { %v6884_v8 = vmul.f32 %v6863_v50, %v3586_v22  ;;  %4213 = vadd.xlane.f32.xlu1 %v4165_v63  ;;  %v3949_v24 = vmul.f32 0.6931472, %v5251_v13  ;;  %5252 = vpow2.f32 %v3768_v53 }
 0x79f   : > { %5254 = vlog2.f32 %v3956_v42  ;;  %v3960_v36 = vadd.f32 1.0, %v3959_v59  ;;  %vm3963_vm6 = vcmp.lt.f32.partialorder %v3962_v58, 0.0004427343 }
 0x7a0   : > { %3654 = vst [vmem:[%s6585_s17 + $0xa0] sm:$0xff] %v6884_v8  ;;  %v3955_v19 = vsel %vm3954_vm5, %v3952_v32, %v3949_v24  ;;  %v3686_v37 = vand.u32 2147483647, %v6884_v8 }
 0x7a1   : > { %v3538_v56 = vpop.f32.mrf.mxu3  ;;  %v4186_v16 = vpop.xlane.xlu1 %4185  ;;  %v4099_v17 = vmul.f32 2.0, %v3955_v19  ;;  %v3961_v41 = vmul.f32 %v5249_v18, %v3960_v36 }
 0x7a2   : > { %v3539_v39 = vadd.f32 %v6871_v52, %v3538_v56  ;;  %v4247_v26 = vsub.f32 0.0, %v4186_v16  ;;  %v3718_v30 = vsub.f32 0.0, %v3686_v37 }
 0x7a3   : > { %v4131_v4 = vadd.f32 %v4099_v17, %v3683_v34 }
 0x7a4   : > { %v5253_v31 = vpop.eup %5252  ;;  %v3587_v48 = vadd.f32 %v3539_v39, %v6423_v21  ;;  %4280 = vst.msk [vmem:[%s6848_s26 + $0x10] sm:$0xff] %vm4277_vm3, %v4247_v26  ;;  %v3770_v35 = vmul.f32 1.442695, %v3718_v30 }
 0x7a5   : > { %v5255_v38 = vpop.eup %5254  ;;  %v4166_v25 = vsel %vm4148_vm8, %v4131_v4, 0.0  ;;  %v3965_v61 = vadd.f32 1.0, %v5253_v31  ;;  %v3968_v34 = vmul.f32 -0.5, %v5253_v31  ;;  %v3971_v29 = vand.u32 2147483647, %v5253_v31 }
 0x7a6   : > { %v6900_v20 = vmul.f32 %v6863_v50, %v3587_v48  ;;  %4215 = vadd.xlane.f32.xlu2 %v4166_v25  ;;  %v3958_v60 = vmul.f32 0.6931472, %v5255_v38  ;;  %5256 = vpow2.f32 %v3770_v35 }
 0x7a7   : > { %5258 = vlog2.f32 %v3965_v61  ;;  %v3969_v7 = vadd.f32 1.0, %v3968_v34  ;;  %vm3972_vm7 = vcmp.lt.f32.partialorder %v3971_v29, 0.0004427343 }
 0x7a8   : > { %3655 = vst [vmem:[%s6585_s17 + $0xa8] sm:$0xff] %v6900_v20  ;;  %v3964_v21 = vsel %vm3963_vm6, %v3961_v41, %v3958_v60  ;;  %v3687_v0 = vand.u32 2147483647, %v6900_v20 }
 0x7a9   : > { %v3541_v27 = vpop.f32.mrf.mxu3  ;;  %v4188_v12 = vpop.xlane.xlu1 %4187  ;;  %v4100_v49 = vmul.f32 2.0, %v3964_v21 }
 0x7aa   : > { %v3542_v62 = vadd.f32 %v6871_v52, %v3541_v27  ;;  %v4248_v9 = vsub.f32 0.0, %v4188_v12  ;;  %v3719_v14 = vsub.f32 0.0, %v3687_v0 }
 0x7ab   : > { %v4132_v43 = vadd.f32 %v4100_v49, %v3684_v10  ;;  %v3970_v10 = vmul.f32 %v5253_v31, %v3969_v7 }
 0x7ac   : > { %v5257_v2 = vpop.eup %5256  ;;  %v3588_v51 = vadd.f32 %v3542_v62, %v6435_v1  ;;  %4281 = vst.msk [vmem:[%s6848_s26 + $0x18] sm:$0xff] %vm4277_vm3, %v4248_v9  ;;  %v3772_v44 = vmul.f32 1.442695, %v3719_v14 }
 0x7ad   : > { %v5259_v23 = vpop.eup %5258  ;;  %v4167_v46 = vsel %vm4148_vm8, %v4132_v43, 0.0  ;;  %v3974_v18 = vadd.f32 1.0, %v5257_v2  ;;  %v3977_v22 = vmul.f32 -0.5, %v5257_v2  ;;  %v3980_v17 = vand.u32 2147483647, %v5257_v2 }
 0x7ae   : > { %v6916_v53 = vmul.f32 %v6863_v50, %v3588_v51  ;;  %4217 = vadd.xlane.f32.xlu0 %v4167_v46  ;;  %v3967_v6 = vmul.f32 0.6931472, %v5259_v23  ;;  %5260 = vpow2.f32 %v3772_v44 }
 0x7af   : > { %5262 = vlog2.f32 %v3974_v18  ;;  %v3978_v24 = vadd.f32 1.0, %v3977_v22  ;;  %vm3981_vm9 = vcmp.lt.f32.partialorder %v3980_v17, 0.0004427343 }
 0x7b0   : > { %3656 = vst [vmem:[%s6585_s17 + $0xb0] sm:$0xff] %v6916_v53  ;;  %v3973_v1 = vsel %vm3972_vm7, %v3970_v10, %v3967_v6  ;;  %v3688_v13 = vand.u32 2147483647, %v6916_v53 }
 0x7b1   : > { %v3543_v63 = vpop.f32.mrf.mxu3  ;;  %v4190_v42 = vpop.xlane.xlu2 %4189  ;;  %v4101_v59 = vmul.f32 2.0, %v3973_v1  ;;  %v3979_v58 = vmul.f32 %v5257_v2, %v3978_v24 }
 0x7b2   : > { %v3544_v32 = vadd.f32 %v6871_v52, %v3543_v63  ;;  %v4249_v19 = vsub.f32 0.0, %v4190_v42  ;;  %v3720_v56 = vsub.f32 0.0, %v3688_v13 }
 0x7b3   : > { %v4133_v16 = vadd.f32 %v4101_v59, %v3685_v54 }
 0x7b4   : > { %v5261_v36 = vpop.eup %5260  ;;  %v3589_v39 = vadd.f32 %v3544_v32, %v6438_v3  ;;  %4282 = vst.msk [vmem:[%s6848_s26 + $0x20] sm:$0xff] %vm4277_vm3, %v4249_v19  ;;  %v3774_v26 = vmul.f32 1.442695, %v3720_v56 }
 0x7b5   : > { %v5263_v30 = vpop.eup %5262  ;;  %v4168_v4 = vsel %vm4148_vm8, %v4133_v16, 0.0  ;;  %v3983_v31 = vadd.f32 1.0, %v5261_v36  ;;  %v3986_v54 = vmul.f32 -0.5, %v5261_v36  ;;  %v3989_v12 = vand.u32 2147483647, %v5261_v36 }
 0x7b6   : > { %v6932_v48 = vmul.f32 %v6863_v50, %v3589_v39  ;;  %4219 = vadd.xlane.f32.xlu1 %v4168_v4  ;;  %v3976_v57 = vmul.f32 0.6931472, %v5263_v30  ;;  %5264 = vpow2.f32 %v3774_v26 }
 0x7b7   : > { %5266 = vlog2.f32 %v3983_v31  ;;  %v3987_v34 = vadd.f32 1.0, %v3986_v54  ;;  %vm3990_vm10 = vcmp.lt.f32.partialorder %v3989_v12, 0.0004427343 }
 0x7b8   : > { %3657 = vst [vmem:[%s6585_s17 + $0xb8] sm:$0xff] %v6932_v48  ;;  %v3982_v3 = vsel %vm3981_vm9, %v3979_v58, %v3976_v57  ;;  %v3689_v35 = vand.u32 2147483647, %v6932_v48 }
 0x7b9   : > { %v3546_v38 = vpop.f32.mrf.mxu3  ;;  %v4192_v25 = vpop.xlane.xlu2 %4191  ;;  %v4102_v41 = vmul.f32 2.0, %v3982_v3 }
 0x7ba   : > { %v3547_v61 = vadd.f32 %v6871_v52, %v3546_v38  ;;  %v4250_v60 = vsub.f32 0.0, %v4192_v25  ;;  %v3721_v21 = vsub.f32 0.0, %v3689_v35 }
 0x7bb   : > { %v4134_v27 = vadd.f32 %v4102_v41, %v3686_v37  ;;  %v3988_v37 = vmul.f32 %v5261_v36, %v3987_v34 }
 0x7bc   : > { %v5265_v49 = vpop.eup %5264  ;;  %v3590_v62 = vadd.f32 %v3547_v61, %v6447_v55  ;;  %4283 = vst.msk [vmem:[%s6848_s26 + $0x28] sm:$0xff] %vm4277_vm3, %v4250_v60  ;;  %v3776_v9 = vmul.f32 1.442695, %v3721_v21 }
 0x7bd   : > { %v5267_v7 = vpop.eup %5266  ;;  %v4169_v14 = vsel %vm4148_vm8, %v4134_v27, 0.0  ;;  %v3992_v43 = vadd.f32 1.0, %v5265_v49  ;;  %v3995_v29 = vmul.f32 -0.5, %v5265_v49  ;;  %v3998_v63 = vand.u32 2147483647, %v5265_v49 }
 0x7be   : > { %v6948_v2 = vmul.f32 %v6863_v50, %v3590_v62  ;;  %4221 = vadd.xlane.f32.xlu2 %v4169_v14  ;;  %v3985_v8 = vmul.f32 0.6931472, %v5267_v7  ;;  %5268 = vpow2.f32 %v3776_v9 }
 0x7bf   : > { %5270 = vlog2.f32 %v3992_v43  ;;  %v3996_v18 = vadd.f32 1.0, %v3995_v29  ;;  %vm3999_vm11 = vcmp.lt.f32.partialorder %v3998_v63, 0.0004427343 }
 0x7c0   : > { %3658 = vst [vmem:[%s6585_s17 + $0xc0] sm:$0xff] %v6948_v2  ;;  %v3991_v55 = vsel %vm3990_vm10, %v3988_v37, %v3985_v8  ;;  %v3690_v51 = vand.u32 2147483647, %v6948_v2 }
 0x7c1   : > { %v3548_v44 = vpop.f32.mrf.mxu3  ;;  %v4194_v23 = vpop.xlane.xlu0 %4193  ;;  %v4103_v46 = vmul.f32 2.0, %v3991_v55  ;;  %v3997_v56 = vmul.f32 %v5265_v49, %v3996_v18 }
 0x7c2   : > { %v3549_v22 = vadd.f32 %v6871_v52, %v3548_v44  ;;  %v4251_v6 = vsub.f32 0.0, %v4194_v23  ;;  %v3722_v10 = vsub.f32 0.0, %v3690_v51 }
 0x7c3   : > { %v4135_v1 = vadd.f32 %v4103_v46, %v3687_v0 }
 0x7c4   : > { %v5269_v42 = vpop.eup %5268  ;;  %v3591_v59 = vadd.f32 %v3549_v22, %v6450_v28  ;;  %4284 = vst.msk [vmem:[%s6848_s26 + $0x30] sm:$0xff] %vm4277_vm3, %v4251_v6  ;;  %v3778_v24 = vmul.f32 1.442695, %v3722_v10 }
 0x7c5   : > { %v5271_v32 = vpop.eup %5270  ;;  %v4170_v19 = vsel %vm4148_vm8, %v4135_v1, 0.0  ;;  %v4001_v16 = vadd.f32 1.0, %v5269_v42  ;;  %v4004_v0 = vmul.f32 -0.5, %v5269_v42  ;;  %v4007_v3 = vand.u32 2147483647, %v5269_v42 }
 0x7c6   : > { %v6964_v17 = vmul.f32 %v6863_v50, %v3591_v59  ;;  %4223 = vadd.xlane.f32.xlu0 %v4170_v19  ;;  %v3994_v20 = vmul.f32 0.6931472, %v5271_v32  ;;  %5272 = vpow2.f32 %v3778_v24 }
 0x7c7   : > { %5274 = vlog2.f32 %v4001_v16  ;;  %v4005_v31 = vadd.f32 1.0, %v4004_v0  ;;  %vm4008_vm12 = vcmp.lt.f32.partialorder %v4007_v3, 0.0004427343 }
 0x7c8   : > { %3659 = vst [vmem:[%s6585_s17 + $0xc8] sm:$0xff] %v6964_v17  ;;  %v4000_v28 = vsel %vm3999_vm11, %v3997_v56, %v3994_v20  ;;  %v3691_v36 = vand.u32 2147483647, %v6964_v17 }
 0x7c9   : > { %v3551_v39 = vpop.f32.mrf.mxu3  ;;  %v4196_v26 = vpop.xlane.xlu1 %4195  ;;  %v4104_v30 = vmul.f32 2.0, %v4000_v28 }
 0x7ca   : > { %v3552_v4 = vadd.f32 %v6871_v52, %v3551_v39  ;;  %v4252_v58 = vsub.f32 0.0, %v4196_v26  ;;  %v3723_v57 = vsub.f32 0.0, %v3691_v36 }
 0x7cb   : > { %v4136_v54 = vadd.f32 %v4104_v30, %v3688_v13  ;;  %v4006_v13 = vmul.f32 %v5269_v42, %v4005_v31 }
 0x7cc   : > { %v5273_v38 = vpop.eup %5272  ;;  %v3592_v25 = vadd.f32 %v3552_v4, %v6462_v40  ;;  %4285 = vst.msk [vmem:[%s6848_s26 + $0x38] sm:$0xff] %vm4277_vm3, %v4252_v58  ;;  %v3780_v41 = vmul.f32 1.442695, %v3723_v57 }
 0x7cd   : > { %v5275_v61 = vpop.eup %5274  ;;  %v4171_v60 = vsel %vm4148_vm8, %v4136_v54, 0.0  ;;  %v4010_v34 = vadd.f32 1.0, %v5273_v38  ;;  %v4013_v21 = vmul.f32 -0.5, %v5273_v38  ;;  %v4016_v37 = vand.u32 2147483647, %v5273_v38 }
 0x7ce   : > { %v6980_v27 = vmul.f32 %v6863_v50, %v3592_v25  ;;  %4225 = vadd.xlane.f32.xlu1 %v4171_v60  ;;  %v4003_v53 = vmul.f32 0.6931472, %v5275_v61  ;;  %5276 = vpow2.f32 %v3780_v41 }
 0x7cf   : > { %5278 = vlog2.f32 %v4010_v34  ;;  %v4014_v7 = vadd.f32 1.0, %v4013_v21  ;;  %vm4017_vm13 = vcmp.lt.f32.partialorder %v4016_v37, 0.0004427343 }
 0x7d0   : > { %3660 = vst [vmem:[%s6585_s17 + $0xd0] sm:$0xff] %v6980_v27  ;;  %v4009_v40 = vsel %vm4008_vm12, %v4006_v13, %v4003_v53  ;;  %v3692_v12 = vand.u32 2147483647, %v6980_v27 }
 0x7d1   : > { %v3553_v49 = vpop.f32.mrf.mxu3  ;;  %v4198_v62 = vpop.xlane.xlu2 %4197  ;;  %v4105_v9 = vmul.f32 2.0, %v4009_v40  ;;  %v4015_v22 = vmul.f32 %v5273_v38, %v4014_v7 }
 0x7d2   : > { %v3554_v14 = vadd.f32 %v6871_v52, %v3553_v49  ;;  %v4253_v43 = vsub.f32 0.0, %v4198_v62  ;;  %v3724_v29 = vsub.f32 0.0, %v3692_v12 }
 0x7d3   : > { %v4137_v8 = vadd.f32 %v4105_v9, %v3689_v35 }
 0x7d4   : > { %v5277_v55 = vpop.eup %5276  ;;  %v3593_v44 = vadd.f32 %v3554_v14, %v6465_v15  ;;  %4286 = vst.msk [vmem:[%s6848_s26 + $0x40] sm:$0xff] %vm4277_vm3, %v4253_v43  ;;  %v3782_v23 = vmul.f32 1.442695, %v3724_v29 }
 0x7d5   : > { %v5279_v46 = vpop.eup %5278  ;;  %v4172_v18 = vsel %vm4148_vm8, %v4137_v8, 0.0  ;;  %v4019_v6 = vadd.f32 1.0, %v5277_v55  ;;  %v4022_v35 = vmul.f32 -0.5, %v5277_v55  ;;  %v4025_v20 = vand.u32 2147483647, %v5277_v55 }
 0x7d6   : > { %v6996_v10 = vmul.f32 %v6863_v50, %v3593_v44  ;;  %4227 = vadd.xlane.f32.xlu2 %v4172_v18  ;;  %v4012_v48 = vmul.f32 0.6931472, %v5279_v46  ;;  %5280 = vpow2.f32 %v3782_v23 }
 0x7d7   : > { %5282 = vlog2.f32 %v4019_v6  ;;  %v4023_v19 = vadd.f32 1.0, %v4022_v35  ;;  %vm4026_vm14 = vcmp.lt.f32.partialorder %v4025_v20, 0.0004427343 }
 0x7d8   : > { %3661 = vst [vmem:[%s6585_s17 + $0xd8] sm:$0xff] %v6996_v10  ;;  %v4018_v15 = vsel %vm4017_vm13, %v4015_v22, %v4012_v48  ;;  %v3693_v1 = vand.u32 2147483647, %v6996_v10 }
 0x7d9   : > { %v3556_v63 = vpop.f32.mrf.mxu3  ;;  %v4200_v42 = vpop.xlane.xlu0 %4199  ;;  %v4106_v59 = vmul.f32 2.0, %v4018_v15 }
 0x7da   : > { %v3557_v24 = vadd.f32 %v6871_v52, %v3556_v63  ;;  %v4254_v32 = vsub.f32 0.0, %v4200_v42  ;;  %v3725_v56 = vsub.f32 0.0, %v3693_v1 }
 0x7db   : > { %v4138_v16 = vadd.f32 %v4106_v59, %v3690_v51  ;;  %v4024_v51 = vmul.f32 %v5277_v55, %v4023_v19 }
 0x7dc   : > { %v5281_v0 = vpop.eup %5280  ;;  %v3594_v28 = vadd.f32 %v3557_v24, %v6477_v33  ;;  %4287 = vst.msk [vmem:[%s6848_s26 + $0x48] sm:$0xff] %vm4277_vm3, %v4254_v32  ;;  %v3784_v39 = vmul.f32 1.442695, %v3725_v56 }
 0x7dd   : > { %v5283_v26 = vpop.eup %5282  ;;  %v4173_v30 = vsel %vm4148_vm8, %v4138_v16, 0.0  ;;  %v4028_v4 = vadd.f32 1.0, %v5281_v0  ;;  %v4031_v58 = vmul.f32 -0.5, %v5281_v0  ;;  %v4034_v21 = vand.u32 2147483647, %v5281_v0 }
 0x7de   : > { %v7012_v31 = vmul.f32 %v6863_v50, %v3594_v28  ;;  %4229 = vadd.xlane.f32.xlu0 %v4173_v30  ;;  %v4021_v2 = vmul.f32 0.6931472, %v5283_v26  ;;  %5284 = vpow2.f32 %v3784_v39 }
 0x7df   : > { %5286 = vlog2.f32 %v4028_v4  ;;  %v4032_v25 = vadd.f32 1.0, %v4031_v58  ;;  %vm4035_vm15 = vcmp.lt.f32.partialorder %v4034_v21, 0.0004427343 }
 0x7e0   : > { %3662 = vst [vmem:[%s6585_s17 + $0xe0] sm:$0xff] %v7012_v31  ;;  %v4027_v33 = vsel %vm4026_vm14, %v4024_v51, %v4021_v2  ;;  %v3694_v57 = vand.u32 2147483647, %v7012_v31 }
 0x7e1   : > { %v3558_v54 = vpop.f32.mrf.mxu3  ;;  %v4202_v3 = vpop.xlane.xlu1 %4201  ;;  %v4107_v38 = vmul.f32 2.0, %v4027_v33  ;;  %v4033_v9 = vmul.f32 %v5281_v0, %v4032_v25 }
 0x7e2   : > { %v3559_v41 = vadd.f32 %v6871_v52, %v3558_v54  ;;  %v4255_v61 = vsub.f32 0.0, %v4202_v3  ;;  %v3726_v60 = vsub.f32 0.0, %v3694_v57 }
 0x7e3   : > { %v4139_v34 = vadd.f32 %v4107_v38, %v3691_v36 }
 0x7e4   : > { %v5285_v53 = vpop.eup %5284  ;;  %v3595_v13 = vadd.f32 %v3559_v41, %v6480_v5  ;;  %4288 = vst.msk [vmem:[%s6848_s26 + $0x50] sm:$0xff] %vm4277_vm3, %v4255_v61  ;;  %v3786_v40 = vmul.f32 1.442695, %v3726_v60 }
 0x7e5   : > { %v5287_v49 = vpop.eup %5286  ;;  %v4174_v62 = vsel %vm4148_vm8, %v4139_v34, 0.0  ;;  %v4037_v7 = vadd.f32 1.0, %v5285_v53  ;;  %v4040_v36 = vmul.f32 -0.5, %v5285_v53  ;;  %v4043_v22 = vand.u32 2147483647, %v5285_v53 }
 0x7e6   : > { %v7028_v14 = vmul.f32 %v6863_v50, %v3595_v13  ;;  %4231 = vadd.xlane.f32.xlu1 %v4174_v62  ;;  %v4030_v17 = vmul.f32 0.6931472, %v5287_v49  ;;  %5288 = vpow2.f32 %v3786_v40 }
 0x7e7   : > { %5290 = vlog2.f32 %v4037_v7  ;;  %v4041_v23 = vadd.f32 1.0, %v4040_v36  ;;  %vm4044_vm0 = vcmp.lt.f32.partialorder %v4043_v22, 0.0004427343 }
 0x7e8   : > { %3663 = vst [vmem:[%s6585_s17 + $0xe8] sm:$0xff] %v7028_v14  ;;  %v4036_v5 = vsel %vm4035_vm15, %v4033_v9, %v4030_v17  ;;  %v3695_v43 = vand.u32 2147483647, %v7028_v14 }
 0x7e9   : > { %v3561_v29 = vpop.f32.mrf.mxu3  ;;  %v4204_v8 = vpop.xlane.xlu2 %4203  ;;  %v4108_v37 = vmul.f32 2.0, %v4036_v5 }
 0x7ea   : > { %v3562_v55 = vadd.f32 %v6871_v52, %v3561_v29  ;;  %v4256_v44 = vsub.f32 0.0, %v4204_v8  ;;  %v3727_v46 = vsub.f32 0.0, %v3695_v43 }
 0x7eb   : > { %v4140_v18 = vadd.f32 %v4108_v37, %v3692_v12  ;;  %v4042_v12 = vmul.f32 %v5285_v53, %v4041_v23 }
 0x7ec   : > { %v5289_v6 = vpop.eup %5288  ;;  %v3596_v48 = vadd.f32 %v3562_v55, %v6489_v47  ;;  %4289 = vst.msk [vmem:[%s6848_s26 + $0x58] sm:$0xff] %vm4277_vm3, %v4256_v44  ;;  %v3788_v35 = vmul.f32 1.442695, %v3727_v46 }
 0x7ed   : > { %v5291_v15 = vpop.eup %5290  ;;  %v4175_v63 = vsel %vm4148_vm8, %v4140_v18, 0.0  ;;  %v4046_v42 = vadd.f32 1.0, %v5289_v6  ;;  %v4049_v59 = vmul.f32 -0.5, %v5289_v6  ;;  %v4052_v30 = vand.u32 2147483647, %v5289_v6 }
 0x7ee   : > { %v7044_v24 = vmul.f32 %v6863_v50, %v3596_v48  ;;  %4233 = vadd.xlane.f32.xlu2 %v4175_v63  ;;  %v4039_v27 = vmul.f32 0.6931472, %v5291_v15  ;;  %5292 = vpow2.f32 %v3788_v35 }
 0x7ef   : > { %5294 = vlog2.f32 %v4046_v42  ;;  %v4050_v20 = vadd.f32 1.0, %v4049_v59  ;;  %vm4053_vm1 = vcmp.lt.f32.partialorder %v4052_v30, 0.0004427343 }
 0x7f0   : > { %3664 = vst [vmem:[%s6585_s17 + $0xf0] sm:$0xff] %v7044_v24  ;;  %v4045_v47 = vsel %vm4044_vm0, %v4042_v12, %v4039_v27  ;;  %v3696_v32 = vand.u32 2147483647, %v7044_v24 }
 0x7f1   : > { %v3563_v19 = vpop.f32.mrf.mxu3  ;;  %v4206_v56 = vpop.xlane.xlu0 %4205  ;;  %v4109_v16 = vmul.f32 2.0, %v4045_v47 }
 0x7f2   : > { %v3564_v0 = vadd.f32 %v6871_v52, %v3563_v19  ;;  %v4257_v28 = vsub.f32 0.0, %v4206_v56  ;;  %v3728_v39 = vsub.f32 0.0, %v3696_v32  ;;  %v4051_v52 = vmul.f32 %v5289_v6, %v4050_v20 }
 0x7f3   : > { %v4141_v26 = vadd.f32 %v4109_v16, %v3693_v1 }
 0x7f4   : > { %v5293_v4 = vpop.eup %5292  ;;  %v3597_v58 = vadd.f32 %v3564_v0, %v6492_v11  ;;  %4290 = vst.msk [vmem:[%s6848_s26 + $0x60] sm:$0xff] %vm4277_vm3, %v4257_v28  ;;  %v3790_v2 = vmul.f32 1.442695, %v3728_v39 }
 0x7f5   : > { %v5295_v51 = vpop.eup %5294  ;;  %v4176_v33 = vsel %vm4148_vm8, %v4141_v26, 0.0  ;;  %v4055_v54 = vadd.f32 1.0, %v5293_v4  ;;  %v4058_v1 = vmul.f32 -0.5, %v5293_v4  ;;  %v4061_v21 = vand.u32 2147483647, %v5293_v4 }
 0x7f6   : > { %v7060_v3 = vmul.f32 %v6863_v50, %v3597_v58  ;;  %4235 = vadd.xlane.f32.xlu0 %v4176_v33  ;;  %v4048_v10 = vmul.f32 0.6931472, %v5295_v51  ;;  %5296 = vpow2.f32 %v3790_v2 }
 0x7f7   : > { %5298 = vlog2.f32 %v4055_v54  ;;  %v4059_v60 = vadd.f32 1.0, %v4058_v1  ;;  %vm4062_vm2 = vcmp.lt.f32.partialorder %v4061_v21, 0.0004427343 }
 0x7f8   : > { %3665 = vst [vmem:[%s6585_s17 + $0xf8] sm:$0xff] %v7060_v3  ;;  %v4054_v11 = vsel %vm4053_vm1, %v4051_v52, %v4048_v10  ;;  %v3697_v38 = vand.u32 2147483647, %v7060_v3 }
 0x7f9   : > { %v4208_v25 = vpop.xlane.xlu1 %4207  ;;  %v4110_v41 = vmul.f32 2.0, %v4054_v11  ;;  %v4060_v7 = vmul.f32 %v5293_v4, %v4059_v60 }
 0x7fa   : > { %v4258_v61 = vsub.f32 0.0, %v4208_v25  ;;  %v3729_v50 = vsub.f32 0.0, %v3697_v38 }
 0x7fb   : > { %v4142_v34 = vadd.f32 %v4110_v41, %v3694_v57 }
 0x7fc   : > { %v5297_v53 = vpop.eup %5296  ;;  %4291 = vst.msk [vmem:[%s6848_s26 + $0x68] sm:$0xff] %vm4277_vm3, %v4258_v61  ;;  %v3792_v13 = vmul.f32 1.442695, %v3729_v50 }
 0x7fd   : > { %v5299_v40 = vpop.eup %5298  ;;  %v4177_v49 = vsel %vm4148_vm8, %v4142_v34, 0.0  ;;  %v4064_v62 = vadd.f32 1.0, %v5297_v53  ;;  %v4067_v17 = vmul.f32 -0.5, %v5297_v53  ;;  %v4070_v37 = vand.u32 2147483647, %v5297_v53 }
 0x7fe   : > { %4237 = vadd.xlane.f32.xlu1 %v4177_v49  ;;  %v4057_v9 = vmul.f32 0.6931472, %v5299_v40  ;;  %5300 = vpow2.f32 %v3792_v13 }
 0x7ff   : > { %5302 = vlog2.f32 %v4064_v62  ;;  %v4068_v29 = vadd.f32 1.0, %v4067_v17  ;;  %vm4071_vm4 = vcmp.lt.f32.partialorder %v4070_v37, 0.0004427343 }
 0x800   : > { %v4063_v31 = vsel %vm4062_vm2, %v4060_v7, %v4057_v9 }
 0x801   : > { %v4210_v57 = vpop.xlane.xlu2 %4209  ;;  %v4111_v36 = vmul.f32 2.0, %v4063_v31  ;;  %v4069_v22 = vmul.f32 %v5297_v53, %v4068_v29 }
 0x802   : > { %v4259_v5 = vsub.f32 0.0, %v4210_v57 }
 0x803   : > { %v4143_v8 = vadd.f32 %v4111_v36, %v3695_v43 }
 0x804   : > { %v5301_v55 = vpop.eup %5300  ;;  %4292 = vst.msk [vmem:[%s6848_s26 + $0x70] sm:$0xff] %vm4277_vm3, %v4259_v5 }
 0x805   : > { %v5303_v44 = vpop.eup %5302  ;;  %v4178_v23 = vsel %vm4148_vm8, %v4143_v8, 0.0  ;;  %v4073_v46 = vadd.f32 1.0, %v5301_v55  ;;  %v4076_v6 = vmul.f32 -0.5, %v5301_v55  ;;  %v4079_v42 = vand.u32 2147483647, %v5301_v55 }
 0x806   : > { %4239 = vadd.xlane.f32.xlu2 %v4178_v23  ;;  %v4066_v18 = vmul.f32 0.6931472, %v5303_v44 }
 0x807   : > { %5304 = vlog2.f32 %v4073_v46  ;;  %v4077_v15 = vadd.f32 1.0, %v4076_v6 }
 0x808   : > { %v4072_v48 = vsel %vm4071_vm4, %v4069_v22, %v4066_v18 }
 0x809   : > { %v4212_v14 = vpop.xlane.xlu0 %4211  ;;  %v4112_v43 = vmul.f32 2.0, %v4072_v48  ;;  %v4078_v47 = vmul.f32 %v5301_v55, %v4077_v15 }
 0x80a   : > { %v4260_v35 = vsub.f32 0.0, %v4212_v14 }
 0x80b   : > { %v4144_v63 = vadd.f32 %v4112_v43, %v3696_v32 }
 0x80c   : > { %4293 = vst.msk [vmem:[%s6848_s26 + $0x78] sm:$0xff] %vm4277_vm3, %v4260_v35 }
 0x80d   : > { %v5305_v59 = vpop.eup %5304  ;;  %v4179_v27 = vsel %vm4148_vm8, %v4144_v63, 0.0 }
 0x80e   : > { %4241 = vadd.xlane.f32.xlu0 %v4179_v27  ;;  %v4075_v12 = vmul.f32 0.6931472, %v5305_v59 }
 0x80f   : > { %5488 = shalt.err (!%p5485_p8)
}
 0x810   : > { %s5546_s18 = smov 128   ;;  %s5547_s25 = smov 8   ;;  %vm4080_vm5 = vcmp.lt.f32.partialorder %v4079_v42, 0.0004427343 }
 0x811   : > { %5094 = dma.vmem_to_hbm [thread:$0]  (%p5636_p5), %s4329_s11, 4096, %s4331_s15, %s4311_s13, %s5546_s18, %s5546_s18, %s5547_s25   ;;  %v4081_v24 = vsel %vm4080_vm5, %v4078_v47, %v4075_v12  ;;  %v4214_v32 = vpop.xlane.xlu1 %4213 }
 0x812   : > { %v4113_v19 = vmul.f32 2.0, %v4081_v24  ;;  %v4261_v56 = vsub.f32 0.0, %v4214_v32 }
 0x814   : > { %v4145_v16 = vadd.f32 %v4113_v19, %v3697_v38  ;;  %4294 = vst.msk [vmem:[%s6848_s26 + $0x80] sm:$0xff] %vm4277_vm3, %v4261_v56 }
 0x816   : > { %v4180_v20 = vsel %vm4148_vm8, %v4145_v16, 0.0 }
 0x817   : > { %4243 = vadd.xlane.f32.xlu1 %v4180_v20 }
 0x819   : > { %v4216_v0 = vpop.xlane.xlu2 %4215 }
 0x81a   : > { %v4262_v28 = vsub.f32 0.0, %v4216_v0 }
 0x81c   : > { %4295 = vst.msk [vmem:[%s6848_s26 + $0x88] sm:$0xff] %vm4277_vm3, %v4262_v28 }
 0x821   : > { %v4218_v39 = vpop.xlane.xlu0 %4217 }
 0x822   : > { %v4263_v26 = vsub.f32 0.0, %v4218_v39 }
 0x824   : > { %4296 = vst.msk [vmem:[%s6848_s26 + $0x90] sm:$0xff] %vm4277_vm3, %v4263_v26 }
 0x829   : > { %v4220_v30 = vpop.xlane.xlu1 %4219 }
 0x82a   : > { %v4264_v4 = vsub.f32 0.0, %v4220_v30 }
 0x82c   : > { %4297 = vst.msk [vmem:[%s6848_s26 + $0x98] sm:$0xff] %vm4277_vm3, %v4264_v4 }
 0x831   : > { %v4222_v58 = vpop.xlane.xlu2 %4221 }
 0x832   : > { %v4265_v45 = vsub.f32 0.0, %v4222_v58 }
 0x834   : > { %4298 = vst.msk [vmem:[%s6848_s26 + $0xa0] sm:$0xff] %vm4277_vm3, %v4265_v45 }
 0x839   : > { %v4224_v2 = vpop.xlane.xlu0 %4223 }
 0x83a   : > { %v4266_v51 = vsub.f32 0.0, %v4224_v2 }
 0x83c   : > { %4299 = vst.msk [vmem:[%s6848_s26 + $0xa8] sm:$0xff] %vm4277_vm3, %v4266_v51 }
 0x841   : > { %v4226_v33 = vpop.xlane.xlu1 %4225 }
 0x842   : > { %v4267_v52 = vsub.f32 0.0, %v4226_v33 }
 0x844   : > { %4300 = vst.msk [vmem:[%s6848_s26 + $0xb0] sm:$0xff] %vm4277_vm3, %v4267_v52 }
 0x849   : > { %v4228_v54 = vpop.xlane.xlu2 %4227 }
 0x84a   : > { %v4268_v3 = vsub.f32 0.0, %v4228_v54 }
 0x84c   : > { %4301 = vst.msk [vmem:[%s6848_s26 + $0xb8] sm:$0xff] %vm4277_vm3, %v4268_v3 }
 0x851   : > { %v4230_v10 = vpop.xlane.xlu0 %4229 }
 0x852   : > { %v4269_v1 = vsub.f32 0.0, %v4230_v10 }
 0x854   : > { %4302 = vst.msk [vmem:[%s6848_s26 + $0xc0] sm:$0xff] %vm4277_vm3, %v4269_v1 }
 0x859   : > { %v4232_v11 = vpop.xlane.xlu1 %4231 }
 0x85a   : > { %v4270_v38 = vsub.f32 0.0, %v4232_v11 }
 0x85c   : > { %4303 = vst.msk [vmem:[%s6848_s26 + $0xc8] sm:$0xff] %vm4277_vm3, %v4270_v38 }
 0x861   : > { %v4234_v25 = vpop.xlane.xlu2 %4233 }
 0x862   : > { %v4271_v41 = vsub.f32 0.0, %v4234_v25 }
 0x864   : > { %4304 = vst.msk [vmem:[%s6848_s26 + $0xd0] sm:$0xff] %vm4277_vm3, %v4271_v41 }
 0x869   : > { %v4236_v61 = vpop.xlane.xlu0 %4235 }
 0x86a   : > { %v4272_v60 = vsub.f32 0.0, %v4236_v61 }
 0x86c   : > { %4305 = vst.msk [vmem:[%s6848_s26 + $0xd8] sm:$0xff] %vm4277_vm3, %v4272_v60 }
 0x871   : > { %v4238_v50 = vpop.xlane.xlu1 %4237 }
 0x872   : > { %v4273_v34 = vsub.f32 0.0, %v4238_v50 }
 0x874   : > { %4306 = vst.msk [vmem:[%s6848_s26 + $0xe0] sm:$0xff] %vm4277_vm3, %v4273_v34 }
 0x879   : > { %v4240_v21 = vpop.xlane.xlu2 %4239 }
 0x87a   : > { %v4274_v53 = vsub.f32 0.0, %v4240_v21 }
 0x87c   : > { %4307 = vst.msk [vmem:[%s6848_s26 + $0xe8] sm:$0xff] %vm4277_vm3, %v4274_v53 }
 0x881   : > { %v4242_v13 = vpop.xlane.xlu0 %4241 }
 0x882   : > { %v4275_v40 = vsub.f32 0.0, %v4242_v13 }
 0x884   : > { %4308 = vst.msk [vmem:[%s6848_s26 + $0xf0] sm:$0xff] %vm4277_vm3, %v4275_v40 }
 0x88a   : > { %v4244_v49 = vpop.xlane.xlu1 %4243 }
 0x88b   : > { %v4276_v62 = vsub.f32 0.0, %v4244_v49 }
 0x88d   : > { %4309 = vst.msk [vmem:[%s6848_s26 + $0xf8] sm:$0xff] %vm4277_vm3, %v4276_v62 }
 0x88e PF: > { %p5121_p5 = scmp.ge.s32.totalorder %s5535_s12, 2  ;;  %s4349_s2 = sand.u32 1, %s5523_s30  }
 0x88f   : > { %s4350_s4 = scalar_lea.sflag [#allocation5], %s4349_s2 }
 0x890   : > { %p5110_p9 = pnand %p5121_p5, %p5640_p6 }
 0x892   : > { %p5111_p10 = pneg %p5110_p9 }
 0x894   : > { %5518 = dma.done.wait (%p5111_p10), %s4350_s4, 4096  }
 0x895   : > { %5520 = vsyncadd (%p5111_p10), %s4350_s4, 4294963200  ;;  %s7182_s12 = sld [smem:[#allocation17_spill]]  ;;  %s7185_s30 = smov %s5527_s10 }
 0x896   : > { %s7183_s29 = sld [smem:[#allocation16_spill]] }
 0x897   : > { %s7184_s11 = sld [smem:[#allocation18_spill]] }
 0x89b   : > { %p23_p11 = scmp.ge.s32.totalorder %s7182_s12, 4  }
 0x89c   : > { %s7186_s10 = smov %s7183_s29 }
 0x89d   :  { %25 = sbr.rel (!%p23_p11) target bundleno = 9 (0x9), region = 134 }
 0x8a2   :  { %4364 = vsyncpa [#allocation4], 1 }
 0x8a3   :  { %4366 = vsyncpa [#allocation4 + $0x1], 1 }
 0x8a4   :  { %4367 = vsyncpa [#allocation7], 1 }
 0x8a5   :  { %4368 = vsyncpa [#allocation10], 1 }
 0x8a6   :  { %4369 = vsyncpa [#allocation5], 1 }
 0x8a7   :  { %4371 = vsyncpa [#allocation5 + $0x1], 1 }

</bundles_post_ra>
